<compile_context>
chip_gen: v7x
topology: tpu7x:2x2x1
jax: 0.10.0
libtpu: 0.0.40
codegen_flags: <defaults>
</compile_context>

<pallas_src>
import functools

import jax
import jax.numpy as jnp
from jax.experimental import pallas as pl
from jax.experimental.pallas import tpu as pltpu


_LANE = 128
_EPS = 1e-5  # torch.nn.BatchNorm2d default eps


def _round_up(x, m):
    return (x + m - 1) // m * m


def _pick_row_tile(h, bytes_per_row, fixed_bytes, budget=28 << 20, max_rows=128):
    """Largest divisor-of-H row tile whose VMEM footprint fits `budget`."""
    divisors = [t for t in range(1, h + 1) if h % t == 0]
    fitting = [t for t in divisors if fixed_bytes + t * bytes_per_row <= budget]
    if not fitting:
        # TODO(synk): also tile the output-channel axis for layers whose
        # resident weight alone exceeds the budget (very deep UNet stages).
        fitting = [1]
    capped = [t for t in fitting if t <= max_rows] or [min(fitting)]
    return max(capped)


def _vmem_limit(footprint_bytes):
    # Derived from the actual tile footprint (not a hard-coded 32 MiB); capped
    # below v7x's 64 MiB physical VMEM (plenty of headroom on v5e/v6e 128 MiB).
    return int(min(max(2 * footprint_bytes + (8 << 20), 32 << 20), 64 << 20))


# ---------------------------------------------------------------------------
# Fused [BN+ReLU of producer (optional)] -> 3x3 conv -> raw output + BN stats.
# ---------------------------------------------------------------------------
def _conv_bn_stats_kernel(*refs, preact):
    if preact:
        xm_ref, xt_ref, xb_ref, w_ref, sc_ref, sh_ref, y_ref, st_ref = refs
    else:
        xm_ref, xt_ref, xb_ref, w_ref, y_ref, st_ref = refs
        sc_ref = sh_ref = None

    _, th, w_img, cpi = xm_ref.shape
    cpo = w_ref.shape[1]
    r = pl.program_id(1)
    last = pl.num_programs(1) - 1

    # (TH+2, W, Cpi) row window: halo row above, TH main rows, halo row below.
    rows = jnp.concatenate([xt_ref[0], xm_ref[0], xb_ref[0]], axis=0)

    if preact:
        # Fused BatchNorm+ReLU of the producer layer (per-channel scale/shift
        # precomputed in the wrapper from the reduced statistics).
        sc = sc_ref[...].reshape(1, 1, cpi)
        sh = sh_ref[...].reshape(1, 1, cpi)
        act = jnp.maximum(rows.astype(jnp.float32) * sc + sh, 0.0)
        act = act.astype(jnp.bfloat16)
    else:
        act = rows

    # Zero the halo rows that fall outside the image (SAME zero padding).
    row_id = jax.lax.broadcasted_iota(jnp.int32, (th + 2, 1, 1), 0)
    keep = jnp.logical_and(jnp.logical_or(row_id != 0, r != 0),
                           jnp.logical_or(row_id != th + 1, r != last))
    act = act * keep.astype(act.dtype)

    # Column-shifted copies (zero column halo): only 3 sublane relayouts total.
    zc = jnp.zeros((th + 2, 1, cpi), act.dtype)
    c_left = jnp.concatenate([zc, act[:, : w_img - 1, :]], axis=1)   # kw = 0
    c_mid = act                                                      # kw = 1
    c_right = jnp.concatenate([act[:, 1:, :], zc], axis=1)           # kw = 2
    cols = (c_left, c_mid, c_right)

    # im2col slab lives only in VMEM: lane-concat of 9 taps -> (TH*W, 9*Cpi),
    # then one big-K MXU matmul for the whole tile.
    taps = [cols[kw][kh:kh + th] for kh in range(3) for kw in range(3)]
    patch = jnp.concatenate(taps, axis=-1).reshape(th * w_img, 9 * cpi)

    acc = jnp.dot(patch, w_ref[...], preferred_element_type=jnp.float32)
    y_ref[0] = acc.reshape(th, w_img, cpo).astype(y_ref.dtype)

    # Per-tile BatchNorm partial stats, two direct stores (no concatenate).
    st_ref[0, 0, 0:1, :] = jnp.sum(acc, axis=0, keepdims=True)
    st_ref[0, 0, 1:2, :] = jnp.sum(acc * acc, axis=0, keepdims=True)


def _conv3x3_bn_stats(x, w_flat, scale=None, shift=None):
    """x: (N, H, W, Cpi) bf16 (raw previous conv output, or padded input);
    w_flat: (9*Cpi, Cpo) bf16.  If scale/shift (1, Cpi) f32 are given, the
    previous layer's BatchNorm+ReLU is fused into the input path.
    Returns raw conv output (N, H, W, Cpo) bf16 and stats (N, R, 2, Cpo) f32."""
    n, h, w_img, cpi = x.shape
    k, cpo = w_flat.shape
    assert k == 9 * cpi
    preact = scale is not None

    w_bytes = k * cpo * 2
    bytes_per_row = w_img * (cpi * (2 * 2 + 4 + 2)      # 2x-buffered input + temps
                             + cpo * (2 * 2 + 4)        # 2x-buffered output + f32 acc
                             + 9 * cpi * 2)             # VMEM patch slab
    fixed_bytes = w_bytes + 4 * w_img * cpi * 2 + 4 * cpo * 4 + (1 << 20)
    th = _pick_row_tile(h, bytes_per_row, fixed_bytes)
    r_steps = h // th

    in_specs = [
        pl.BlockSpec((1, th, w_img, cpi), lambda i, r: (i, r, 0, 0)),
        # +/-1 row halo via two extra 1-row views of the same array (clamped
        # index maps; out-of-image rows are zeroed inside the kernel).
        pl.BlockSpec((1, 1, w_img, cpi),
                     lambda i, r: (i, jnp.maximum(r * th - 1, 0), 0, 0)),
        pl.BlockSpec((1, 1, w_img, cpi),
                     lambda i, r: (i, jnp.minimum((r + 1) * th, h - 1), 0, 0)),
        pl.BlockSpec((k, cpo), lambda i, r: (0, 0)),    # resident weight
    ]
    inputs = [x, x, x, w_flat]
    if preact:
        in_specs += [pl.BlockSpec((1, cpi), lambda i, r: (0, 0)),
                     pl.BlockSpec((1, cpi), lambda i, r: (0, 0))]
        inputs += [scale, shift]

    out_shape = (jax.ShapeDtypeStruct((n, h, w_img, cpo), jnp.bfloat16),
                 jax.ShapeDtypeStruct((n, r_steps, 2, cpo), jnp.float32))
    out_specs = (pl.BlockSpec((1, th, w_img, cpo), lambda i, r: (i, r, 0, 0)),
                 pl.BlockSpec((1, 1, 2, cpo), lambda i, r: (i, r, 0, 0)))

    footprint = fixed_bytes + th * bytes_per_row
    return pl.pallas_call(
        functools.partial(_conv_bn_stats_kernel, preact=preact),
        out_shape=out_shape,
        grid_spec=pltpu.PrefetchScalarGridSpec(
            num_scalar_prefetch=0,
            grid=(n, r_steps),
            in_specs=in_specs,
            out_specs=out_specs,
        ),
        compiler_params=pltpu.CompilerParams(
            dimension_semantics=("parallel", "parallel"),
            vmem_limit_bytes=_vmem_limit(footprint),
        ),
    )(*inputs)


# ---------------------------------------------------------------------------
# Final BatchNorm+ReLU apply (layer 2 has no downstream consumer to fuse into).
# ---------------------------------------------------------------------------
def _bn_relu_kernel(y_ref, sc_ref, sh_ref, o_ref):
    cpo = y_ref.shape[-1]
    yv = y_ref[...].astype(jnp.float32)
    sc = sc_ref[...].reshape(1, 1, 1, cpo)
    sh = sh_ref[...].reshape(1, 1, 1, cpo)
    o_ref[...] = jnp.maximum(yv * sc + sh, 0.0).astype(o_ref.dtype)


def _bn_relu_apply(y, scale, shift, out_dtype):
    n, h, w_img, cpo = y.shape
    out_isz = jnp.dtype(out_dtype).itemsize
    bytes_per_row = w_img * cpo * (2 * 2 + 2 * out_isz + 4)
    th = _pick_row_tile(h, bytes_per_row, 4 * cpo * 4 + (1 << 20))
    footprint = 4 * cpo * 4 + th * bytes_per_row
    return pl.pallas_call(
        _bn_relu_kernel,
        out_shape=jax.ShapeDtypeStruct((n, h, w_img, cpo), out_dtype),
        grid_spec=pltpu.PrefetchScalarGridSpec(
            num_scalar_prefetch=0,
            grid=(n, h // th),
            in_specs=[
                pl.BlockSpec((1, th, w_img, cpo), lambda i, r: (i, r, 0, 0)),
                pl.BlockSpec((1, cpo), lambda i, r: (0, 0)),
                pl.BlockSpec((1, cpo), lambda i, r: (0, 0)),
            ],
            out_specs=pl.BlockSpec((1, th, w_img, cpo), lambda i, r: (i, r, 0, 0)),
        ),
        compiler_params=pltpu.CompilerParams(
            dimension_semantics=("parallel", "parallel"),
            vmem_limit_bytes=_vmem_limit(footprint),
        ),
    )(y, scale, shift)


# ---------------------------------------------------------------------------
# Wrapper glue.
# ---------------------------------------------------------------------------
def _scale_shift(partial_stats, gamma, beta, count):
    """Reduce per-tile [sum, sumsq] partials into per-channel BN scale/shift
    (training-mode batch statistics, biased variance, like torch BatchNorm2d)."""
    tot = jnp.sum(partial_stats, axis=(0, 1))             # (2, Cpo)
    mean = tot[0] / count
    # TODO(synk): E[x^2]-E[x]^2 in f32 can lose precision for huge counts;
    # switch to Welford-style partials if BN accuracy ever matters here.
    var = jnp.maximum(tot[1] / count - mean * mean, 0.0)
    scale = gamma * jax.lax.rsqrt(var + _EPS)
    shift = beta - mean * scale
    return (scale.reshape(1, -1).astype(jnp.float32),
            shift.reshape(1, -1).astype(jnp.float32))


def double_conv(x_nchw, params):
    # TODO(synk): BatchNorm running_mean/running_var buffer updates (training
    # side effect) are not emitted; only the forward activation is produced.
    n, cin, h, w_img = x_nchw.shape
    cout = params["w1"].shape[-1]
    cpi1 = _round_up(cin, _LANE)     # first-layer input lanes (zero padded)
    cp = _round_up(cout, _LANE)      # channel width kept end-to-end between layers

    # NCHW -> NHWC once at the boundary.
    # TODO(synk): drop the two boundary transposes if the surrounding model can
    # produce/consume NHWC activations directly.
    x = jnp.transpose(x_nchw, (0, 2, 3, 1))
    x = jnp.pad(x, ((0, 0), (0, 0), (0, 0), (0, cpi1 - cin))).astype(jnp.bfloat16)

    w1 = jnp.pad(params["w1"], ((0, 0), (0, 0), (0, cpi1 - cin), (0, cp - cout)))
    w1 = w1.reshape(9 * cpi1, cp).astype(jnp.bfloat16)
    w2 = jnp.pad(params["w2"], ((0, 0), (0, 0), (0, cp - cout), (0, cp - cout)))
    w2 = w2.reshape(9 * cp, cp).astype(jnp.bfloat16)
    g1 = jnp.pad(params["gamma1"].astype(jnp.float32), (0, cp - cout))
    b1 = jnp.pad(params["beta1"].astype(jnp.float32), (0, cp - cout))
    g2 = jnp.pad(params["gamma2"].astype(jnp.float32), (0, cp - cout))
    b2 = jnp.pad(params["beta2"].astype(jnp.float32), (0, cp - cout))

    count = float(n * h * w_img)

    # Layer 1: conv only (raw output + BN partial stats); its BN+ReLU is fused
    # into layer 2's input path.
    y1, st1 = _conv3x3_bn_stats(x, w1)
    sc1, sh1 = _scale_shift(st1, g1, b1, count)

    # Layer 2: fused BN1+ReLU on the input tile, then conv (raw output + stats).
    y2, st2 = _conv3x3_bn_stats(y1, w2, sc1, sh1)
    sc2, sh2 = _scale_shift(st2, g2, b2, count)

    # Final BN2+ReLU apply; padded channels are sliced off and layout restored
    # to NCHW only here, at the very end.
    a2 = _bn_relu_apply(y2, sc2, sh2, jnp.float32)
    return jnp.transpose(a2[..., :cout], (0, 3, 1, 2)).astype(x_nchw.dtype)


double_conv_jit = jax.jit(double_conv)


# Pure-JAX f32 reference for correctness checking.
def _reference(x_nchw, params):
    def conv(x, w_hwio):
        return jax.lax.conv_general_dilated(
            x, w_hwio, window_strides=(1, 1), padding="SAME",
            dimension_numbers=("NCHW", "HWIO", "NCHW"))

    def bn_relu_ref(y, gamma, beta):
        mean = jnp.mean(y, axis=(0, 2, 3), keepdims=True)
        var = jnp.var(y, axis=(0, 2, 3), keepdims=True)
        g = gamma.reshape(1, -1, 1, 1)
        b = beta.reshape(1, -1, 1, 1)
        return jnp.maximum((y - mean) * jax.lax.rsqrt(var + _EPS) * g + b, 0.0)

    y = bn_relu_ref(conv(x_nchw, params["w1"]), params["gamma1"], params["beta1"])
    y = bn_relu_ref(conv(y, params["w2"]), params["gamma2"], params["beta2"])
    return y


if __name__ == "__main__":
    key = jax.random.PRNGKey(0)
    kx, k1, k2, kg1, kb1, kg2, kb2 = jax.random.split(key, 7)
    N, Cin, H, W = 2, 4, 16, 16
    Cout = 8

    x = jax.random.normal(kx, (N, Cin, H, W), jnp.float32)
    params = {
        "w1": 0.1 * jax.random.normal(k1, (3, 3, Cin, Cout), jnp.float32),
        "gamma1": 1.0 + 0.1 * jax.random.normal(kg1, (Cout,), jnp.float32),
        "beta1": 0.1 * jax.random.normal(kb1, (Cout,), jnp.float32),
        "w2": 0.1 * jax.random.normal(k2, (3, 3, Cout, Cout), jnp.float32),
        "gamma2": 1.0 + 0.1 * jax.random.normal(kg2, (Cout,), jnp.float32),
        "beta2": 0.1 * jax.random.normal(kb2, (Cout,), jnp.float32),
    }

    out = jax.block_until_ready(double_conv_jit(x, params))
    ref = _reference(x, params)
    assert out.shape == (N, Cout, H, W), out.shape
    # Kernel path runs activations in bf16 (f32 accumulation/statistics);
    # tolerance is loosened accordingly vs. the all-f32 reference.
    max_err = float(jnp.max(jnp.abs(out - ref)))
    assert jnp.allclose(out, ref, atol=1e-1, rtol=1e-1), max_err
    print("KERNEL_OK")
</pallas_src>

<mosaic_0001>
module attributes {stable_mosaic.version = 11 : i64} {
  func.func @_conv_bn_stats_kernel(%arg0: i32, %arg1: i32, %arg2: memref<1x16x16x128xbf16, #tpu.memory_space<vmem>>, %arg3: memref<1x1x16x128xbf16, #tpu.memory_space<vmem>>, %arg4: memref<1x1x16x128xbf16, #tpu.memory_space<vmem>>, %arg5: memref<1152x128xbf16, #tpu.memory_space<vmem>>, %arg6: memref<1x16x16x128xbf16, #tpu.memory_space<vmem>>, %arg7: memref<1x1x2x128xf32, #tpu.memory_space<vmem>>) attributes {dimension_semantics = [#tpu.dimension_semantics<parallel>, #tpu.dimension_semantics<parallel>], iteration_bounds = array<i64: 2, 1>, scalar_prefetch = 0 : i64, scratch_operands = 0 : i64, tpu.core_type = #tpu.core_type<tc>, window_params = [{transform_indices = @transform_0, window_bounds = array<i64: 1, 16, 16, 128>}, {transform_indices = @transform_1, window_bounds = array<i64: 1, 1, 16, 128>}, {transform_indices = @transform_2, window_bounds = array<i64: 1, 1, 16, 128>}, {pipeline_mode = #tpu.pipeline_mode<synchronous>, transform_indices = @transform_3, window_bounds = array<i64: 1152, 128>}, {transform_indices = @transform_4, window_bounds = array<i64: 1, 16, 16, 128>}, {transform_indices = @transform_5, window_bounds = array<i64: 1, 1, 2, 128>}]} {
    %c0 = arith.constant 0 : index
    %c0_0 = arith.constant 0 : index
    %c0_1 = arith.constant 0 : index
    %c0_2 = arith.constant 0 : index
    %0 = vector.load %arg3[%c0, %c0_0, %c0_1, %c0_2] : memref<1x1x16x128xbf16, #tpu.memory_space<vmem>>, vector<1x1x16x128xbf16>
    %1 = vector.shape_cast %0 : vector<1x1x16x128xbf16> to vector<1x16x128xbf16>
    %c0_3 = arith.constant 0 : index
    %c0_4 = arith.constant 0 : index
    %c0_5 = arith.constant 0 : index
    %c0_6 = arith.constant 0 : index
    %2 = vector.load %arg2[%c0_3, %c0_4, %c0_5, %c0_6] : memref<1x16x16x128xbf16, #tpu.memory_space<vmem>>, vector<1x16x16x128xbf16>
    %3 = vector.shape_cast %2 : vector<1x16x16x128xbf16> to vector<16x16x128xbf16>
    %c0_7 = arith.constant 0 : index
    %c0_8 = arith.constant 0 : index
    %c0_9 = arith.constant 0 : index
    %c0_10 = arith.constant 0 : index
    %4 = vector.load %arg4[%c0_7, %c0_8, %c0_9, %c0_10] : memref<1x1x16x128xbf16, #tpu.memory_space<vmem>>, vector<1x1x16x128xbf16>
    %5 = vector.shape_cast %4 : vector<1x1x16x128xbf16> to vector<1x16x128xbf16>
    %6 = tpu.concatenate %1, %3, %5 in 0 : vector<1x16x128xbf16>, vector<16x16x128xbf16>, vector<1x16x128xbf16> -> vector<18x16x128xbf16>
    %7 = tpu.iota {dimensions = array<i32: 0>} : vector<18x1x1xi32>
    %c0_i32 = arith.constant 0 : i32
    %8 = vector.broadcast %c0_i32 : i32 to vector<18x1x1xi32>
    %9 = arith.cmpi ne, %7, %8 : vector<18x1x1xi32>
    %c0_i32_11 = arith.constant 0 : i32
    %10 = arith.cmpi ne, %arg1, %c0_i32_11 : i32
    %11 = vector.broadcast %10 : i1 to vector<18x1x1xi1>
    %12 = arith.ori %9, %11 : vector<18x1x1xi1>
    %c17_i32 = arith.constant 17 : i32
    %13 = vector.broadcast %c17_i32 : i32 to vector<18x1x1xi32>
    %14 = arith.cmpi ne, %7, %13 : vector<18x1x1xi32>
    %c0_i32_12 = arith.constant 0 : i32
    %15 = arith.cmpi ne, %arg1, %c0_i32_12 : i32
    %16 = vector.broadcast %15 : i1 to vector<18x1x1xi1>
    %17 = arith.ori %14, %16 : vector<18x1x1xi1>
    %18 = arith.andi %12, %17 : vector<18x1x1xi1>
    %19 = arith.extui %18 : vector<18x1x1xi1> to vector<18x1x1xi32>
    %20 = arith.sitofp %19 : vector<18x1x1xi32> to vector<18x1x1xf32>
    %21 = arith.truncf %20 : vector<18x1x1xf32> to vector<18x1x1xbf16>
    %22 = vector.broadcast %21 : vector<18x1x1xbf16> to vector<18x16x128xbf16>
    %23 = arith.mulf %6, %22 : vector<18x16x128xbf16>
    %cst = arith.constant 0.000000e+00 : bf16
    %24 = vector.broadcast %cst : bf16 to vector<18x1x128xbf16>
    %25 = vector.extract_strided_slice %23 {offsets = [0, 0, 0], sizes = [18, 15, 128], strides = [1, 1, 1]} : vector<18x16x128xbf16> to vector<18x15x128xbf16>
    %26 = tpu.concatenate %24, %25 in 1 : vector<18x1x128xbf16>, vector<18x15x128xbf16> -> vector<18x16x128xbf16>
    %27 = vector.extract_strided_slice %23 {offsets = [0, 1, 0], sizes = [18, 15, 128], strides = [1, 1, 1]} : vector<18x16x128xbf16> to vector<18x15x128xbf16>
    %28 = tpu.concatenate %27, %24 in 1 : vector<18x15x128xbf16>, vector<18x1x128xbf16> -> vector<18x16x128xbf16>
    %29 = vector.extract_strided_slice %26 {offsets = [0, 0, 0], sizes = [16, 16, 128], strides = [1, 1, 1]} : vector<18x16x128xbf16> to vector<16x16x128xbf16>
    %30 = vector.extract_strided_slice %23 {offsets = [0, 0, 0], sizes = [16, 16, 128], strides = [1, 1, 1]} : vector<18x16x128xbf16> to vector<16x16x128xbf16>
    %31 = vector.extract_strided_slice %28 {offsets = [0, 0, 0], sizes = [16, 16, 128], strides = [1, 1, 1]} : vector<18x16x128xbf16> to vector<16x16x128xbf16>
    %32 = vector.extract_strided_slice %26 {offsets = [1, 0, 0], sizes = [16, 16, 128], strides = [1, 1, 1]} : vector<18x16x128xbf16> to vector<16x16x128xbf16>
    %33 = vector.extract_strided_slice %23 {offsets = [1, 0, 0], sizes = [16, 16, 128], strides = [1, 1, 1]} : vector<18x16x128xbf16> to vector<16x16x128xbf16>
    %34 = vector.extract_strided_slice %28 {offsets = [1, 0, 0], sizes = [16, 16, 128], strides = [1, 1, 1]} : vector<18x16x128xbf16> to vector<16x16x128xbf16>
    %35 = vector.extract_strided_slice %26 {offsets = [2, 0, 0], sizes = [16, 16, 128], strides = [1, 1, 1]} : vector<18x16x128xbf16> to vector<16x16x128xbf16>
    %36 = vector.extract_strided_slice %23 {offsets = [2, 0, 0], sizes = [16, 16, 128], strides = [1, 1, 1]} : vector<18x16x128xbf16> to vector<16x16x128xbf16>
    %37 = vector.extract_strided_slice %28 {offsets = [2, 0, 0], sizes = [16, 16, 128], strides = [1, 1, 1]} : vector<18x16x128xbf16> to vector<16x16x128xbf16>
    %38 = tpu.concatenate %29, %30, %31, %32, %33, %34, %35, %36, %37 in 2 : vector<16x16x128xbf16>, vector<16x16x128xbf16>, vector<16x16x128xbf16>, vector<16x16x128xbf16>, vector<16x16x128xbf16>, vector<16x16x128xbf16>, vector<16x16x128xbf16>, vector<16x16x128xbf16>, vector<16x16x128xbf16> -> vector<16x16x1152xbf16>
    %39 = vector.shape_cast %38 : vector<16x16x1152xbf16> to vector<256x1152xbf16>
    %c0_13 = arith.constant 0 : index
    %c0_14 = arith.constant 0 : index
    %40 = vector.load %arg5[%c0_13, %c0_14] : memref<1152x128xbf16, #tpu.memory_space<vmem>>, vector<1152x128xbf16>
    %cst_15 = arith.constant dense<0.000000e+00> : vector<256x128xf32>
    %41 = tpu.matmul %39, %40, %cst_15 {dimension_numbers = #tpu.dot_dimension_numbers<[1], [0], [0], [1], [0, 0, 1, 1], [], []>} : vector<256x1152xbf16>, vector<1152x128xbf16>, vector<256x128xf32> -> vector<256x128xf32>
    %42 = vector.shape_cast %41 : vector<256x128xf32> to vector<16x16x128xf32>
    %43 = arith.truncf %42 : vector<16x16x128xf32> to vector<16x16x128xbf16>
    %c0_16 = arith.constant 0 : index
    %c0_17 = arith.constant 0 : index
    %c0_18 = arith.constant 0 : index
    %c0_19 = arith.constant 0 : index
    %44 = vector.load %arg6[%c0_16, %c0_17, %c0_18, %c0_19] : memref<1x16x16x128xbf16, #tpu.memory_space<vmem>>, vector<1x16x16x128xbf16>
    %45 = vector.shape_cast %44 : vector<1x16x16x128xbf16> to vector<16x16x128xbf16>
    %46 = vector.shape_cast %43 : vector<16x16x128xbf16> to vector<1x16x16x128xbf16>
    tpu.vector_store %arg6[%c0_16, %c0_17, %c0_18, %c0_19], %46 {strides = array<i32>} : memref<1x16x16x128xbf16, #tpu.memory_space<vmem>>, vector<1x16x16x128xbf16>,
    %cst_20 = arith.constant dense<0.000000e+00> : vector<128xf32>
    %47 = vector.multi_reduction <add>, %41, %cst_20 [0] : vector<256x128xf32> to vector<128xf32>
    %48 = vector.shape_cast %47 : vector<128xf32> to vector<1x128xf32>
    %c0_21 = arith.constant 0 : index
    %c0_22 = arith.constant 0 : index
    %c0_23 = arith.constant 0 : index
    %c0_24 = arith.constant 0 : index
    %49 = vector.load %arg7[%c0_21, %c0_22, %c0_23, %c0_24] : memref<1x1x2x128xf32, #tpu.memory_space<vmem>>, vector<1x1x1x128xf32>
    %50 = vector.shape_cast %49 : vector<1x1x1x128xf32> to vector<1x128xf32>
    %51 = vector.shape_cast %48 : vector<1x128xf32> to vector<1x1x1x128xf32>
    tpu.vector_store %arg7[%c0_21, %c0_22, %c0_23, %c0_24], %51 {strides = array<i32>} : memref<1x1x2x128xf32, #tpu.memory_space<vmem>>, vector<1x1x1x128xf32>,
    %52 = arith.mulf %41, %41 : vector<256x128xf32>
    %cst_25 = arith.constant dense<0.000000e+00> : vector<128xf32>
    %53 = vector.multi_reduction <add>, %52, %cst_25 [0] : vector<256x128xf32> to vector<128xf32>
    %54 = vector.shape_cast %53 : vector<128xf32> to vector<1x128xf32>
    %c0_26 = arith.constant 0 : index
    %c0_27 = arith.constant 0 : index
    %c1 = arith.constant 1 : index
    %c0_28 = arith.constant 0 : index
    %55 = vector.load %arg7[%c0_26, %c0_27, %c1, %c0_28] : memref<1x1x2x128xf32, #tpu.memory_space<vmem>>, vector<1x1x1x128xf32>
    %56 = vector.shape_cast %55 : vector<1x1x1x128xf32> to vector<1x128xf32>
    %57 = vector.shape_cast %54 : vector<1x128xf32> to vector<1x1x1x128xf32>
    tpu.vector_store %arg7[%c0_26, %c0_27, %c1, %c0_28], %57 {strides = array<i32>} : memref<1x1x2x128xf32, #tpu.memory_space<vmem>>, vector<1x1x1x128xf32>,
    return
  }
  func.func @transform_0(%arg0: i32, %arg1: i32) -> (i32, i32, i32, i32) {
    %c0_i32 = arith.constant 0 : i32
    %c0_i32_0 = arith.constant 0 : i32
    %c0_i32_1 = arith.constant 0 : i32
    return %arg0, %arg1, %c0_i32, %c0_i32_0 : i32, i32, i32, i32
  }
  func.func @transform_1(%arg0: i32, %arg1: i32) -> (i32, i32, i32, i32) {
    %c16_i32 = arith.constant 16 : i32
    %0 = arith.muli %arg1, %c16_i32 : i32
    %c1_i32 = arith.constant 1 : i32
    %1 = arith.subi %0, %c1_i32 : i32
    %c0_i32 = arith.constant 0 : i32
    %2 = arith.maxsi %1, %c0_i32 : i32
    %c0_i32_0 = arith.constant 0 : i32
    %c0_i32_1 = arith.constant 0 : i32
    %c0_i32_2 = arith.constant 0 : i32
    return %arg0, %2, %c0_i32_0, %c0_i32_1 : i32, i32, i32, i32
  }
  func.func @transform_2(%arg0: i32, %arg1: i32) -> (i32, i32, i32, i32) {
    %c1_i32 = arith.constant 1 : i32
    %0 = arith.addi %arg1, %c1_i32 : i32
    %c16_i32 = arith.constant 16 : i32
    %1 = arith.muli %0, %c16_i32 : i32
    %c15_i32 = arith.constant 15 : i32
    %2 = arith.minsi %1, %c15_i32 : i32
    %c0_i32 = arith.constant 0 : i32
    %c0_i32_0 = arith.constant 0 : i32
    %c0_i32_1 = arith.constant 0 : i32
    return %arg0, %2, %c0_i32, %c0_i32_0 : i32, i32, i32, i32
  }
  func.func @transform_3(%arg0: i32, %arg1: i32) -> (i32, i32) {
    %c0_i32 = arith.constant 0 : i32
    %c0_i32_0 = arith.constant 0 : i32
    %c0_i32_1 = arith.constant 0 : i32
    return %c0_i32, %c0_i32_0 : i32, i32
  }
  func.func @transform_4(%arg0: i32, %arg1: i32) -> (i32, i32, i32, i32) {
    %c0_i32 = arith.constant 0 : i32
    %c0_i32_0 = arith.constant 0 : i32
    %c0_i32_1 = arith.constant 0 : i32
    return %arg0, %arg1, %c0_i32, %c0_i32_0 : i32, i32, i32, i32
  }
  func.func @transform_5(%arg0: i32, %arg1: i32) -> (i32, i32, i32, i32) {
    %c0_i32 = arith.constant 0 : i32
    %c0_i32_0 = arith.constant 0 : i32
    %c0_i32_1 = arith.constant 0 : i32
    return %arg0, %arg1, %c0_i32, %c0_i32_0 : i32, i32, i32, i32
  }
}

module attributes {stable_mosaic.version = 11 : i64} {
  func.func @_conv_bn_stats_kernel(%arg0: i32, %arg1: i32, %arg2: memref<1x16x16x128xbf16, #tpu.memory_space<vmem>>, %arg3: memref<1x1x16x128xbf16, #tpu.memory_space<vmem>>, %arg4: memref<1x1x16x128xbf16, #tpu.memory_space<vmem>>, %arg5: memref<1152x128xbf16, #tpu.memory_space<vmem>>, %arg6: memref<1x128xf32, #tpu.memory_space<vmem>>, %arg7: memref<1x128xf32, #tpu.memory_space<vmem>>, %arg8: memref<1x16x16x128xbf16, #tpu.memory_space<vmem>>, %arg9: memref<1x1x2x128xf32, #tpu.memory_space<vmem>>) attributes {dimension_semantics = [#tpu.dimension_semantics<parallel>, #tpu.dimension_semantics<parallel>], iteration_bounds = array<i64: 2, 1>, scalar_prefetch = 0 : i64, scratch_operands = 0 : i64, tpu.core_type = #tpu.core_type<tc>, window_params = [{transform_indices = @transform_0, window_bounds = array<i64: 1, 16, 16, 128>}, {transform_indices = @transform_1, window_bounds = array<i64: 1, 1, 16, 128>}, {transform_indices = @transform_2, window_bounds = array<i64: 1, 1, 16, 128>}, {pipeline_mode = #tpu.pipeline_mode<synchronous>, transform_indices = @transform_3, window_bounds = array<i64: 1152, 128>}, {pipeline_mode = #tpu.pipeline_mode<synchronous>, transform_indices = @transform_4, window_bounds = array<i64: 1, 128>}, {pipeline_mode = #tpu.pipeline_mode<synchronous>, transform_indices = @transform_5, window_bounds = array<i64: 1, 128>}, {transform_indices = @transform_6, window_bounds = array<i64: 1, 16, 16, 128>}, {transform_indices = @transform_7, window_bounds = array<i64: 1, 1, 2, 128>}]} {
    %c0 = arith.constant 0 : index
    %c0_0 = arith.constant 0 : index
    %c0_1 = arith.constant 0 : index
    %c0_2 = arith.constant 0 : index
    %0 = vector.load %arg3[%c0, %c0_0, %c0_1, %c0_2] : memref<1x1x16x128xbf16, #tpu.memory_space<vmem>>, vector<1x1x16x128xbf16>
    %1 = vector.shape_cast %0 : vector<1x1x16x128xbf16> to vector<1x16x128xbf16>
    %c0_3 = arith.constant 0 : index
    %c0_4 = arith.constant 0 : index
    %c0_5 = arith.constant 0 : index
    %c0_6 = arith.constant 0 : index
    %2 = vector.load %arg2[%c0_3, %c0_4, %c0_5, %c0_6] : memref<1x16x16x128xbf16, #tpu.memory_space<vmem>>, vector<1x16x16x128xbf16>
    %3 = vector.shape_cast %2 : vector<1x16x16x128xbf16> to vector<16x16x128xbf16>
    %c0_7 = arith.constant 0 : index
    %c0_8 = arith.constant 0 : index
    %c0_9 = arith.constant 0 : index
    %c0_10 = arith.constant 0 : index
    %4 = vector.load %arg4[%c0_7, %c0_8, %c0_9, %c0_10] : memref<1x1x16x128xbf16, #tpu.memory_space<vmem>>, vector<1x1x16x128xbf16>
    %5 = vector.shape_cast %4 : vector<1x1x16x128xbf16> to vector<1x16x128xbf16>
    %6 = tpu.concatenate %1, %3, %5 in 0 : vector<1x16x128xbf16>, vector<16x16x128xbf16>, vector<1x16x128xbf16> -> vector<18x16x128xbf16>
    %c0_11 = arith.constant 0 : index
    %c0_12 = arith.constant 0 : index
    %7 = vector.load %arg6[%c0_11, %c0_12] : memref<1x128xf32, #tpu.memory_space<vmem>>, vector<1x128xf32>
    %8 = vector.shape_cast %7 : vector<1x128xf32> to vector<1x1x128xf32>
    %c0_13 = arith.constant 0 : index
    %c0_14 = arith.constant 0 : index
    %9 = vector.load %arg7[%c0_13, %c0_14] : memref<1x128xf32, #tpu.memory_space<vmem>>, vector<1x128xf32>
    %10 = vector.shape_cast %9 : vector<1x128xf32> to vector<1x1x128xf32>
    %11 = arith.extf %6 : vector<18x16x128xbf16> to vector<18x16x128xf32>
    %12 = vector.broadcast %8 : vector<1x1x128xf32> to vector<18x16x128xf32>
    %13 = arith.mulf %11, %12 : vector<18x16x128xf32>
    %14 = vector.broadcast %10 : vector<1x1x128xf32> to vector<18x16x128xf32>
    %15 = arith.addf %13, %14 : vector<18x16x128xf32>
    %cst = arith.constant 0.000000e+00 : f32
    %16 = vector.broadcast %cst : f32 to vector<18x16x128xf32>
    %17 = arith.maximumf %15, %16 : vector<18x16x128xf32>
    %18 = arith.truncf %17 : vector<18x16x128xf32> to vector<18x16x128xbf16>
    %19 = tpu.iota {dimensions = array<i32: 0>} : vector<18x1x1xi32>
    %c0_i32 = arith.constant 0 : i32
    %20 = vector.broadcast %c0_i32 : i32 to vector<18x1x1xi32>
    %21 = arith.cmpi ne, %19, %20 : vector<18x1x1xi32>
    %c0_i32_15 = arith.constant 0 : i32
    %22 = arith.cmpi ne, %arg1, %c0_i32_15 : i32
    %23 = vector.broadcast %22 : i1 to vector<18x1x1xi1>
    %24 = arith.ori %21, %23 : vector<18x1x1xi1>
    %c17_i32 = arith.constant 17 : i32
    %25 = vector.broadcast %c17_i32 : i32 to vector<18x1x1xi32>
    %26 = arith.cmpi ne, %19, %25 : vector<18x1x1xi32>
    %c0_i32_16 = arith.constant 0 : i32
    %27 = arith.cmpi ne, %arg1, %c0_i32_16 : i32
    %28 = vector.broadcast %27 : i1 to vector<18x1x1xi1>
    %29 = arith.ori %26, %28 : vector<18x1x1xi1>
    %30 = arith.andi %24, %29 : vector<18x1x1xi1>
    %31 = arith.extui %30 : vector<18x1x1xi1> to vector<18x1x1xi32>
    %32 = arith.sitofp %31 : vector<18x1x1xi32> to vector<18x1x1xf32>
    %33 = arith.truncf %32 : vector<18x1x1xf32> to vector<18x1x1xbf16>
    %34 = vector.broadcast %33 : vector<18x1x1xbf16> to vector<18x16x128xbf16>
    %35 = arith.mulf %18, %34 : vector<18x16x128xbf16>
    %cst_17 = arith.constant 0.000000e+00 : bf16
    %36 = vector.broadcast %cst_17 : bf16 to vector<18x1x128xbf16>
    %37 = vector.extract_strided_slice %35 {offsets = [0, 0, 0], sizes = [18, 15, 128], strides = [1, 1, 1]} : vector<18x16x128xbf16> to vector<18x15x128xbf16>
    %38 = tpu.concatenate %36, %37 in 1 : vector<18x1x128xbf16>, vector<18x15x128xbf16> -> vector<18x16x128xbf16>
    %39 = vector.extract_strided_slice %35 {offsets = [0, 1, 0], sizes = [18, 15, 128], strides = [1, 1, 1]} : vector<18x16x128xbf16> to vector<18x15x128xbf16>
    %40 = tpu.concatenate %39, %36 in 1 : vector<18x15x128xbf16>, vector<18x1x128xbf16> -> vector<18x16x128xbf16>
    %41 = vector.extract_strided_slice %38 {offsets = [0, 0, 0], sizes = [16, 16, 128], strides = [1, 1, 1]} : vector<18x16x128xbf16> to vector<16x16x128xbf16>
    %42 = vector.extract_strided_slice %35 {offsets = [0, 0, 0], sizes = [16, 16, 128], strides = [1, 1, 1]} : vector<18x16x128xbf16> to vector<16x16x128xbf16>
    %43 = vector.extract_strided_slice %40 {offsets = [0, 0, 0], sizes = [16, 16, 128], strides = [1, 1, 1]} : vector<18x16x128xbf16> to vector<16x16x128xbf16>
    %44 = vector.extract_strided_slice %38 {offsets = [1, 0, 0], sizes = [16, 16, 128], strides = [1, 1, 1]} : vector<18x16x128xbf16> to vector<16x16x128xbf16>
    %45 = vector.extract_strided_slice %35 {offsets = [1, 0, 0], sizes = [16, 16, 128], strides = [1, 1, 1]} : vector<18x16x128xbf16> to vector<16x16x128xbf16>
    %46 = vector.extract_strided_slice %40 {offsets = [1, 0, 0], sizes = [16, 16, 128], strides = [1, 1, 1]} : vector<18x16x128xbf16> to vector<16x16x128xbf16>
    %47 = vector.extract_strided_slice %38 {offsets = [2, 0, 0], sizes = [16, 16, 128], strides = [1, 1, 1]} : vector<18x16x128xbf16> to vector<16x16x128xbf16>
    %48 = vector.extract_strided_slice %35 {offsets = [2, 0, 0], sizes = [16, 16, 128], strides = [1, 1, 1]} : vector<18x16x128xbf16> to vector<16x16x128xbf16>
    %49 = vector.extract_strided_slice %40 {offsets = [2, 0, 0], sizes = [16, 16, 128], strides = [1, 1, 1]} : vector<18x16x128xbf16> to vector<16x16x128xbf16>
    %50 = tpu.concatenate %41, %42, %43, %44, %45, %46, %47, %48, %49 in 2 : vector<16x16x128xbf16>, vector<16x16x128xbf16>, vector<16x16x128xbf16>, vector<16x16x128xbf16>, vector<16x16x128xbf16>, vector<16x16x128xbf16>, vector<16x16x128xbf16>, vector<16x16x128xbf16>, vector<16x16x128xbf16> -> vector<16x16x1152xbf16>
    %51 = vector.shape_cast %50 : vector<16x16x1152xbf16> to vector<256x1152xbf16>
    %c0_18 = arith.constant 0 : index
    %c0_19 = arith.constant 0 : index
    %52 = vector.load %arg5[%c0_18, %c0_19] : memref<1152x128xbf16, #tpu.memory_space<vmem>>, vector<1152x128xbf16>
    %cst_20 = arith.constant dense<0.000000e+00> : vector<256x128xf32>
    %53 = tpu.matmul %51, %52, %cst_20 {dimension_numbers = #tpu.dot_dimension_numbers<[1], [0], [0], [1], [0, 0, 1, 1], [], []>} : vector<256x1152xbf16>, vector<1152x128xbf16>, vector<256x128xf32> -> vector<256x128xf32>
    %54 = vector.shape_cast %53 : vector<256x128xf32> to vector<16x16x128xf32>
    %55 = arith.truncf %54 : vector<16x16x128xf32> to vector<16x16x128xbf16>
    %c0_21 = arith.constant 0 : index
    %c0_22 = arith.constant 0 : index
    %c0_23 = arith.constant 0 : index
    %c0_24 = arith.constant 0 : index
    %56 = vector.load %arg8[%c0_21, %c0_22, %c0_23, %c0_24] : memref<1x16x16x128xbf16, #tpu.memory_space<vmem>>, vector<1x16x16x128xbf16>
    %57 = vector.shape_cast %56 : vector<1x16x16x128xbf16> to vector<16x16x128xbf16>
    %58 = vector.shape_cast %55 : vector<16x16x128xbf16> to vector<1x16x16x128xbf16>
    tpu.vector_store %arg8[%c0_21, %c0_22, %c0_23, %c0_24], %58 {strides = array<i32>} : memref<1x16x16x128xbf16, #tpu.memory_space<vmem>>, vector<1x16x16x128xbf16>,
    %cst_25 = arith.constant dense<0.000000e+00> : vector<128xf32>
    %59 = vector.multi_reduction <add>, %53, %cst_25 [0] : vector<256x128xf32> to vector<128xf32>
    %60 = vector.shape_cast %59 : vector<128xf32> to vector<1x128xf32>
    %c0_26 = arith.constant 0 : index
    %c0_27 = arith.constant 0 : index
    %c0_28 = arith.constant 0 : index
    %c0_29 = arith.constant 0 : index
    %61 = vector.load %arg9[%c0_26, %c0_27, %c0_28, %c0_29] : memref<1x1x2x128xf32, #tpu.memory_space<vmem>>, vector<1x1x1x128xf32>
    %62 = vector.shape_cast %61 : vector<1x1x1x128xf32> to vector<1x128xf32>
    %63 = vector.shape_cast %60 : vector<1x128xf32> to vector<1x1x1x128xf32>
    tpu.vector_store %arg9[%c0_26, %c0_27, %c0_28, %c0_29], %63 {strides = array<i32>} : memref<1x1x2x128xf32, #tpu.memory_space<vmem>>, vector<1x1x1x128xf32>,
    %64 = arith.mulf %53, %53 : vector<256x128xf32>
    %cst_30 = arith.constant dense<0.000000e+00> : vector<128xf32>
    %65 = vector.multi_reduction <add>, %64, %cst_30 [0] : vector<256x128xf32> to vector<128xf32>
    %66 = vector.shape_cast %65 : vector<128xf32> to vector<1x128xf32>
    %c0_31 = arith.constant 0 : index
    %c0_32 = arith.constant 0 : index
    %c1 = arith.constant 1 : index
    %c0_33 = arith.constant 0 : index
    %67 = vector.load %arg9[%c0_31, %c0_32, %c1, %c0_33] : memref<1x1x2x128xf32, #tpu.memory_space<vmem>>, vector<1x1x1x128xf32>
    %68 = vector.shape_cast %67 : vector<1x1x1x128xf32> to vector<1x128xf32>
    %69 = vector.shape_cast %66 : vector<1x128xf32> to vector<1x1x1x128xf32>
    tpu.vector_store %arg9[%c0_31, %c0_32, %c1, %c0_33], %69 {strides = array<i32>} : memref<1x1x2x128xf32, #tpu.memory_space<vmem>>, vector<1x1x1x128xf32>,
    return
  }
  func.func @transform_0(%arg0: i32, %arg1: i32) -> (i32, i32, i32, i32) {
    %c0_i32 = arith.constant 0 : i32
    %c0_i32_0 = arith.constant 0 : i32
    %c0_i32_1 = arith.constant 0 : i32
    return %arg0, %arg1, %c0_i32, %c0_i32_0 : i32, i32, i32, i32
  }
  func.func @transform_1(%arg0: i32, %arg1: i32) -> (i32, i32, i32, i32) {
    %c16_i32 = arith.constant 16 : i32
    %0 = arith.muli %arg1, %c16_i32 : i32
    %c1_i32 = arith.constant 1 : i32
    %1 = arith.subi %0, %c1_i32 : i32
    %c0_i32 = arith.constant 0 : i32
    %2 = arith.maxsi %1, %c0_i32 : i32
    %c0_i32_0 = arith.constant 0 : i32
    %c0_i32_1 = arith.constant 0 : i32
    %c0_i32_2 = arith.constant 0 : i32
    return %arg0, %2, %c0_i32_0, %c0_i32_1 : i32, i32, i32, i32
  }
  func.func @transform_2(%arg0: i32, %arg1: i32) -> (i32, i32, i32, i32) {
    %c1_i32 = arith.constant 1 : i32
    %0 = arith.addi %arg1, %c1_i32 : i32
    %c16_i32 = arith.constant 16 : i32
    %1 = arith.muli %0, %c16_i32 : i32
    %c15_i32 = arith.constant 15 : i32
    %2 = arith.minsi %1, %c15_i32 : i32
    %c0_i32 = arith.constant 0 : i32
    %c0_i32_0 = arith.constant 0 : i32
    %c0_i32_1 = arith.constant 0 : i32
    return %arg0, %2, %c0_i32, %c0_i32_0 : i32, i32, i32, i32
  }
  func.func @transform_3(%arg0: i32, %arg1: i32) -> (i32, i32) {
    %c0_i32 = arith.constant 0 : i32
    %c0_i32_0 = arith.constant 0 : i32
    %c0_i32_1 = arith.constant 0 : i32
    return %c0_i32, %c0_i32_0 : i32, i32
  }
  func.func @transform_4(%arg0: i32, %arg1: i32) -> (i32, i32) {
    %c0_i32 = arith.constant 0 : i32
    %c0_i32_0 = arith.constant 0 : i32
    %c0_i32_1 = arith.constant 0 : i32
    return %c0_i32, %c0_i32_0 : i32, i32
  }
  func.func @transform_5(%arg0: i32, %arg1: i32) -> (i32, i32) {
    %c0_i32 = arith.constant 0 : i32
    %c0_i32_0 = arith.constant 0 : i32
    %c0_i32_1 = arith.constant 0 : i32
    return %c0_i32, %c0_i32_0 : i32, i32
  }
  func.func @transform_6(%arg0: i32, %arg1: i32) -> (i32, i32, i32, i32) {
    %c0_i32 = arith.constant 0 : i32
    %c0_i32_0 = arith.constant 0 : i32
    %c0_i32_1 = arith.constant 0 : i32
    return %arg0, %arg1, %c0_i32, %c0_i32_0 : i32, i32, i32, i32
  }
  func.func @transform_7(%arg0: i32, %arg1: i32) -> (i32, i32, i32, i32) {
    %c0_i32 = arith.constant 0 : i32
    %c0_i32_0 = arith.constant 0 : i32
    %c0_i32_1 = arith.constant 0 : i32
    return %arg0, %arg1, %c0_i32, %c0_i32_0 : i32, i32, i32, i32
  }
}

module attributes {stable_mosaic.version = 11 : i64} {
  func.func @_bn_relu_kernel(%arg0: i32, %arg1: i32, %arg2: memref<1x16x16x128xbf16, #tpu.memory_space<vmem>>, %arg3: memref<1x128xf32, #tpu.memory_space<vmem>>, %arg4: memref<1x128xf32, #tpu.memory_space<vmem>>, %arg5: memref<1x16x16x128xf32, #tpu.memory_space<vmem>>) attributes {dimension_semantics = [#tpu.dimension_semantics<parallel>, #tpu.dimension_semantics<parallel>], iteration_bounds = array<i64: 2, 1>, scalar_prefetch = 0 : i64, scratch_operands = 0 : i64, tpu.core_type = #tpu.core_type<tc>, window_params = [{transform_indices = @transform_0, window_bounds = array<i64: 1, 16, 16, 128>}, {pipeline_mode = #tpu.pipeline_mode<synchronous>, transform_indices = @transform_1, window_bounds = array<i64: 1, 128>}, {pipeline_mode = #tpu.pipeline_mode<synchronous>, transform_indices = @transform_2, window_bounds = array<i64: 1, 128>}, {transform_indices = @transform_3, window_bounds = array<i64: 1, 16, 16, 128>}]} {
    %c0 = arith.constant 0 : index
    %c0_0 = arith.constant 0 : index
    %c0_1 = arith.constant 0 : index
    %c0_2 = arith.constant 0 : index
    %0 = vector.load %arg2[%c0, %c0_0, %c0_1, %c0_2] : memref<1x16x16x128xbf16, #tpu.memory_space<vmem>>, vector<1x16x16x128xbf16>
    %1 = arith.extf %0 : vector<1x16x16x128xbf16> to vector<1x16x16x128xf32>
    %c0_3 = arith.constant 0 : index
    %c0_4 = arith.constant 0 : index
    %2 = vector.load %arg3[%c0_3, %c0_4] : memref<1x128xf32, #tpu.memory_space<vmem>>, vector<1x128xf32>
    %3 = vector.shape_cast %2 : vector<1x128xf32> to vector<1x1x1x128xf32>
    %c0_5 = arith.constant 0 : index
    %c0_6 = arith.constant 0 : index
    %4 = vector.load %arg4[%c0_5, %c0_6] : memref<1x128xf32, #tpu.memory_space<vmem>>, vector<1x128xf32>
    %5 = vector.shape_cast %4 : vector<1x128xf32> to vector<1x1x1x128xf32>
    %6 = vector.broadcast %3 : vector<1x1x1x128xf32> to vector<1x16x16x128xf32>
    %7 = arith.mulf %1, %6 : vector<1x16x16x128xf32>
    %8 = vector.broadcast %5 : vector<1x1x1x128xf32> to vector<1x16x16x128xf32>
    %9 = arith.addf %7, %8 : vector<1x16x16x128xf32>
    %cst = arith.constant 0.000000e+00 : f32
    %10 = vector.broadcast %cst : f32 to vector<1x16x16x128xf32>
    %11 = arith.maximumf %9, %10 : vector<1x16x16x128xf32>
    %c0_7 = arith.constant 0 : index
    %c0_8 = arith.constant 0 : index
    %c0_9 = arith.constant 0 : index
    %c0_10 = arith.constant 0 : index
    %12 = vector.load %arg5[%c0_7, %c0_8, %c0_9, %c0_10] : memref<1x16x16x128xf32, #tpu.memory_space<vmem>>, vector<1x16x16x128xf32>
    tpu.vector_store %arg5[%c0_7, %c0_8, %c0_9, %c0_10], %11 {strides = array<i32>} : memref<1x16x16x128xf32, #tpu.memory_space<vmem>>, vector<1x16x16x128xf32>,
    return
  }
  func.func @transform_0(%arg0: i32, %arg1: i32) -> (i32, i32, i32, i32) {
    %c0_i32 = arith.constant 0 : i32
    %c0_i32_0 = arith.constant 0 : i32
    %c0_i32_1 = arith.constant 0 : i32
    return %arg0, %arg1, %c0_i32, %c0_i32_0 : i32, i32, i32, i32
  }
  func.func @transform_1(%arg0: i32, %arg1: i32) -> (i32, i32) {
    %c0_i32 = arith.constant 0 : i32
    %c0_i32_0 = arith.constant 0 : i32
    %c0_i32_1 = arith.constant 0 : i32
    return %c0_i32, %c0_i32_0 : i32, i32
  }
  func.func @transform_2(%arg0: i32, %arg1: i32) -> (i32, i32) {
    %c0_i32 = arith.constant 0 : i32
    %c0_i32_0 = arith.constant 0 : i32
    %c0_i32_1 = arith.constant 0 : i32
    return %c0_i32, %c0_i32_0 : i32, i32
  }
  func.func @transform_3(%arg0: i32, %arg1: i32) -> (i32, i32, i32, i32) {
    %c0_i32 = arith.constant 0 : i32
    %c0_i32_0 = arith.constant 0 : i32
    %c0_i32_1 = arith.constant 0 : i32
    return %arg0, %arg1, %c0_i32, %c0_i32_0 : i32, i32, i32, i32
  }
}

</mosaic_0001>

<bundles_post_ra>
// kernel: double_conv.5
= control target key start
LH: loop header
LB: loop body
LE: loop exit
PB: predicated region body
PF: predicated region fallthrough
CT: control target
= control target key end

     0   :  { %s679_s12 = smov 0   ;;  %s681_s13 = smov 0   ;;  %s842_s0 = inlined_call_operand.vmem [shape: bf16[2,16,16,128], index: 0, kind: input, shape index: {}]   ;;  %s843_s1 = inlined_call_operand.vmem [shape: f32[1,128], index: 1, kind: input, shape index: {}]   ;;  %s844_s2 = inlined_call_operand.vmem [shape: f32[1,128], index: 2, kind: input, shape index: {}]   ;;  %s845_s3 = inlined_call_operand.vmem [shape: f32[2,16,16,128], index: 3, kind: output, shape index: {}]  }
   0x1   :  { %s683_s14 = smov 0  }
   0x2 LB: > { %s25_s15 = sadd.s32 1, %s653_s13  ;;  %p521_p0 = scmp.ge.s32.totalorder %s657_s14, 1  ;;  %s657_s14 = sphi %s683_s14, %s13_s14   ;;  %s653_s13 = sphi %s681_s13, %s847_s13   ;;  %s649_s12 = sphi %s679_s12, %s846_s12  }
   0x3   : > { %p27_p1 = scmp.ge.s32.totalorder %s25_s15, 2  ;;  %p159_p2 = scmp.lt.s32.totalorder %s657_s14, 3 }
   0x5   : > { %s849_s15 = smov (%p27_p1, %s25_s15), 0  ;;  %p160_p3 = pnand %p521_p0, %p159_p2 }
   0x6   : > { %p194_p4 = scmp.lt.s32.totalorder (!%p160_p3), %s649_s12, 1  ;;  %v708_v0 = vld [vmem:[%s843_s1] ss:$0 sm:$0xff] (!%p160_p3) }
   0x7   : > { %163 = sbr.rel (%p160_p3) target bundleno = 54 (0x36), region = 32  ;;  %v717_v9 = vld [vmem:[%s844_s2] ss:$0 sm:$0xff] (!%p160_p3) }
   0xe   : > { %s851_s12 = smov (!%p194_p4, %s649_s12), 1 }
   0xf   : > { %s530_s16 = sshll.u32 %s851_s12, 7  ;;  %s531_s24 = sshll.u32 %s851_s12, 8 }
  0x10   : > { %s703_s19 = scalar_lea.vmem %s842_s0, %s530_s16  ;;  %s735_s27 = scalar_lea.vmem %s845_s3, %s531_s24 }
  0x11   : > { %v533_v1 = vld [vmem:[%s703_s19] sm:$0xff]   ;;  %v596_v2 = vld [vmem:[%s703_s19 + $0x8] sm:$0xff]   ;;  %v597_v3 = vld [vmem:[%s703_s19 + $0x10] sm:$0xff]  }
  0x12   : > { %v534_v4 = vunpack.c.l.bf16 %v533_v1  ;;  %v535_v5 = vunpack.c.h.bf16 %v533_v1  ;;  %v538_v6 = vunpack.c.l.bf16 %v596_v2  ;;  %v539_v7 = vunpack.c.h.bf16 %v596_v2  ;;  %v598_v8 = vld [vmem:[%s703_s19 + $0x18] sm:$0xff]   ;;  %v599_v30 = vld [vmem:[%s703_s19 + $0x20] sm:$0xff]   ;;  %v600_v31 = vld [vmem:[%s703_s19 + $0x28] sm:$0xff]  }
  0x13   : > { %v542_v10 = vunpack.c.l.bf16 %v597_v3  ;;  %v543_v11 = vunpack.c.h.bf16 %v597_v3  ;;  %v546_v12 = vunpack.c.l.bf16 %v598_v8  ;;  %v547_v13 = vunpack.c.h.bf16 %v598_v8  ;;  %v601_v36 = vld [vmem:[%s703_s19 + $0x30] sm:$0xff]   ;;  %v602_v37 = vld [vmem:[%s703_s19 + $0x38] sm:$0xff]   ;;  %v603_v3 = vld [vmem:[%s703_s19 + $0x40] sm:$0xff]  }
  0x14   : > { %v287_v14 = vmul.f32 %v534_v4, %v708_v0  ;;  %v288_v15 = vmul.f32 %v535_v5, %v708_v0  ;;  %v289_v16 = vmul.f32 %v538_v6, %v708_v0  ;;  %v290_v17 = vmul.f32 %v539_v7, %v708_v0  ;;  %v604_v4 = vld [vmem:[%s703_s19 + $0x48] sm:$0xff]  }
  0x15   : > { %v291_v18 = vmul.f32 %v542_v10, %v708_v0  ;;  %v292_v19 = vmul.f32 %v543_v11, %v708_v0  ;;  %v293_v20 = vmul.f32 %v546_v12, %v708_v0  ;;  %v294_v21 = vmul.f32 %v547_v13, %v708_v0  ;;  %v605_v10 = vld [vmem:[%s703_s19 + $0x50] sm:$0xff]   ;;  %v606_v11 = vld [vmem:[%s703_s19 + $0x58] sm:$0xff]  }
  0x16   : > { %v325_v22 = vadd.f32 %v717_v9, %v287_v14  ;;  %v326_v23 = vadd.f32 %v717_v9, %v288_v15  ;;  %v327_v24 = vadd.f32 %v717_v9, %v289_v16  ;;  %v328_v25 = vadd.f32 %v717_v9, %v290_v17 }
  0x17   : > { %v329_v26 = vadd.f32 %v717_v9, %v291_v18  ;;  %v330_v27 = vadd.f32 %v717_v9, %v292_v19  ;;  %v331_v28 = vadd.f32 %v717_v9, %v293_v20  ;;  %v332_v29 = vadd.f32 %v717_v9, %v294_v21 }
  0x18   : > { %v357_v32 = vmax.f32 %v325_v22, 0.0  ;;  %v358_v33 = vmax.f32 %v326_v23, 0.0  ;;  %v359_v34 = vmax.f32 %v327_v24, 0.0  ;;  %v360_v35 = vmax.f32 %v328_v25, 0.0 }
  0x19   : > { %v361_v38 = vmax.f32 %v329_v26, 0.0  ;;  %v362_v39 = vmax.f32 %v330_v27, 0.0  ;;  %v363_v40 = vmax.f32 %v331_v28, 0.0  ;;  %v364_v41 = vmax.f32 %v332_v29, 0.0 }
  0x1a   : > { %389 = vst [vmem:[%s735_s27] sm:$0xff] %v357_v32  ;;  %390 = vst [vmem:[%s735_s27 + $0x8] sm:$0xff] %v358_v33  ;;  %v550_v42 = vunpack.c.l.bf16 %v599_v30  ;;  %v551_v43 = vunpack.c.h.bf16 %v599_v30  ;;  %v554_v44 = vunpack.c.l.bf16 %v600_v31  ;;  %v555_v45 = vunpack.c.h.bf16 %v600_v31 }
  0x1b   : > { %391 = vst [vmem:[%s735_s27 + $0x10] sm:$0xff] %v359_v34  ;;  %392 = vst [vmem:[%s735_s27 + $0x18] sm:$0xff] %v360_v35  ;;  %v558_v46 = vunpack.c.l.bf16 %v601_v36  ;;  %v559_v47 = vunpack.c.h.bf16 %v601_v36  ;;  %v562_v48 = vunpack.c.l.bf16 %v602_v37  ;;  %v563_v49 = vunpack.c.h.bf16 %v602_v37 }
  0x1c   : > { %393 = vst [vmem:[%s735_s27 + $0x20] sm:$0xff] %v361_v38  ;;  %394 = vst [vmem:[%s735_s27 + $0x28] sm:$0xff] %v362_v39  ;;  %v295_v50 = vmul.f32 %v550_v42, %v708_v0  ;;  %v296_v51 = vmul.f32 %v551_v43, %v708_v0  ;;  %v297_v52 = vmul.f32 %v554_v44, %v708_v0  ;;  %v566_v16 = vunpack.c.l.bf16 %v603_v3 }
  0x1d   : > { %395 = vst [vmem:[%s735_s27 + $0x30] sm:$0xff] %v363_v40  ;;  %396 = vst [vmem:[%s735_s27 + $0x38] sm:$0xff] %v364_v41  ;;  %v298_v53 = vmul.f32 %v555_v45, %v708_v0  ;;  %v299_v54 = vmul.f32 %v558_v46, %v708_v0  ;;  %v300_v55 = vmul.f32 %v559_v47, %v708_v0  ;;  %v567_v17 = vunpack.c.h.bf16 %v603_v3  ;;  %v607_v40 = vld [vmem:[%s703_s19 + $0x60] sm:$0xff]   ;;  %v608_v41 = vld [vmem:[%s703_s19 + $0x68] sm:$0xff]  }
  0x1e   : > { %v301_v56 = vmul.f32 %v562_v48, %v708_v0  ;;  %v302_v57 = vmul.f32 %v563_v49, %v708_v0  ;;  %v333_v58 = vadd.f32 %v717_v9, %v295_v50  ;;  %v334_v59 = vadd.f32 %v717_v9, %v296_v51  ;;  %v609_v46 = vld [vmem:[%s703_s19 + $0x70] sm:$0xff]   ;;  %v610_v47 = vld [vmem:[%s703_s19 + $0x78] sm:$0xff]  }
  0x1f   : > { %v335_v60 = vadd.f32 %v717_v9, %v297_v52  ;;  %v336_v61 = vadd.f32 %v717_v9, %v298_v53  ;;  %v337_v62 = vadd.f32 %v717_v9, %v299_v54  ;;  %v338_v63 = vadd.f32 %v717_v9, %v300_v55 }
  0x20   : > { %v339_v1 = vadd.f32 %v717_v9, %v301_v56  ;;  %v340_v2 = vadd.f32 %v717_v9, %v302_v57  ;;  %v365_v5 = vmax.f32 %v333_v58, 0.0  ;;  %v366_v6 = vmax.f32 %v334_v59, 0.0 }
  0x21   : > { %v367_v7 = vmax.f32 %v335_v60, 0.0  ;;  %v368_v8 = vmax.f32 %v336_v61, 0.0  ;;  %v369_v12 = vmax.f32 %v337_v62, 0.0  ;;  %v370_v13 = vmax.f32 %v338_v63, 0.0 }
  0x22   : > { %v371_v14 = vmax.f32 %v339_v1, 0.0  ;;  %v372_v15 = vmax.f32 %v340_v2, 0.0  ;;  %397 = vst [vmem:[%s735_s27 + $0x40] sm:$0xff] %v365_v5  ;;  %398 = vst [vmem:[%s735_s27 + $0x48] sm:$0xff] %v366_v6  ;;  %v570_v18 = vunpack.c.l.bf16 %v604_v4  ;;  %v571_v19 = vunpack.c.h.bf16 %v604_v4 }
  0x23   : > { %399 = vst [vmem:[%s735_s27 + $0x50] sm:$0xff] %v367_v7  ;;  %400 = vst [vmem:[%s735_s27 + $0x58] sm:$0xff] %v368_v8  ;;  %v574_v20 = vunpack.c.l.bf16 %v605_v10  ;;  %v575_v21 = vunpack.c.h.bf16 %v605_v10  ;;  %v578_v22 = vunpack.c.l.bf16 %v606_v11  ;;  %v579_v23 = vunpack.c.h.bf16 %v606_v11 }
  0x24   : > { %401 = vst [vmem:[%s735_s27 + $0x60] sm:$0xff] %v369_v12  ;;  %402 = vst [vmem:[%s735_s27 + $0x68] sm:$0xff] %v370_v13  ;;  %v303_v24 = vmul.f32 %v566_v16, %v708_v0  ;;  %v304_v25 = vmul.f32 %v567_v17, %v708_v0  ;;  %v305_v26 = vmul.f32 %v570_v18, %v708_v0  ;;  %v582_v52 = vunpack.c.l.bf16 %v607_v40 }
  0x25   : > { %403 = vst [vmem:[%s735_s27 + $0x70] sm:$0xff] %v371_v14  ;;  %404 = vst [vmem:[%s735_s27 + $0x78] sm:$0xff] %v372_v15  ;;  %v306_v27 = vmul.f32 %v571_v19, %v708_v0  ;;  %v307_v28 = vmul.f32 %v574_v20, %v708_v0  ;;  %v308_v29 = vmul.f32 %v575_v21, %v708_v0  ;;  %v583_v53 = vunpack.c.h.bf16 %v607_v40 }
  0x26   : > { %v309_v30 = vmul.f32 %v578_v22, %v708_v0  ;;  %v310_v31 = vmul.f32 %v579_v23, %v708_v0  ;;  %v341_v32 = vadd.f32 %v717_v9, %v303_v24  ;;  %v342_v33 = vadd.f32 %v717_v9, %v304_v25 }
  0x27   : > { %v343_v34 = vadd.f32 %v717_v9, %v305_v26  ;;  %v344_v35 = vadd.f32 %v717_v9, %v306_v27  ;;  %v345_v36 = vadd.f32 %v717_v9, %v307_v28  ;;  %v346_v37 = vadd.f32 %v717_v9, %v308_v29 }
  0x28   : > { %v347_v38 = vadd.f32 %v717_v9, %v309_v30  ;;  %v348_v39 = vadd.f32 %v717_v9, %v310_v31  ;;  %v373_v42 = vmax.f32 %v341_v32, 0.0  ;;  %v374_v43 = vmax.f32 %v342_v33, 0.0 }
  0x29   : > { %v375_v44 = vmax.f32 %v343_v34, 0.0  ;;  %v376_v45 = vmax.f32 %v344_v35, 0.0  ;;  %v377_v48 = vmax.f32 %v345_v36, 0.0  ;;  %v378_v49 = vmax.f32 %v346_v37, 0.0 }
  0x2a   : > { %v379_v50 = vmax.f32 %v347_v38, 0.0  ;;  %v380_v51 = vmax.f32 %v348_v39, 0.0  ;;  %405 = vst [vmem:[%s735_s27 + $0x80] sm:$0xff] %v373_v42  ;;  %406 = vst [vmem:[%s735_s27 + $0x88] sm:$0xff] %v374_v43  ;;  %v586_v54 = vunpack.c.l.bf16 %v608_v41  ;;  %v587_v55 = vunpack.c.h.bf16 %v608_v41 }
  0x2b   : > { %407 = vst [vmem:[%s735_s27 + $0x90] sm:$0xff] %v375_v44  ;;  %408 = vst [vmem:[%s735_s27 + $0x98] sm:$0xff] %v376_v45  ;;  %v590_v56 = vunpack.c.l.bf16 %v609_v46  ;;  %v591_v57 = vunpack.c.h.bf16 %v609_v46  ;;  %v594_v58 = vunpack.c.l.bf16 %v610_v47  ;;  %v595_v59 = vunpack.c.h.bf16 %v610_v47 }
  0x2c   : > { %409 = vst [vmem:[%s735_s27 + $0xa0] sm:$0xff] %v377_v48  ;;  %410 = vst [vmem:[%s735_s27 + $0xa8] sm:$0xff] %v378_v49  ;;  %v311_v60 = vmul.f32 %v582_v52, %v708_v0  ;;  %v312_v61 = vmul.f32 %v583_v53, %v708_v0  ;;  %v313_v62 = vmul.f32 %v586_v54, %v708_v0 }
  0x2d   : > { %411 = vst [vmem:[%s735_s27 + $0xb0] sm:$0xff] %v379_v50  ;;  %412 = vst [vmem:[%s735_s27 + $0xb8] sm:$0xff] %v380_v51  ;;  %v314_v63 = vmul.f32 %v587_v55, %v708_v0  ;;  %v315_v1 = vmul.f32 %v590_v56, %v708_v0  ;;  %v316_v2 = vmul.f32 %v591_v57, %v708_v0 }
  0x2e   : > { %v317_v3 = vmul.f32 %v594_v58, %v708_v0  ;;  %v318_v4 = vmul.f32 %v595_v59, %v708_v0  ;;  %v349_v5 = vadd.f32 %v717_v9, %v311_v60  ;;  %v350_v6 = vadd.f32 %v717_v9, %v312_v61 }
  0x2f   : > { %v351_v7 = vadd.f32 %v717_v9, %v313_v62  ;;  %v352_v8 = vadd.f32 %v717_v9, %v314_v63  ;;  %v353_v10 = vadd.f32 %v717_v9, %v315_v1  ;;  %v354_v11 = vadd.f32 %v717_v9, %v316_v2 }
  0x30   : > { %v355_v0 = vadd.f32 %v717_v9, %v317_v3  ;;  %v356_v12 = vadd.f32 %v717_v9, %v318_v4  ;;  %v381_v13 = vmax.f32 %v349_v5, 0.0  ;;  %v382_v14 = vmax.f32 %v350_v6, 0.0 }
  0x31   : > { %v383_v15 = vmax.f32 %v351_v7, 0.0  ;;  %v384_v16 = vmax.f32 %v352_v8, 0.0  ;;  %v385_v17 = vmax.f32 %v353_v10, 0.0  ;;  %v386_v18 = vmax.f32 %v354_v11, 0.0 }
  0x32   : > { %v387_v19 = vmax.f32 %v355_v0, 0.0  ;;  %v388_v20 = vmax.f32 %v356_v12, 0.0  ;;  %413 = vst [vmem:[%s735_s27 + $0xc0] sm:$0xff] %v381_v13  ;;  %414 = vst [vmem:[%s735_s27 + $0xc8] sm:$0xff] %v382_v14 }
  0x33   : > { %415 = vst [vmem:[%s735_s27 + $0xd0] sm:$0xff] %v383_v15  ;;  %416 = vst [vmem:[%s735_s27 + $0xd8] sm:$0xff] %v384_v16 }
  0x34   : > { %417 = vst [vmem:[%s735_s27 + $0xe0] sm:$0xff] %v385_v17  ;;  %418 = vst [vmem:[%s735_s27 + $0xe8] sm:$0xff] %v386_v18 }
  0x35   : > { %419 = vst [vmem:[%s735_s27 + $0xf0] sm:$0xff] %v387_v19  ;;  %420 = vst [vmem:[%s735_s27 + $0xf8] sm:$0xff] %v388_v20 }
  0x36 PF: > { %s13_s14 = sadd.s32 1, %s657_s14   ;;  %s846_s12 = smov %s653_s13 }
  0x37   : > { %p10_p5 = scmp.ge.s32.totalorder %s13_s14, 4   ;;  %s847_s13 = smov %s849_s15 }
  0x39   :  { %12 = sbr.rel (!%p10_p5) target bundleno = 2 (0x2), region = 62 }

// kernel: double_conv.3
= control target key start
LH: loop header
LB: loop body
LE: loop exit
PB: predicated region body
PF: predicated region fallthrough
CT: control target
= control target key end

     0   :  { %s3627_s18 = smov 0   ;;  %s3629_s19 = smov 0   ;;  %s4774_s0 = inlined_call_operand.vmem [shape: bf16[2,16,16,128], index: 0, kind: input, shape index: {}, may-alias: {0,1,2}]   ;;  %s4775_s1 = inlined_call_operand.vmem [shape: bf16[2,16,16,128], index: 1, kind: input, shape index: {}, may-alias: {0,1,2}]   ;;  %s4776_s2 = inlined_call_operand.vmem [shape: bf16[2,16,16,128], index: 2, kind: input, shape index: {}, may-alias: {0,1,2}]   ;;  %s4777_s3 = inlined_call_operand.vmem [shape: bf16[1152,128], index: 3, kind: input, shape index: {}]   ;;  %s4778_s4 = inlined_call_operand.vmem [shape: bf16[2,16,16,128], index: 4, kind: output, shape index: {0}]   ;;  %s4779_s5 = inlined_call_operand.vmem [shape: f32[2,1,2,128], index: 5, kind: output, shape index: {1}]  }
   0x1   :  { %s3631_s20 = smov 0  }
   0x2 LB: > { %s28_s21 = sadd.s32 1, %s3591_s19  ;;  %p2674_p0 = scmp.ge.s32.totalorder %s3595_s20, 1  ;;  %s3595_s20 = sphi %s3631_s20, %s16_s20   ;;  %s3591_s19 = sphi %s3629_s19, %s4785_s19   ;;  %s3587_s18 = sphi %s3627_s18, %s4784_s18  }
   0x3   : > { %p30_p1 = scmp.ge.s32.totalorder %s28_s21, 2  ;;  %p278_p2 = scmp.lt.s32.totalorder %s3595_s20, 3 }
   0x5   : > { %s4787_s21 = smov (%p30_p1, %s28_s21), 0  ;;  %p279_p3 = pnand %p2674_p0, %p278_p2 }
   0x6   : > { %v3501_v0 = vld [vmem:[%s4777_s3 + $0x40] sm:$0xff] (!%p279_p3)   ;;  %v3503_v2 = vld [vmem:[%s4777_s3 + $0x48] sm:$0xff] (!%p279_p3)   ;;  %p350_p4 = scmp.lt.s32.totalorder (!%p279_p3), %s3587_s18, 1  ;;  %v3505_v4 = vld [vmem:[%s4777_s3 + $0x50] sm:$0xff] (!%p279_p3)   ;;  %vm728_vm0 = vcmask (!%p279_p3), 1040384   ;;  %vm803_vm4 = vcmask (!%p279_p3), 1047552  }
   0x7   : > { %282 = sbr.rel (%p279_p3) target bundleno = 558 (0x22e), region = 36  ;;  %v3502_v1 = vld [vmem:[%s4777_s3] sm:$0xff] (!%p279_p3)   ;;  %2941 = vmatprep.subr.bf16.mxu0 (!%p279_p3), %v3501_v0  ;;  %3461 = vmatprep.subr.bf16.mxu1 (!%p279_p3), %v3501_v0  ;;  %v3504_v3 = vld [vmem:[%s4777_s3 + $0x8] sm:$0xff] (!%p279_p3)   ;;  %v3506_v5 = vld [vmem:[%s4777_s3 + $0x10] sm:$0xff] (!%p279_p3)   ;;  %vm729_vm1 = vsmask.f32 (!%p279_p3), 256 }
   0x8   : > { %2942 = vmatpush3.bf16.msra.mxu0 (!%p279_p3), %v3502_v1  ;;  %3469 = vmatpush3.bf16.msra.mxu1 (!%p279_p3), %v3502_v1  ;;  %v3507_v6 = vld [vmem:[%s4777_s3 + $0x58] sm:$0xff] (!%p279_p3)   ;;  %v3509_v8 = vld [vmem:[%s4777_s3 + $0x60] sm:$0xff] (!%p279_p3)   ;;  %v3511_v10 = vld [vmem:[%s4777_s3 + $0x68] sm:$0xff] (!%p279_p3)   ;;  %vm804_vm3 = vsmask.f32 (!%p279_p3), 7424 }
   0x9   : > { %2943 = vmatprep.subr.bf16.mxu0 (!%p279_p3), %v3503_v2  ;;  %3462 = vmatprep.subr.bf16.mxu1 (!%p279_p3), %v3503_v2  ;;  %v3508_v7 = vld [vmem:[%s4777_s3 + $0x18] sm:$0xff] (!%p279_p3)   ;;  %v3510_v9 = vld [vmem:[%s4777_s3 + $0x20] sm:$0xff] (!%p279_p3)   ;;  %v3512_v19 = vld [vmem:[%s4777_s3 + $0x28] sm:$0xff] (!%p279_p3)  }
   0xa   : > { %v3513_v21 = vld [vmem:[%s4777_s3 + $0x70] sm:$0xff] (!%p279_p3)   ;;  %v3515_v29 = vld [vmem:[%s4777_s3 + $0x78] sm:$0xff] (!%p279_p3)   ;;  %vm3733_vm2 = vmand (!%p279_p3), %vm728_vm0, %vm729_vm1 }
   0xb   : > { %v3514_v24 = vld [vmem:[%s4777_s3 + $0x30] sm:$0xff] (!%p279_p3)   ;;  %v3516_v35 = vld [vmem:[%s4777_s3 + $0x38] sm:$0xff] (!%p279_p3)   ;;  %v3517_v41 = vld [vmem:[%s4777_s3 + $0xc0] sm:$0xff] (!%p279_p3)  }
   0xc   : > { %2944 = vmatpush3.bf16.msra.mxu0 (!%p279_p3), %v3504_v3  ;;  %3470 = vmatpush3.bf16.msra.mxu1 (!%p279_p3), %v3504_v3  ;;  %v3518_v42 = vld [vmem:[%s4777_s3 + $0x140] sm:$0xff] (!%p279_p3)   ;;  %v3521_v48 = vld [vmem:[%s4777_s3 + $0xc8] sm:$0xff] (!%p279_p3)   ;;  %v3523_v60 = vld [vmem:[%s4777_s3 + $0xd0] sm:$0xff] (!%p279_p3)  }
   0xd   : > { %2945 = vmatprep.subr.bf16.mxu0 (!%p279_p3), %v3505_v4  ;;  %3463 = vmatprep.subr.bf16.mxu1 (!%p279_p3), %v3505_v4  ;;  %v3519_v45 = vld [vmem:[%s4777_s3 + $0x80] sm:$0xff] (!%p279_p3)   ;;  %v3522_v56 = vld [vmem:[%s4777_s3 + $0x88] sm:$0xff] (!%p279_p3)   ;;  %vm3925_vm5 = vmand (!%p279_p3), %vm803_vm4, %vm804_vm3 }
   0xe   : > { %s4789_s18 = smov (!%p350_p4, %s3587_s18), 1  ;;  %v3520_v46 = vld [vmem:[%s4777_s3 + $0x100] sm:$0xff]   ;;  %v3526_v58 = vld [vmem:[%s4777_s3 + $0x148] sm:$0xff]  }
   0xf   : > { %s3669_s11 = sshll.u32 %s4789_s18, 7  ;;  %v3528_v61 = vld [vmem:[%s4777_s3 + $0x108] sm:$0xff]  }
  0x10   : > { %2946 = vmatpush3.bf16.msra.mxu0 %v3506_v5  ;;  %3471 = vmatpush3.bf16.msra.mxu1 %v3506_v5  ;;  %s3681_s22 = scalar_lea.vmem %s4774_s0, %s3669_s11  ;;  %s372_s25 = scalar_lea.vmem %s4775_s1, %s3669_s11 }
  0x11   : > { %2947 = vmatprep.subr.bf16.mxu0 %v3507_v6  ;;  %3464 = vmatprep.subr.bf16.mxu1 %v3507_v6  ;;  %v413_v11 = vld [vmem:[%s372_s25] sm:$0xf]  ;;  %v414_v12 = vld [vmem:[%s372_s25 + $0x4] sm:$0xf]  ;;  %v437_v13 = vld [vmem:[%s3681_s22 + $0x58] sm:$0xf]  ;;  %s4696_s24 = scalar_lea.vmem %s4778_s4, %s3669_s11 }
  0x12   : > { %v458_v14 = vmul.bf16 0.0|0.0, %v413_v11  ;;  %v459_v15 = vmul.bf16 0.0|0.0, %v414_v12  ;;  %v438_v16 = vld [vmem:[%s3681_s22 + $0x5c] sm:$0xf]  ;;  %v482_v17 = vmul.bf16 1.0|1.0, %v437_v13 }
  0x13   : > { %v483_v18 = vmul.bf16 1.0|1.0, %v438_v16  ;;  %v415_v31 = vld [vmem:[%s3681_s22] sm:$0xf]  ;;  %v416_v32 = vld [vmem:[%s3681_s22 + $0x4] sm:$0xf] }
  0x14   : > { %2948 = vmatpush3.bf16.msra.mxu0 %v3508_v7  ;;  %3472 = vmatpush3.bf16.msra.mxu1 %v3508_v7  ;;  %v3698_v20 = vcombine.low %v458_v14, %v459_v15  ;;  %v460_v33 = vmul.bf16 1.0|1.0, %v415_v31  ;;  %v439_v34 = vld [vmem:[%s3681_s22 + $0x60] sm:$0xf]  ;;  %v461_v38 = vmul.bf16 1.0|1.0, %v416_v32 }
  0x15   : > { %2949 = vmatprep.subr.bf16.mxu0 %v3509_v8  ;;  %3465 = vmatprep.subr.bf16.mxu1 %v3509_v8  ;;  %v3703_v22 = vcombine.low %v482_v17, %v483_v18  ;;  %v440_v39 = vld [vmem:[%s3681_s22 + $0x64] sm:$0xf]  ;;  %v484_v43 = vmul.bf16 1.0|1.0, %v439_v34  ;;  %v417_v62 = vld [vmem:[%s3681_s22 + $0x8] sm:$0xf] }
  0x16   : > { %1450 = vmatprep.mubr.bf16.mxu0 %v3698_v20  ;;  %v585_v23 = vshrl.u32 %v3698_v20, 16  ;;  %v588_v25 = vshll.u32 %v3698_v20, 16  ;;  %v485_v44 = vmul.bf16 1.0|1.0, %v440_v39  ;;  %v3749_v47 = vcombine.low %v460_v33, %v461_v38  ;;  %v418_v0 = vld [vmem:[%s3681_s22 + $0xc] sm:$0xf] }
  0x17   : > { %1546 = vmatprep.mubr.bf16.mxu1 %v3703_v22  ;;  %v669_v26 = vshrl.u32 %v3703_v22, 16  ;;  %v672_v28 = vshll.u32 %v3703_v22, 16  ;;  %v462_v1 = vmul.bf16 1.0|1.0, %v417_v62  ;;  %v441_v2 = vld [vmem:[%s3681_s22 + $0x68] sm:$0xf] }
  0x18   : > { %2950 = vmatpush3.bf16.msra.mxu0 %v3510_v9  ;;  %3473 = vmatpush3.bf16.msra.mxu1 %v3510_v9  ;;  %v587_v27 = vrot.slane %v585_v23, 7  ;;  %v3754_v49 = vcombine.low %v484_v43, %v485_v44  ;;  %v592_v52 = vshrl.u32 %v3749_v47, 16  ;;  %v595_v53 = vshll.u32 %v3749_v47, 16  ;;  %v442_v5 = vld [vmem:[%s3681_s22 + $0x6c] sm:$0xf]  ;;  %v3524_v7 = vld [vmem:[%s4777_s3 + $0x90] sm:$0xff]  }
  0x19   : > { %2951 = vmatprep.subr.bf16.mxu0 %v3511_v10  ;;  %3466 = vmatprep.subr.bf16.mxu1 %v3511_v10  ;;  %v671_v30 = vrot.slane %v669_v26, 7  ;;  %v463_v4 = vmul.bf16 1.0|1.0, %v418_v0  ;;  %v486_v6 = vmul.bf16 1.0|1.0, %v441_v2  ;;  %v3525_v13 = vld [vmem:[%s4777_s3 + $0xd8] sm:$0xff]  }
  0x1a   : > { %v590_v36 = vor.u32 %v588_v25, %v587_v27  ;;  %v676_v54 = vshrl.u32 %v3754_v49, 16  ;;  %v679_v55 = vshll.u32 %v3754_v49, 16  ;;  %v594_v57 = vrot.slane %v592_v52, 7  ;;  %v3527_v16 = vld [vmem:[%s4777_s3 + $0x98] sm:$0xff]   ;;  %v420_v27 = vld [vmem:[%s3681_s22 + $0x14] sm:$0xf] }
  0x1b   : > { %v674_v37 = vor.u32 %v672_v28, %v671_v30  ;;  %v487_v8 = vmul.bf16 1.0|1.0, %v442_v5  ;;  %v3804_v11 = vcombine.low %v462_v1, %v463_v4  ;;  %v465_v31 = vmul.bf16 1.0|1.0, %v420_v27  ;;  %v443_v32 = vld [vmem:[%s3681_s22 + $0x70] sm:$0xf] }
  0x1c   : > { %2952 = vmatpush3.bf16.msra.mxu0 %v3512_v19  ;;  %3474 = vmatpush3.bf16.msra.mxu1 %v3512_v19  ;;  %v731_v50 = vsel %vm3733_vm2, 0, %v590_v36  ;;  %v678_v59 = vrot.slane %v676_v54, 7  ;;  %v597_v63 = vor.u32 %v595_v53, %v594_v57  ;;  %v419_v19 = vld [vmem:[%s3681_s22 + $0x10] sm:$0xf]  ;;  %v488_v36 = vmul.bf16 1.0|1.0, %v443_v32 }
  0x1d   : > { %2953 = vmatprep.subr.bf16.mxu0 %v3513_v21  ;;  %3467 = vmatprep.subr.bf16.mxu1 %v3513_v21  ;;  %v3760_v51 = vsel %vm3733_vm2, 0, %v674_v37  ;;  %v3806_v12 = vcombine.low %v486_v6, %v487_v8  ;;  %v599_v14 = vshrl.u32 %v3804_v11, 16  ;;  %v602_v15 = vshll.u32 %v3804_v11, 16  ;;  %v3534_v33 = vld [vmem:[%s4777_s3 + $0x150] sm:$0xff]   ;;  %v3530_v38 = vld [vmem:[%s4777_s3 + $0xa0] sm:$0xff]   ;;  %v3531_v43 = vld [vmem:[%s4777_s3 + $0xe8] sm:$0xff]  }
  0x1e   : > { %v681_v3 = vor.u32 %v679_v55, %v678_v59  ;;  %v3798_v9 = vsel %vm3733_vm2, 0, %v597_v63  ;;  %v749_v59 = vrot.slane %v588_v25, 1  ;;  %v3533_v25 = vld [vmem:[%s4777_s3 + $0xf0] sm:$0xff]   ;;  %v421_v63 = vld [vmem:[%s3681_s22 + $0x18] sm:$0xf]  ;;  %v3539_v20 = vld [vmem:[%s4777_s3 + $0x1c0] sm:$0xff]  }
  0x1f   : > { %v683_v17 = vshrl.u32 %v3806_v12, 16  ;;  %v686_v18 = vshll.u32 %v3806_v12, 16  ;;  %v601_v21 = vrot.slane %v599_v14, 7  ;;  %v422_v0 = vld [vmem:[%s3681_s22 + $0x1c] sm:$0xf]  ;;  %v3535_v5 = vld [vmem:[%s4777_s3 + $0xb0] sm:$0xff]  }
  0x20   : > { %2954 = vmatpush3.bf16.msra.mxu0 %v3514_v24  ;;  %3475 = vmatpush3.bf16.msra.mxu1 %v3514_v24  ;;  %v3802_v10 = vsel %vm3733_vm2, 0, %v681_v3  ;;  %v3529_v24 = vld [vmem:[%s4777_s3 + $0xe0] sm:$0xff]   ;;  %v466_v1 = vmul.bf16 1.0|1.0, %v421_v63  ;;  %v467_v2 = vmul.bf16 1.0|1.0, %v422_v0 }
  0x21   : > { %2955 = vmatprep.subr.bf16.mxu0 %v3515_v29  ;;  %3468 = vmatprep.subr.bf16.mxu1 %v3515_v29  ;;  %v464_v29 = vmul.bf16 1.0|1.0, %v419_v19  ;;  %v685_v30 = vrot.slane %v683_v17, 7  ;;  %v604_v34 = vor.u32 %v602_v15, %v601_v21  ;;  %v3541_v8 = vld [vmem:[%s4777_s3 + $0x158] sm:$0xff]   ;;  %v425_v32 = vld [vmem:[%s3681_s22 + $0x28] sm:$0xf] }
  0x22   : > { %v3894_v6 = vcombine.low %v466_v1, %v467_v2  ;;  %v3542_v21 = vld [vmem:[%s4777_s3 + $0x118] sm:$0xff]   ;;  %v3544_v63 = vld [vmem:[%s4777_s3 + $0x1c8] sm:$0xff]   ;;  %v3545_v0 = vld [vmem:[%s4777_s3 + $0x120] sm:$0xff]  }
  0x23   : > { %v688_v37 = vor.u32 %v686_v18, %v685_v30  ;;  %v3843_v39 = vcombine.low %v464_v29, %v465_v31  ;;  %v3538_v27 = vld [vmem:[%s4777_s3 + $0xb8] sm:$0xff]   ;;  %v750_v29 = vor.u32 %v749_v59, %v585_v23  ;;  %v424_v30 = vld [vmem:[%s3681_s22 + $0x24] sm:$0xf]  ;;  %v427_v1 = vld [vmem:[%s3681_s22 + $0x30] sm:$0xf] }
  0x24   : > { %2956 = vmatpush3.bf16.msra.mxu0 %v3516_v35  ;;  %3476 = vmatpush3.bf16.msra.mxu1 %v3516_v35  ;;  %v444_v35 = vld [vmem:[%s3681_s22 + $0x74] sm:$0xf]  ;;  %v616_v19 = vshll.u32 %v3894_v6, 16  ;;  %v469_v23 = vmul.bf16 1.0|1.0, %v424_v30  ;;  %v3546_v2 = vld [vmem:[%s4777_s3 + $0x188] sm:$0xff]  }
  0x25   : > { %3053 = vmatprep.subr.bf16.mxu1 %v3517_v41  ;;  %3165 = vmatprep.subr.bf16.mxu0 %v3518_v42  ;;  %v489_v41 = vmul.bf16 1.0|1.0, %v444_v35  ;;  %v3847_v42 = vsel %vm3733_vm2, 0, %v604_v34  ;;  %v3854_v44 = vsel %vm3733_vm2, 0, %v688_v37  ;;  %v426_v35 = vld [vmem:[%s3681_s22 + $0x2c] sm:$0xf] }
  0x26   : > { %v471_v37 = vmul.bf16 1.0|1.0, %v426_v35 }
  0x27   : > { %1451 = vmatmul.mubr.bf16.vlgmr.msra.gmra.mrb[0].mxu0 %v731_v50  ;;  %1547 = vmatmul.mubr.bf16.vlgmr.msra.gmra.mrb[0].mxu1 %v3760_v51  ;;  %v3536_v50 = vld [vmem:[%s4777_s3 + $0x110] sm:$0xff]  }
  0x28   : > { %3054 = vmatpush3.bf16.msra.mxu1 %v3519_v45  ;;  %3166 = vmatpush3.bf16.msra.mxu0 %v3520_v46  ;;  %v3856_v45 = vcombine.low %v488_v36, %v489_v41  ;;  %v606_v46 = vshrl.u32 %v3843_v39, 16  ;;  %v470_v36 = vmul.bf16 1.0|1.0, %v425_v32  ;;  %v430_v32 = vld [vmem:[%s3681_s22 + $0x3c] sm:$0xf] }
  0x29   : > { %3055 = vmatprep.subr.bf16.mxu1 %v3521_v48  ;;  %1458 = vmatprep.mubr.bf16.mxu0 %v3749_v47  ;;  %v609_v48 = vshll.u32 %v3843_v39, 16 }
  0x2a   : > { %1554 = vmatprep.mubr.bf16.mxu1 %v3754_v49  ;;  %3167 = vmatprep.subr.bf16.mxu0 %v3526_v58  ;;  %v690_v57 = vshrl.u32 %v3856_v45, 16  ;;  %v693_v58 = vshll.u32 %v3856_v45, 16 }
  0x2c   : > { %3056 = vmatpush3.bf16.msra.mxu1 %v3522_v56  ;;  %3168 = vmatpush3.bf16.msra.mxu0 %v3528_v61  ;;  %v608_v56 = vrot.slane %v606_v46, 7  ;;  %v692_v62 = vrot.slane %v690_v57, 7 }
  0x2d   : > { %3057 = vmatprep.subr.bf16.mxu1 %v3523_v60  ;;  %3169 = vmatprep.subr.bf16.mxu0 %v3534_v33  ;;  %v3532_v60 = vld [vmem:[%s4777_s3 + $0xa8] sm:$0xff]  }
  0x2e   : > { %v611_v61 = vor.u32 %v609_v48, %v608_v56  ;;  %v695_v4 = vor.u32 %v693_v58, %v692_v62  ;;  %v3944_v56 = vcombine.low %v470_v36, %v471_v37 }
  0x2f   : > { %1459 = vmatmul.mubr.bf16.gmra.mrb[4].mxu0 %v3798_v9  ;;  %1555 = vmatmul.mubr.bf16.gmra.mrb[4].mxu1 %v3802_v10 }
  0x30   : > { %3058 = vmatpush3.bf16.msra.mxu1 %v3524_v7  ;;  %1466 = vmatprep.mubr.bf16.mxu0 %v3804_v11  ;;  %v3887_v3 = vsel %vm3733_vm2, 0, %v611_v61  ;;  %v3898_v7 = vsel %vm3733_vm2, 0, %v695_v4  ;;  %v753_v61 = vrot.slane %v602_v15, 1  ;;  %v627_v15 = vshrl.u32 %v3944_v56, 16  ;;  %v428_v4 = vld [vmem:[%s3681_s22 + $0x34] sm:$0xf] }
  0x31   : > { %3059 = vmatprep.subr.bf16.mxu1 %v3525_v13  ;;  %1562 = vmatprep.mubr.bf16.mxu1 %v3806_v12  ;;  %v3537_v13 = vld [vmem:[%s4777_s3 + $0xf8] sm:$0xff]  }
  0x32   : > { %3170 = vmatpush3.bf16.msra.mxu0 %v3536_v50  ;;  %v806_v50 = vsel %vm3925_vm5, %v750_v29, 0  ;;  %v3548_v29 = vld [vmem:[%s4777_s3 + $0x128] sm:$0xff]   ;;  %v629_v30 = vrot.slane %v627_v15, 7 }
  0x33   : > { %3171 = vmatprep.subr.bf16.mxu0 %v3541_v8  ;;  %v3547_v8 = vld [vmem:[%s4777_s3 + $0x168] sm:$0xff]  }
  0x34   : > { %3060 = vmatpush3.bf16.msra.mxu1 %v3527_v16  ;;  %v613_v16 = vshrl.u32 %v3894_v6, 16 }
  0x35   : > { %3061 = vmatprep.subr.bf16.mxu1 %v3529_v24  ;;  %v423_v24 = vld [vmem:[%s3681_s22 + $0x20] sm:$0xf] }
  0x36   : > { %v468_v31 = vmul.bf16 1.0|1.0, %v423_v24  ;;  %v615_v33 = vrot.slane %v613_v16, 7  ;;  %3172 = vmatpush3.bf16.msra.mxu0 %v3542_v21 }
  0x37   : > { %1467 = vmatmul.mubr.bf16.gmra.mrb[8].mxu0 %v3847_v42  ;;  %1563 = vmatmul.mubr.bf16.gmra.mrb[8].mxu1 %v3854_v44 }
  0x38   : > { %3062 = vmatpush3.bf16.msra.mxu1 %v3530_v38  ;;  %1474 = vmatprep.mubr.bf16.mxu0 %v3843_v39  ;;  %v618_v38 = vor.u32 %v616_v19, %v615_v33  ;;  %v3937_v41 = vcombine.low %v468_v31, %v469_v23  ;;  %v429_v31 = vld [vmem:[%s3681_s22 + $0x38] sm:$0xf]  ;;  %v3549_v33 = vld [vmem:[%s4777_s3 + $0x1d0] sm:$0xff]   ;;  %v475_v23 = vmul.bf16 1.0|1.0, %v430_v32 }
  0x39   : > { %3063 = vmatprep.subr.bf16.mxu1 %v3531_v43  ;;  %1570 = vmatprep.mubr.bf16.mxu1 %v3856_v45  ;;  %v3543_v43 = vld [vmem:[%s4777_s3 + $0x160] sm:$0xff]   ;;  %v433_v32 = vld [vmem:[%s3681_s22 + $0x48] sm:$0xf] }
  0x3a   : > { %v620_v59 = vshrl.u32 %v3937_v41, 16  ;;  %3173 = vmatprep.subr.bf16.mxu0 %v3543_v43  ;;  %v3956_v62 = vsel %vm3733_vm2, 0, %v618_v38  ;;  %v754_v38 = vor.u32 %v753_v61, %v599_v14  ;;  %v3550_v43 = vld [vmem:[%s4777_s3 + $0x190] sm:$0xff]  }
  0x3b   : > { %3174 = vmatpush3.bf16.msra.mxu0 %v3545_v0  ;;  %v3552_v14 = vld [vmem:[%s4777_s3 + $0x130] sm:$0xff]   ;;  %v755_v0 = vrot.slane %v609_v48, 1 }
  0x3c   : > { %3064 = vmatpush3.bf16.msra.mxu1 %v3532_v60  ;;  %v751_v60 = vrot.slane %v595_v53, 1  ;;  %v622_v53 = vrot.slane %v620_v59, 7  ;;  %3175 = vmatprep.subr.bf16.mxu0 %v3547_v8 }
  0x3d   : > { %3065 = vmatprep.subr.bf16.mxu1 %v3533_v25  ;;  %v623_v25 = vshll.u32 %v3937_v41, 16 }
  0x3e   : > { %v752_v24 = vor.u32 %v751_v60, %v592_v52  ;;  %v474_v52 = vmul.bf16 1.0|1.0, %v429_v31 }
  0x3f   : > { %1475 = vmatmul.mubr.bf16.gmra.mrb[12].mxu0 %v3887_v3  ;;  %1571 = vmatmul.mubr.bf16.gmra.mrb[12].mxu1 %v3898_v7  ;;  %v625_v21 = vor.u32 %v623_v25, %v622_v53  ;;  %v757_v53 = vrot.slane %v616_v19, 1  ;;  %v3554_v19 = vld [vmem:[%s4777_s3 + $0x198] sm:$0xff]  }
  0x40   : > { %3066 = vmatpush3.bf16.msra.mxu1 %v3535_v5  ;;  %1482 = vmatprep.mubr.bf16.mxu0 %v3894_v6  ;;  %v472_v5 = vmul.bf16 1.0|1.0, %v427_v1  ;;  %v4002_v36 = vsel %vm3925_vm5, %v752_v24, 0  ;;  %v4017_v60 = vcombine.low %v474_v52, %v475_v23  ;;  %v431_v1 = vld [vmem:[%s3681_s22 + $0x40] sm:$0xf]  ;;  %v756_v24 = vor.u32 %v755_v0, %v606_v46 }
  0x41   : > { %3067 = vmatprep.subr.bf16.mxu1 %v3537_v13  ;;  %1611 = vmatprep.mubr.bf16.mxu1 %v3798_v9  ;;  %v3540_v9 = vld [vmem:[%s4777_s3 + $0x180] sm:$0xff]   ;;  %v473_v13 = vmul.bf16 1.0|1.0, %v428_v4  ;;  %v3998_v35 = vsel %vm3733_vm2, 0, %v625_v21  ;;  %v476_v48 = vmul.bf16 1.0|1.0, %v431_v1  ;;  %v758_v52 = vor.u32 %v757_v53, %v613_v16 }
  0x42   : > { %3176 = vmatpush3.bf16.msra.mxu0 %v3548_v29  ;;  %v641_v8 = vshrl.u32 %v4017_v60, 16  ;;  %v3555_v21 = vld [vmem:[%s4777_s3 + $0x178] sm:$0xff]   ;;  %v644_v46 = vshll.u32 %v4017_v60, 16  ;;  %v3557_v23 = vld [vmem:[%s4777_s3 + $0x1e0] sm:$0xff]  }
  0x43   : > { %v3559_v0 = vld [vmem:[%s4777_s3 + $0x1a0] sm:$0xff]   ;;  %v4095_v1 = vsel %vm3925_vm5, %v758_v52, 0  ;;  %v435_v52 = vld [vmem:[%s3681_s22 + $0x50] sm:$0xf] }
  0x44   : > { %3068 = vmatpush3.bf16.msra.mxu1 %v3538_v27  ;;  %v630_v27 = vshll.u32 %v3944_v56, 16 }
  0x45   : > { %3277 = vmatprep.subr.bf16.mxu1 %v3539_v20  ;;  %v3994_v20 = vcombine.low %v472_v5, %v473_v13  ;;  %v432_v5 = vld [vmem:[%s3681_s22 + $0x44] sm:$0xf]  ;;  %v3553_v13 = vld [vmem:[%s4777_s3 + $0x1d8] sm:$0xff]  }
  0x46   : > { %v632_v37 = vor.u32 %v630_v27, %v629_v30  ;;  %v477_v29 = vmul.bf16 1.0|1.0, %v432_v5  ;;  %v3556_v30 = vld [vmem:[%s4777_s3 + $0x138] sm:$0xff]  }
  0x47   : > { %1483 = vmatmul.mubr.bf16.gmra.mrb[16].mxu0 %v3956_v62  ;;  %1612 = vmatmul.mubr.bf16.vlgmr.msra.gmra.mrb[16].mxu1 %v806_v50  ;;  %v3551_v50 = vld [vmem:[%s4777_s3 + $0x170] sm:$0xff]   ;;  %v637_v4 = vshll.u32 %v3994_v20, 16 }
  0x48   : > { %3278 = vmatpush3.bf16.msra.mxu1 %v3540_v9  ;;  %1490 = vmatprep.mubr.bf16.mxu0 %v3937_v41  ;;  %v634_v9 = vshrl.u32 %v3994_v20, 16  ;;  %v4026_v61 = vsel %vm3733_vm2, 0, %v632_v37  ;;  %v4073_v37 = vsel %vm3925_vm5, %v756_v24, 0  ;;  %v775_v24 = vrot.slane %v679_v55, 1 }
  0x49   : > { %1619 = vmatprep.mubr.bf16.mxu1 %v3847_v42  ;;  %3279 = vmatprep.subr.bf16.mxu1 %v3544_v63  ;;  %v4030_v63 = vsel %vm3925_vm5, %v754_v38, 0  ;;  %v4075_v38 = vcombine.low %v476_v48, %v477_v29  ;;  %v759_v48 = vrot.slane %v623_v25, 1  ;;  %v3563_v25 = vld [vmem:[%s4777_s3 + $0x1f0] sm:$0xff]  }
  0x4a   : > { %3177 = vmatprep.subr.bf16.mxu0 %v3551_v50  ;;  %v434_v50 = vld [vmem:[%s3681_s22 + $0x4c] sm:$0xf] }
  0x4b   : > { %3178 = vmatpush3.bf16.msra.mxu0 %v3552_v14  ;;  %v478_v14 = vmul.bf16 1.0|1.0, %v433_v32  ;;  %v648_v5 = vshrl.u32 %v4075_v38, 16  ;;  %v3565_v32 = vld [vmem:[%s4777_s3 + $0x1b0] sm:$0xff]  }
  0x4c   : > { %3280 = vmatpush3.bf16.msra.mxu1 %v3546_v2  ;;  %v636_v2 = vrot.slane %v634_v9, 7  ;;  %3179 = vmatprep.subr.bf16.mxu0 %v3555_v21  ;;  %v479_v21 = vmul.bf16 1.0|1.0, %v434_v50  ;;  %v3566_v50 = vld [vmem:[%s4777_s3 + $0x1f8] sm:$0xff]  }
  0x4d   : > { %3281 = vmatprep.subr.bf16.mxu1 %v3549_v33  ;;  %v643_v33 = vrot.slane %v641_v8, 7 }
  0x4e   : > { %v639_v31 = vor.u32 %v637_v4, %v636_v2  ;;  %v3560_v2 = vld [vmem:[%s4777_s3 + $0x1e8] sm:$0xff]   ;;  %v4131_v55 = vcombine.low %v478_v14, %v479_v21 }
  0x4f   : > { %1491 = vmatmul.mubr.bf16.gmra.mrb[20].mxu0 %v3998_v35  ;;  %1620 = vmatmul.mubr.bf16.gmra.mrb[20].mxu1 %v4002_v36  ;;  %v646_v53 = vor.u32 %v644_v46, %v643_v33  ;;  %v4129_v33 = vor.u32 %v775_v24, %v676_v54  ;;  %v779_v54 = vrot.slane %v693_v58, 1 }
  0x50   : > { %1498 = vmatprep.mubr.bf16.mxu0 %v3944_v56  ;;  %1627 = vmatprep.mubr.bf16.mxu1 %v3887_v3  ;;  %v4085_v16 = vsel %vm3733_vm2, 0, %v639_v31  ;;  %v650_v31 = vrot.slane %v648_v5, 7  ;;  %v655_v14 = vshrl.u32 %v4131_v55, 16  ;;  %v658_v24 = vshll.u32 %v4131_v55, 16 }
  0x51   : > { %3282 = vmatpush3.bf16.msra.mxu1 %v3550_v43  ;;  %3180 = vmatpush3.bf16.msra.mxu0 %v3556_v30  ;;  %v4080_v43 = vld [vmem:[%s4777_s3 + $0x200] sm:$0xff]   ;;  %v4118_v29 = vsel %vm3733_vm2, 0, %v646_v53  ;;  %v777_v30 = vrot.slane %v686_v18, 1  ;;  %v436_v18 = vld [vmem:[%s3681_s22 + $0x54] sm:$0xf]  ;;  %v4158_v58 = vor.u32 %v779_v54, %v690_v57 }
  0x52   : > { %3283 = vmatprep.subr.bf16.mxu1 %v3553_v13  ;;  %3413 = vmatprep.subr.bf16.mxu0 %v4080_v43  ;;  %v651_v13 = vshll.u32 %v4075_v38, 16  ;;  %v480_v53 = vmul.bf16 1.0|1.0, %v435_v52 }
  0x55   : > { %3284 = vmatpush3.bf16.msra.mxu1 %v3554_v19  ;;  %v3562_v19 = vld [vmem:[%s4777_s3 + $0x1a8] sm:$0xff]  }
  0x56   : > { %3285 = vmatprep.subr.bf16.mxu1 %v3557_v23  ;;  %v4136_v23 = vor.u32 %v777_v30, %v683_v17  ;;  %v760_v17 = vor.u32 %v759_v48, %v620_v59  ;;  %v761_v48 = vrot.slane %v630_v27, 1 }
  0x57   : > { %1499 = vmatmul.mubr.bf16.gmra.mrb[24].mxu0 %v4026_v61  ;;  %1628 = vmatmul.mubr.bf16.gmra.mrb[24].mxu1 %v4030_v63 }
  0x58   : > { %1506 = vmatprep.mubr.bf16.mxu0 %v3994_v20  ;;  %1635 = vmatprep.mubr.bf16.mxu1 %v3956_v62  ;;  %v4162_v59 = vsel %vm3925_vm5, %v760_v17, 0  ;;  %v762_v27 = vor.u32 %v761_v48, %v627_v15  ;;  %v769_v48 = vrot.slane %v658_v24, 1 }
  0x59   : > { %3286 = vmatpush3.bf16.msra.mxu1 %v3559_v0  ;;  %v3568_v0 = vld [vmem:[%s4777_s3 + $0x1b8] sm:$0xff]  }
  0x5a   : > { %3287 = vmatprep.subr.bf16.mxu1 %v3560_v2  ;;  %v653_v2 = vor.u32 %v651_v13, %v650_v31 }
  0x5c   : > { %v4168_v21 = vsel %vm3733_vm2, 0, %v653_v2 }
  0x5d   : > { %3288 = vmatpush3.bf16.msra.mxu1 %v3562_v19  ;;  %v481_v19 = vmul.bf16 1.0|1.0, %v436_v18  ;;  %v4188_v18 = vsel %vm3925_vm5, %v762_v27, 0  ;;  %v3571_v27 = vld [vmem:[%s4777_s3 + $0x230] sm:$0xff]  }
  0x5e   : > { %3289 = vmatprep.subr.bf16.mxu1 %v3563_v25  ;;  %v657_v25 = vrot.slane %v655_v14, 7 }
  0x5f   : > { %1507 = vmatmul.mubr.bf16.gmra.mrb[28].mxu0 %v4085_v16  ;;  %1636 = vmatmul.mubr.bf16.gmra.mrb[28].mxu1 %v4073_v37  ;;  %v4171_v30 = vcombine.low %v480_v53, %v481_v19  ;;  %v765_v53 = vrot.slane %v644_v46, 1  ;;  %v767_v19 = vrot.slane %v651_v13, 1  ;;  %v3561_v46 = vld [vmem:[%s4777_s3 + $0x208] sm:$0xff]  }
  0x60   : > { %1514 = vmatprep.mubr.bf16.mxu0 %v4017_v60  ;;  %1643 = vmatprep.mubr.bf16.mxu1 %v3998_v35  ;;  %v660_v57 = vor.u32 %v658_v24, %v657_v25 }
  0x61   : > { %3290 = vmatpush3.bf16.msra.mxu1 %v3565_v32  ;;  %v662_v31 = vshrl.u32 %v4171_v30, 16  ;;  %v763_v32 = vrot.slane %v637_v4, 1 }
  0x62   : > { %3291 = vmatprep.subr.bf16.mxu1 %v3566_v50  ;;  %v4184_v52 = vsel %vm3733_vm2, 0, %v660_v57  ;;  %v3570_v57 = vld [vmem:[%s4777_s3 + $0x228] sm:$0xff]  }
  0x63   : > { %v664_v50 = vrot.slane %v662_v31, 7  ;;  %v764_v4 = vor.u32 %v763_v32, %v634_v9  ;;  %v766_v9 = vor.u32 %v765_v53, %v641_v8  ;;  %v3564_v8 = vld [vmem:[%s4777_s3 + $0x210] sm:$0xff]  }
  0x65   : > { %3292 = vmatpush3.bf16.msra.mxu1 %v3568_v0  ;;  %v665_v0 = vshll.u32 %v4171_v30, 16  ;;  %v4203_v17 = vsel %vm3925_vm5, %v764_v4, 0  ;;  %v4215_v2 = vsel %vm3925_vm5, %v766_v9, 0 }
  0x67   : > { %1515 = vmatmul.mubr.bf16.gmra.mrb[32].mxu0 %v4118_v29  ;;  %1644 = vmatmul.mubr.bf16.gmra.mrb[32].mxu1 %v4095_v1  ;;  %v667_v15 = vor.u32 %v665_v0, %v664_v50  ;;  %v771_v24 = vrot.slane %v665_v0, 1  ;;  %v773_v50 = vrot.slane %v672_v28, 1  ;;  %v445_v0 = vld [vmem:[%s3681_s22 + $0x78] sm:$0xf] }
  0x68   : > { %1522 = vmatprep.mubr.bf16.mxu0 %v4075_v38  ;;  %1651 = vmatprep.mubr.bf16.mxu1 %v4026_v61  ;;  %v490_v28 = vmul.bf16 1.0|1.0, %v445_v0 }
  0x69   : > { %v4199_v54 = vsel %vm3733_vm2, 0, %v667_v15  ;;  %v446_v15 = vld [vmem:[%s3681_s22 + $0x7c] sm:$0xf]  ;;  %v774_v4 = vor.u32 %v773_v50, %v669_v26  ;;  %s2811_s22 = sadd.s32 120, %s3669_s11  ;;  %s2683_s11 = sshll.u32 %s4789_s18, 1 }
  0x6a   : > { %v491_v53 = vmul.bf16 1.0|1.0, %v446_v15  ;;  %s389_s16 = scalar_lea.vmem %s4776_s2, %s2811_s22  ;;  %s411_s27 = scalar_lea.vmem %s4779_s5, %s2683_s11 }
  0x6b   : > { %v4279_v9 = vsel %vm3925_vm5, %v774_v4, 0 }
  0x6f   : > { %1523 = vmatmul.mubr.bf16.gmra.mrb[36].mxu0 %v4168_v21  ;;  %1652 = vmatmul.mubr.bf16.gmra.mrb[36].mxu1 %v4162_v59 }
  0x70   : > { %1530 = vmatprep.mubr.bf16.mxu0 %v4131_v55  ;;  %1659 = vmatprep.mubr.bf16.mxu1 %v4085_v16 }
  0x77   : > { %1531 = vmatmul.mubr.bf16.gmra.mrb[40].mxu0 %v4184_v52  ;;  %1660 = vmatmul.mubr.bf16.gmra.mrb[40].mxu1 %v4188_v18 }
  0x78   : > { %1538 = vmatprep.mubr.bf16.mxu0 %v4171_v30  ;;  %1667 = vmatprep.mubr.bf16.mxu1 %v4118_v29 }
  0x7f   : > { %1539 = vmatmul.mubr.bf16.gmra.mrb[44].mxu0 %v4199_v54  ;;  %1668 = vmatmul.mubr.bf16.gmra.mrb[44].mxu1 %v4203_v17 }
  0x80   : > { %1675 = vmatprep.mubr.bf16.mxu1 %v4168_v21  ;;  %1772 = vmatprep.mubr.bf16.mxu0 %v4002_v36  ;;  %v768_v36 = vor.u32 %v767_v19, %v648_v5  ;;  %v3569_v5 = vld [vmem:[%s4777_s3 + $0x220] sm:$0xff]   ;;  %v4281_v19 = vcombine.low %v490_v28, %v491_v53 }
  0x82   : > { %v4234_v13 = vsel %vm3925_vm5, %v768_v36, 0  ;;  %v697_v26 = vshrl.u32 %v4281_v19, 16 }
  0x84   : > { %v699_v36 = vrot.slane %v697_v26, 7 }
  0x87   : > { %1676 = vmatmul.mubr.bf16.gmra.mrb[48].mxu1 %v4215_v2  ;;  %1773 = vmatmul.mubr.bf16.vlgmr.msra.gmra.mrb[48].mxu0 %v3749_v47  ;;  %v3567_v47 = vld [vmem:[%s4777_s3 + $0x218] sm:$0xff]  }
  0x88   : > { %3414 = vmatpush3.bf16.msra.mxu0 %v4080_v43  ;;  %1683 = vmatprep.mubr.bf16.mxu1 %v4184_v52  ;;  %v770_v43 = vor.u32 %v769_v48, %v655_v14  ;;  %v772_v14 = vor.u32 %v771_v24, %v662_v31  ;;  %v3572_v31 = vld [vmem:[%s4777_s3 + $0x238] sm:$0xff]  }
  0x89   : > { %1780 = vmatprep.mubr.bf16.mxu0 %v4030_v63  ;;  %3415 = vmatprep.subr.bf16.mxu0 %v3561_v46 }
  0x8a   : > { %v4248_v25 = vsel %vm3925_vm5, %v770_v43, 0  ;;  %v4262_v32 = vsel %vm3925_vm5, %v772_v14, 0  ;;  %v4314_v43 = vsel %vm3925_vm5, %v4158_v58, 0 }
  0x8c   : > { %3416 = vmatpush3.bf16.msra.mxu0 %v3561_v46  ;;  %v4291_v46 = vsel %vm3925_vm5, %v4129_v33, 0 }
  0x8d   : > { %3417 = vmatprep.subr.bf16.mxu0 %v3564_v8 }
  0x8f   : > { %1684 = vmatmul.mubr.bf16.gmra.mrb[52].mxu1 %v4234_v13  ;;  %1781 = vmatmul.mubr.bf16.gmra.mrb[52].mxu0 %v3804_v11 }
  0x90   : > { %1691 = vmatprep.mubr.bf16.mxu1 %v4199_v54  ;;  %1788 = vmatprep.mubr.bf16.mxu0 %v4073_v37 }
  0x91   : > { %3418 = vmatpush3.bf16.msra.mxu0 %v3564_v8  ;;  %v700_v8 = vshll.u32 %v4281_v19, 16 }
  0x92   : > { %3419 = vmatprep.subr.bf16.mxu0 %v3567_v47 }
  0x93   : > { %v702_v48 = vor.u32 %v700_v8, %v699_v36 }
  0x95   : > { %3420 = vmatpush3.bf16.msra.mxu0 %v3567_v47  ;;  %v4301_v47 = vsel %vm3925_vm5, %v4136_v23, 0  ;;  %v4305_v33 = vsel %vm3733_vm2, 0, %v702_v48 }
  0x96   : > { %3421 = vmatprep.subr.bf16.mxu0 %v3569_v5 }
  0x97   : > { %1692 = vmatmul.mubr.bf16.gmra.mrb[56].mxu1 %v4248_v25  ;;  %1789 = vmatmul.mubr.bf16.gmra.mrb[56].mxu0 %v3843_v39 }
  0x98   : > { %1699 = vmatprep.mubr.bf16.mxu1 %v3760_v51  ;;  %1796 = vmatprep.mubr.bf16.mxu0 %v4095_v1 }
  0x99   : > { %3422 = vmatpush3.bf16.msra.mxu0 %v3569_v5 }
  0x9a   : > { %3423 = vmatprep.subr.bf16.mxu0 %v3570_v57 }
  0x9d   : > { %3424 = vmatpush3.bf16.msra.mxu0 %v3570_v57 }
  0x9e   : > { %3425 = vmatprep.subr.bf16.mxu0 %v3571_v27 }
  0x9f   : > { %1700 = vmatmul.mubr.bf16.gmra.mrb[60].mxu1 %v4262_v32  ;;  %1797 = vmatmul.mubr.bf16.gmra.mrb[60].mxu0 %v3894_v6 }
  0xa0   : > { %1707 = vmatprep.mubr.bf16.mxu1 %v3802_v10  ;;  %1804 = vmatprep.mubr.bf16.mxu0 %v4162_v59 }
  0xa1   : > { %3426 = vmatpush3.bf16.msra.mxu0 %v3571_v27 }
  0xa2   : > { %3427 = vmatprep.subr.bf16.mxu0 %v3572_v31 }
  0xa5   : > { %3428 = vmatpush3.bf16.msra.mxu0 %v3572_v31 }
  0xa7   : > { %1708 = vmatmul.mubr.bf16.gmra.mrb[64].mxu1 %v4279_v9  ;;  %1805 = vmatmul.mubr.bf16.gmra.mrb[64].mxu0 %v3937_v41 }
  0xa8   : > { %1715 = vmatprep.mubr.bf16.mxu1 %v3854_v44  ;;  %1812 = vmatprep.mubr.bf16.mxu0 %v4188_v18 }
  0xaf   : > { %1716 = vmatmul.mubr.bf16.gmra.mrb[68].mxu1 %v4291_v46  ;;  %1813 = vmatmul.mubr.bf16.gmra.mrb[68].mxu0 %v3944_v56 }
  0xb0   : > { %1723 = vmatprep.mubr.bf16.mxu1 %v3898_v7  ;;  %1820 = vmatprep.mubr.bf16.mxu0 %v4203_v17 }
  0xb7   : > { %1724 = vmatmul.mubr.bf16.gmra.mrb[72].mxu1 %v4301_v47  ;;  %1821 = vmatmul.mubr.bf16.gmra.mrb[72].mxu0 %v3994_v20 }
  0xb8   : > { %1731 = vmatprep.mubr.bf16.mxu1 %v4305_v33  ;;  %1828 = vmatprep.mubr.bf16.mxu0 %v4215_v2 }
  0xbf   : > { %1732 = vmatmul.mubr.bf16.gmra.mrb[76].mxu1 %v4314_v43  ;;  %1829 = vmatmul.mubr.bf16.gmra.mrb[76].mxu0 %v4017_v60 }
  0xc0   : > { %1836 = vmatprep.mubr.bf16.mxu0 %v4234_v13  ;;  %1933 = vmatprep.mubr.bf16.mxu1 %v3804_v11  ;;  %v781_v11 = vrot.slane %v700_v8, 1 }
  0xc7   : > { %1837 = vmatmul.mubr.bf16.gmra.mrb[80].mxu0 %v4075_v38  ;;  %1934 = vmatmul.mubr.bf16.vlgmr.msra.gmra.mrb[80].mxu1 %v3847_v42 }
  0xc8   : > { %1844 = vmatprep.mubr.bf16.mxu0 %v4248_v25  ;;  %1941 = vmatprep.mubr.bf16.mxu1 %v3843_v39  ;;  %v782_v39 = vor.u32 %v781_v11, %v697_v26 }
  0xca   : > { %v4346_v42 = vsel %vm3925_vm5, %v782_v39, 0 }
  0xcf   : > { %1845 = vmatmul.mubr.bf16.gmra.mrb[84].mxu0 %v4131_v55  ;;  %1942 = vmatmul.mubr.bf16.gmra.mrb[84].mxu1 %v3887_v3 }
  0xd0   : > { %1852 = vmatprep.mubr.bf16.mxu0 %v4262_v32  ;;  %1949 = vmatprep.mubr.bf16.mxu1 %v3894_v6 }
  0xd7   : > { %1853 = vmatmul.mubr.bf16.gmra.mrb[88].mxu0 %v4171_v30  ;;  %1950 = vmatmul.mubr.bf16.gmra.mrb[88].mxu1 %v3956_v62 }
  0xd8   : > { %1860 = vmatprep.mubr.bf16.mxu0 %v4279_v9  ;;  %1957 = vmatprep.mubr.bf16.mxu1 %v3937_v41 }
  0xdf   : > { %1861 = vmatmul.mubr.bf16.gmra.mrb[92].mxu0 %v3703_v22  ;;  %1958 = vmatmul.mubr.bf16.gmra.mrb[92].mxu1 %v3998_v35 }
  0xe0   : > { %1868 = vmatprep.mubr.bf16.mxu0 %v4291_v46  ;;  %1965 = vmatprep.mubr.bf16.mxu1 %v3944_v56 }
  0xe7   : > { %1869 = vmatmul.mubr.bf16.gmra.mrb[96].mxu0 %v3754_v49  ;;  %1966 = vmatmul.mubr.bf16.gmra.mrb[96].mxu1 %v4026_v61 }
  0xe8   : > { %1876 = vmatprep.mubr.bf16.mxu0 %v4301_v47  ;;  %1973 = vmatprep.mubr.bf16.mxu1 %v3994_v20 }
  0xef   : > { %1877 = vmatmul.mubr.bf16.gmra.mrb[100].mxu0 %v3806_v12  ;;  %1974 = vmatmul.mubr.bf16.gmra.mrb[100].mxu1 %v4085_v16 }
  0xf0   : > { %1884 = vmatprep.mubr.bf16.mxu0 %v4314_v43  ;;  %1981 = vmatprep.mubr.bf16.mxu1 %v4017_v60 }
  0xf7   : > { %1885 = vmatmul.mubr.bf16.gmra.mrb[104].mxu0 %v3856_v45  ;;  %1982 = vmatmul.mubr.bf16.gmra.mrb[104].mxu1 %v4118_v29 }
  0xf8   : > { %1892 = vmatprep.mubr.bf16.mxu0 %v4346_v42  ;;  %1989 = vmatprep.mubr.bf16.mxu1 %v4075_v38 }
  0xfa   : > { %v2957_v3 = vpop.f32.mrb[0].mxu0  ;;  %v3029_v6 = vpop.f32.mrb[0].mxu1 }
  0xfb   : > { %v2958_v41 = vpop.f32.mrb[1].mxu0  ;;  %v3030_v56 = vpop.f32.mrb[1].mxu1 }
  0xfc   : > { %v4352_v62 = vadd.f32 %v2958_v41, %v2957_v3  ;;  %v4354_v20 = vadd.f32 %v3030_v56, %v3029_v6  ;;  %v2960_v35 = vpop.f32.mrb[2].mxu0  ;;  %v3032_v60 = vpop.f32.mrb[2].mxu1 }
  0xfd   : > { %v2961_v61 = vpop.f32.mrb[3].mxu0  ;;  %v3033_v16 = vpop.f32.mrb[3].mxu1 }
  0xfe   : > { %v4356_v23 = vadd.f32 %v2961_v61, %v2960_v35  ;;  %v4358_v58 = vadd.f32 %v3033_v16, %v3032_v60 }
  0xff   : > { %1893 = vmatmul.mubr.bf16.gmra.mrb[108].mxu0 %v4281_v19  ;;  %1990 = vmatmul.mubr.bf16.gmra.mrb[108].mxu1 %v4168_v21 }
 0x100   : > { %1997 = vmatprep.mubr.bf16.mxu1 %v4131_v55  ;;  %3429 = vmatprep.mubr.bf16.mxu0 %v4030_v63 }
 0x102   : > { %v2963_v38 = vpop.f32.mrb[4].mxu0  ;;  %v3035_v29 = vpop.f32.mrb[4].mxu1 }
 0x103   : > { %v2964_v5 = vpop.f32.mrb[5].mxu0  ;;  %v3036_v24 = vpop.f32.mrb[5].mxu1 }
 0x104   : > { %v4364_v57 = vadd.f32 %v2964_v5, %v2963_v38  ;;  %v4366_v14 = vadd.f32 %v3036_v24, %v3035_v29  ;;  %v2966_v27 = vpop.f32.mrb[6].mxu0  ;;  %v3038_v50 = vpop.f32.mrb[6].mxu1 }
 0x105   : > { %v2967_v0 = vpop.f32.mrb[7].mxu0  ;;  %v3039_v15 = vpop.f32.mrb[7].mxu1 }
 0x106   : > { %v4368_v31 = vadd.f32 %v2967_v0, %v2966_v27  ;;  %v4370_v4 = vadd.f32 %v3039_v15, %v3038_v50 }
 0x107   : > { %1998 = vmatmul.mubr.bf16.gmra.mrb[112].mxu1 %v4184_v52  ;;  %3430 = vmatmul.mubr.bf16.vlgmr.msra.gmra.mrb[112].mxu0 %v4073_v37 }
 0x108   : > { %2005 = vmatprep.mubr.bf16.mxu1 %v4171_v30  ;;  %3433 = vmatprep.mubr.bf16.mxu0 %v4095_v1 }
 0x10a   : > { %v2969_v63 = vpop.f32.mrb[8].mxu0  ;;  %v3041_v55 = vpop.f32.mrb[8].mxu1 }
 0x10b   : > { %v2970_v21 = vpop.f32.mrb[9].mxu0  ;;  %v3042_v28 = vpop.f32.mrb[9].mxu1 }
 0x10c   : > { %v4376_v53 = vadd.f32 %v2970_v21, %v2969_v63  ;;  %v4378_v26 = vadd.f32 %v3042_v28, %v3041_v55  ;;  %v2972_v36 = vpop.f32.mrb[10].mxu0  ;;  %v3044_v8 = vpop.f32.mrb[10].mxu1 }
 0x10d   : > { %v2973_v48 = vpop.f32.mrb[11].mxu0  ;;  %v3045_v11 = vpop.f32.mrb[11].mxu1 }
 0x10e   : > { %v4380_v39 = vadd.f32 %v2973_v48, %v2972_v36  ;;  %v4382_v52 = vadd.f32 %v3045_v11, %v3044_v8  ;;  %v447_v8 = vld [vmem:[%s389_s16] sm:$0xf]  ;;  %v448_v48 = vld [vmem:[%s389_s16 + $0x4] sm:$0xf] }
 0x10f   : > { %2006 = vmatmul.mubr.bf16.gmra.mrb[116].mxu1 %v4199_v54  ;;  %3434 = vmatmul.mubr.bf16.gmra.mrb[116].mxu0 %v4162_v59 }
 0x110   : > { %2013 = vmatprep.mubr.bf16.mxu1 %v3703_v22  ;;  %3437 = vmatprep.mubr.bf16.mxu0 %v4188_v18 }
 0x112   : > { %v2975_v37 = vpop.f32.mrb[12].mxu0  ;;  %v3047_v1 = vpop.f32.mrb[12].mxu1 }
 0x113   : > { %v2976_v30 = vpop.f32.mrb[13].mxu0  ;;  %v3048_v3 = vpop.f32.mrb[13].mxu1 }
 0x114   : > { %v4388_v6 = vadd.f32 %v2976_v30, %v2975_v37  ;;  %v4390_v41 = vadd.f32 %v3048_v3, %v3047_v1  ;;  %v2978_v56 = vpop.f32.mrb[14].mxu0  ;;  %v3050_v35 = vpop.f32.mrb[14].mxu1  ;;  %v492_v1 = vmul.bf16 0.0|0.0, %v447_v8  ;;  %v493_v30 = vmul.bf16 0.0|0.0, %v448_v48 }
 0x115   : > { %v2979_v60 = vpop.f32.mrb[15].mxu0  ;;  %v3051_v61 = vpop.f32.mrb[15].mxu1 }
 0x116   : > { %v4392_v16 = vadd.f32 %v2979_v60, %v2978_v56  ;;  %v4394_v54 = vadd.f32 %v3051_v61, %v3050_v35 }
 0x117   : > { %2014 = vmatmul.mubr.bf16.gmra.mrb[120].mxu1 %v3760_v51  ;;  %3438 = vmatmul.mubr.bf16.gmra.mrb[120].mxu0 %v4203_v17 }
 0x118   : > { %2021 = vmatprep.mubr.bf16.mxu1 %v3754_v49  ;;  %3441 = vmatprep.mubr.bf16.mxu0 %v4215_v2 }
 0x11a   : > { %v2981_v22 = vpop.f32.mrb[16].mxu0  ;;  %v3069_v59 = vpop.f32.mrb[16].mxu1 }
 0x11b   : > { %v2982_v18 = vpop.f32.mrb[17].mxu0  ;;  %v3070_v38 = vpop.f32.mrb[17].mxu1 }
 0x11c   : > { %v4400_v29 = vadd.f32 %v2982_v18, %v2981_v22  ;;  %v3071_v5 = vadd.f32 %v3070_v38, %v3069_v59  ;;  %v2984_v24 = vpop.f32.mrb[18].mxu0  ;;  %v3072_v27 = vpop.f32.mrb[18].mxu1  ;;  %v2701_v59 = vcombine.low %v492_v1, %v493_v30 }
 0x11d   : > { %v2985_v50 = vpop.f32.mrb[19].mxu0  ;;  %v3073_v0 = vpop.f32.mrb[19].mxu1 }
 0x11e   : > { %v4403_v51 = vadd.f32 %v3071_v5, %v4352_v62  ;;  %v4405_v17 = vadd.f32 %v2985_v50, %v2984_v24  ;;  %v3074_v49 = vadd.f32 %v3073_v0, %v3072_v27  ;;  %v704_v5 = vshrl.u32 %v2701_v59, 16 }
 0x11f   : > { %2022 = vmatmul.mubr.bf16.gmra.mrb[124].mxu1 %v3802_v10  ;;  %3442 = vmatmul.mubr.bf16.gmra.mrb[124].mxu0 %v4234_v13  ;;  %v707_v24 = vshll.u32 %v2701_v59, 16 }
 0x120   : > { %v4411_v2 = vadd.f32 %v3074_v49, %v4356_v23  ;;  %2029 = vmatprep.mubr.bf16.mxu1 %v3806_v12  ;;  %3445 = vmatprep.mubr.bf16.mxu0 %v4248_v25 }
 0x122   : > { %v2987_v15 = vpop.f32.mrb[20].mxu0  ;;  %v3075_v63 = vpop.f32.mrb[20].mxu1 }
 0x123   : > { %v2988_v62 = vpop.f32.mrb[21].mxu0  ;;  %v3076_v55 = vpop.f32.mrb[21].mxu1 }
 0x124   : > { %v4418_v21 = vadd.f32 %v2988_v62, %v2987_v15  ;;  %v3077_v10 = vadd.f32 %v3076_v55, %v3075_v63  ;;  %v2990_v13 = vpop.f32.mrb[22].mxu0  ;;  %v3078_v28 = vpop.f32.mrb[22].mxu1  ;;  %v706_v62 = vrot.slane %v704_v5, 7 }
 0x125   : > { %v2991_v36 = vpop.f32.mrb[23].mxu0  ;;  %v3079_v23 = vpop.f32.mrb[23].mxu1 }
 0x126   : > { %v4421_v12 = vadd.f32 %v3077_v10, %v4364_v57  ;;  %v4423_v25 = vadd.f32 %v2991_v36, %v2990_v13  ;;  %v3080_v11 = vadd.f32 %v3079_v23, %v3078_v28  ;;  %v709_v28 = vor.u32 %v707_v24, %v706_v62 }
 0x127   : > { %2030 = vmatmul.mubr.bf16.gmra.mrb[128].mxu1 %v3854_v44  ;;  %3446 = vmatmul.mubr.bf16.gmra.mrb[128].mxu0 %v4262_v32 }
 0x128   : > { %v4428_v37 = vadd.f32 %v3080_v11, %v4368_v31  ;;  %2037 = vmatprep.mubr.bf16.mxu1 %v3856_v45  ;;  %3449 = vmatprep.mubr.bf16.mxu0 %v4279_v9 }
 0x12a   : > { %v2993_v3 = vpop.f32.mrb[24].mxu0  ;;  %v3081_v56 = vpop.f32.mrb[24].mxu1 }
 0x12b   : > { %v2994_v57 = vpop.f32.mrb[25].mxu0  ;;  %v3082_v35 = vpop.f32.mrb[25].mxu1 }
 0x12c   : > { %v4432_v60 = vadd.f32 %v2994_v57, %v2993_v3  ;;  %v3083_v61 = vadd.f32 %v3082_v35, %v3081_v56  ;;  %v2996_v22 = vpop.f32.mrb[26].mxu0  ;;  %v3084_v44 = vpop.f32.mrb[26].mxu1 }
 0x12d   : > { %v2997_v32 = vpop.f32.mrb[27].mxu0  ;;  %v3085_v18 = vpop.f32.mrb[27].mxu1 }
 0x12e   : > { %v4435_v31 = vadd.f32 %v3083_v61, %v4376_v53  ;;  %v4437_v45 = vadd.f32 %v2997_v32, %v2996_v22  ;;  %v3086_v9 = vadd.f32 %v3085_v18, %v3084_v44 }
 0x12f   : > { %2038 = vmatmul.mubr.bf16.gmra.mrb[132].mxu1 %v3898_v7  ;;  %3450 = vmatmul.mubr.bf16.gmra.mrb[132].mxu0 %v4291_v46  ;;  %v783_v46 = vrot.slane %v707_v24, 1 }
 0x130   : > { %v4442_v38 = vadd.f32 %v3086_v9, %v4380_v39  ;;  %2045 = vmatprep.mubr.bf16.mxu1 %v4281_v19  ;;  %3453 = vmatprep.mubr.bf16.mxu0 %v4301_v47 }
 0x131   : > { %v784_v36 = vor.u32 %v783_v46, %v704_v5 }
 0x132   : > { %v2999_v27 = vpop.f32.mrb[28].mxu0  ;;  %v3087_v50 = vpop.f32.mrb[28].mxu1 }
 0x133   : > { %v3000_v53 = vpop.f32.mrb[29].mxu0  ;;  %v3088_v0 = vpop.f32.mrb[29].mxu1 }
 0x134   : > { %v4446_v49 = vadd.f32 %v3000_v53, %v2999_v27  ;;  %v3089_v15 = vadd.f32 %v3088_v0, %v3087_v50  ;;  %v3002_v63 = vpop.f32.mrb[30].mxu0  ;;  %v3090_v7 = vpop.f32.mrb[30].mxu1 }
 0x135   : > { %v3003_v55 = vpop.f32.mrb[31].mxu0  ;;  %v3091_v39 = vpop.f32.mrb[31].mxu1 }
 0x136   : > { %v4449_v10 = vadd.f32 %v3089_v15, %v4388_v6  ;;  %v4451_v19 = vadd.f32 %v3003_v55, %v3002_v63  ;;  %v3092_v47 = vadd.f32 %v3091_v39, %v3090_v7 }
 0x137   : > { %2046 = vmatmul.mubr.bf16.gmra.mrb[136].mxu1 %v4305_v33  ;;  %3454 = vmatmul.mubr.bf16.gmra.mrb[136].mxu0 %v4314_v43  ;;  %v748_v33 = vsel %vm3733_vm2, 0, %v709_v28  ;;  %v823_v43 = vsel %vm3925_vm5, %v784_v36, 0 }
 0x138   : > { %v4456_v13 = vadd.f32 %v3092_v47, %v4392_v16  ;;  %2053 = vmatprep.mubr.bf16.mxu1 %v2701_v59  ;;  %3457 = vmatprep.mubr.bf16.mxu0 %v4346_v42 }
 0x13a   : > { %v3005_v23 = vpop.f32.mrb[32].mxu0  ;;  %v3093_v8 = vpop.f32.mrb[32].mxu1 }
 0x13b   : > { %v3006_v48 = vpop.f32.mrb[33].mxu0  ;;  %v3094_v6 = vpop.f32.mrb[33].mxu1 }
 0x13c   : > { %v4459_v11 = vadd.f32 %v3006_v48, %v3005_v23  ;;  %v3095_v1 = vadd.f32 %v3094_v6, %v3093_v8  ;;  %v3008_v30 = vpop.f32.mrb[34].mxu0  ;;  %v3096_v3 = vpop.f32.mrb[34].mxu1 }
 0x13d   : > { %v3009_v16 = vpop.f32.mrb[35].mxu0  ;;  %v3097_v56 = vpop.f32.mrb[35].mxu1 }
 0x13e   : > { %v4466_v42 = vadd.f32 %v3095_v1, %v4400_v29  ;;  %v3010_v57 = vadd.f32 %v3009_v16, %v3008_v30  ;;  %v3098_v35 = vadd.f32 %v3097_v56, %v3096_v3 }
 0x13f   : > { %2054 = vmatmul.mubr.bf16.gmra.mrb[140].mxu1 %v748_v33  ;;  %3458 = vmatmul.mubr.bf16.gmra.mrb[140].mxu0 %v823_v43 }
 0x140   : > { %v4469_v61 = vadd.f32 %v3098_v35, %v4405_v17 }
 0x142   : > { %v3011_v22 = vpop.f32.mrb[36].mxu0  ;;  %v3099_v44 = vpop.f32.mrb[36].mxu1 }
 0x143   : > { %v3012_v59 = vpop.f32.mrb[37].mxu0  ;;  %v3100_v40 = vpop.f32.mrb[37].mxu1 }
 0x144   : > { %v4471_v32 = vadd.f32 %v3012_v59, %v3011_v22  ;;  %v3101_v34 = vadd.f32 %v3100_v40, %v3099_v44  ;;  %v3014_v18 = vpop.f32.mrb[38].mxu0  ;;  %v3102_v9 = vpop.f32.mrb[38].mxu1 }
 0x145   : > { %v3015_v5 = vpop.f32.mrb[39].mxu0  ;;  %v3103_v24 = vpop.f32.mrb[39].mxu1 }
 0x146   : > { %v4474_v29 = vadd.f32 %v3101_v34, %v4418_v21  ;;  %v3016_v27 = vadd.f32 %v3015_v5, %v3014_v18  ;;  %v3104_v50 = vadd.f32 %v3103_v24, %v3102_v9 }
 0x148   : > { %v4477_v53 = vadd.f32 %v3104_v50, %v4423_v25 }
 0x14a   : > { %v3017_v17 = vpop.f32.mrb[40].mxu0  ;;  %v3105_v0 = vpop.f32.mrb[40].mxu1 }
 0x14b   : > { %v3018_v15 = vpop.f32.mrb[41].mxu0  ;;  %v3106_v63 = vpop.f32.mrb[41].mxu1 }
 0x14c   : > { %v4479_v7 = vadd.f32 %v3018_v15, %v3017_v17  ;;  %v3107_v62 = vadd.f32 %v3106_v63, %v3105_v0  ;;  %v3020_v46 = vpop.f32.mrb[42].mxu0  ;;  %v3108_v55 = vpop.f32.mrb[42].mxu1 }
 0x14d   : > { %v3021_v39 = vpop.f32.mrb[43].mxu0  ;;  %v3109_v47 = vpop.f32.mrb[43].mxu1 }
 0x14e   : > { %v4482_v28 = vadd.f32 %v3107_v62, %v4432_v60  ;;  %v4484_v21 = vadd.f32 %v3021_v39, %v3020_v46  ;;  %v3110_v36 = vadd.f32 %v3109_v47, %v3108_v55 }
 0x150   : > { %v4487_v25 = vadd.f32 %v3110_v36, %v4437_v45 }
 0x152   : > { %v3023_v23 = vpop.f32.mrb[44].mxu0  ;;  %v3111_v8 = vpop.f32.mrb[44].mxu1 }
 0x153   : > { %v3024_v48 = vpop.f32.mrb[45].mxu0  ;;  %v3112_v6 = vpop.f32.mrb[45].mxu1 }
 0x154   : > { %v4489_v1 = vadd.f32 %v3024_v48, %v3023_v23  ;;  %v3113_v30 = vadd.f32 %v3112_v6, %v3111_v8  ;;  %v3026_v3 = vpop.f32.mrb[46].mxu0  ;;  %v3114_v33 = vpop.f32.mrb[46].mxu1 }
 0x155   : > { %v3027_v43 = vpop.f32.mrb[47].mxu0  ;;  %v3115_v16 = vpop.f32.mrb[47].mxu1 }
 0x156   : > { %v4492_v60 = vadd.f32 %v3113_v30, %v4446_v49  ;;  %v4494_v56 = vadd.f32 %v3027_v43, %v3026_v3  ;;  %v3116_v35 = vadd.f32 %v3115_v16, %v3114_v33 }
 0x158   : > { %v4497_v45 = vadd.f32 %v3116_v35, %v4451_v19 }
 0x15a   : > { %v3117_v22 = vpop.f32.mrb[48].mxu1  ;;  %v3181_v44 = vpop.f32.mrb[48].mxu0 }
 0x15b   : > { %v3118_v59 = vpop.f32.mrb[49].mxu1  ;;  %v3182_v40 = vpop.f32.mrb[49].mxu0 }
 0x15c   : > { %v3119_v34 = vadd.f32 %v3118_v59, %v3117_v22  ;;  %v3183_v18 = vadd.f32 %v3182_v40, %v3181_v44  ;;  %v3120_v9 = vpop.f32.mrb[50].mxu1  ;;  %v3184_v5 = vpop.f32.mrb[50].mxu0 }
 0x15d   : > { %v3121_v24 = vpop.f32.mrb[51].mxu1  ;;  %v3185_v50 = vpop.f32.mrb[51].mxu0 }
 0x15e   : > { %v4500_v17 = vadd.f32 %v3119_v34, %v4459_v11  ;;  %v4503_v49 = vadd.f32 %v3183_v18, %v4403_v51  ;;  %v3122_v0 = vadd.f32 %v3121_v24, %v3120_v9  ;;  %v3186_v15 = vadd.f32 %v3185_v50, %v3184_v5 }
 0x160   : > { %v4505_v19 = vadd.f32 %v3122_v0, %v3010_v57  ;;  %v4508_v63 = vadd.f32 %v3186_v15, %v4411_v2 }
 0x162   : > { %v3123_v62 = vpop.f32.mrb[52].mxu1  ;;  %v3187_v46 = vpop.f32.mrb[52].mxu0 }
 0x163   : > { %v3124_v55 = vpop.f32.mrb[53].mxu1  ;;  %v3188_v39 = vpop.f32.mrb[53].mxu0 }
 0x164   : > { %v3125_v47 = vadd.f32 %v3124_v55, %v3123_v62  ;;  %v3189_v36 = vadd.f32 %v3188_v39, %v3187_v46  ;;  %v3126_v23 = vpop.f32.mrb[54].mxu1  ;;  %v3190_v8 = vpop.f32.mrb[54].mxu0 }
 0x165   : > { %v3127_v11 = vpop.f32.mrb[55].mxu1  ;;  %v3191_v48 = vpop.f32.mrb[55].mxu0 }
 0x166   : > { %v4511_v51 = vadd.f32 %v3125_v47, %v4471_v32  ;;  %v4514_v6 = vadd.f32 %v3189_v36, %v4421_v12  ;;  %v3128_v57 = vadd.f32 %v3127_v11, %v3126_v23  ;;  %v3192_v30 = vadd.f32 %v3191_v48, %v3190_v8 }
 0x168   : > { %v4516_v2 = vadd.f32 %v3128_v57, %v3016_v27  ;;  %v4519_v3 = vadd.f32 %v3192_v30, %v4428_v37 }
 0x16a   : > { %v3129_v33 = vpop.f32.mrb[56].mxu1  ;;  %v3193_v43 = vpop.f32.mrb[56].mxu0 }
 0x16b   : > { %v3130_v16 = vpop.f32.mrb[57].mxu1  ;;  %v3194_v35 = vpop.f32.mrb[57].mxu0 }
 0x16c   : > { %v3131_v22 = vadd.f32 %v3130_v16, %v3129_v33  ;;  %v3195_v44 = vadd.f32 %v3194_v35, %v3193_v43  ;;  %v3132_v59 = vpop.f32.mrb[58].mxu1  ;;  %v3196_v40 = vpop.f32.mrb[58].mxu0 }
 0x16d   : > { %v3133_v32 = vpop.f32.mrb[59].mxu1  ;;  %v3197_v34 = vpop.f32.mrb[59].mxu0 }
 0x16e   : > { %v4522_v12 = vadd.f32 %v3131_v22, %v4479_v7  ;;  %v4525_v18 = vadd.f32 %v3195_v44, %v4435_v31  ;;  %v3134_v27 = vadd.f32 %v3133_v32, %v3132_v59  ;;  %v3198_v9 = vadd.f32 %v3197_v34, %v3196_v40 }
 0x170   : > { %v4528_v37 = vadd.f32 %v3134_v27, %v4484_v21  ;;  %v4531_v5 = vadd.f32 %v3198_v9, %v4442_v38 }
 0x172   : > { %v3135_v24 = vpop.f32.mrb[60].mxu1  ;;  %v3199_v50 = vpop.f32.mrb[60].mxu0 }
 0x173   : > { %v3136_v0 = vpop.f32.mrb[61].mxu1  ;;  %v3200_v15 = vpop.f32.mrb[61].mxu0 }
 0x174   : > { %v3137_v62 = vadd.f32 %v3136_v0, %v3135_v24  ;;  %v3201_v46 = vadd.f32 %v3200_v15, %v3199_v50  ;;  %v3138_v55 = vpop.f32.mrb[62].mxu1  ;;  %v3202_v7 = vpop.f32.mrb[62].mxu0 }
 0x175   : > { %v3139_v39 = vpop.f32.mrb[63].mxu1  ;;  %v3203_v47 = vpop.f32.mrb[63].mxu0 }
 0x176   : > { %v4534_v31 = vadd.f32 %v3137_v62, %v4489_v1  ;;  %v4537_v36 = vadd.f32 %v3201_v46, %v4449_v10  ;;  %v3140_v21 = vadd.f32 %v3139_v39, %v3138_v55  ;;  %v3204_v23 = vadd.f32 %v3203_v47, %v3202_v7 }
 0x178   : > { %v4540_v38 = vadd.f32 %v3140_v21, %v4494_v56  ;;  %v4543_v8 = vadd.f32 %v3204_v23, %v4456_v13 }
 0x17a   : > { %v3141_v11 = vpop.f32.mrb[64].mxu1  ;;  %v3205_v48 = vpop.f32.mrb[64].mxu0 }
 0x17b   : > { %v3142_v57 = vpop.f32.mrb[65].mxu1  ;;  %v3206_v30 = vpop.f32.mrb[65].mxu0 }
 0x17c   : > { %v3143_v33 = vadd.f32 %v3142_v57, %v3141_v11  ;;  %v3207_v43 = vadd.f32 %v3206_v30, %v3205_v48  ;;  %v3144_v16 = vpop.f32.mrb[66].mxu1  ;;  %v3208_v1 = vpop.f32.mrb[66].mxu0 }
 0x17d   : > { %v3145_v35 = vpop.f32.mrb[67].mxu1  ;;  %v3209_v22 = vpop.f32.mrb[67].mxu0 }
 0x17e   : > { %v4546_v10 = vadd.f32 %v3143_v33, %v4354_v20  ;;  %v4549_v44 = vadd.f32 %v3207_v43, %v4466_v42  ;;  %v3146_v56 = vadd.f32 %v3145_v35, %v3144_v16  ;;  %v3210_v59 = vadd.f32 %v3209_v22, %v3208_v1 }
 0x180   : > { %v4552_v13 = vadd.f32 %v3146_v56, %v4358_v58  ;;  %v4555_v40 = vadd.f32 %v3210_v59, %v4469_v61 }
 0x182   : > { %v3147_v32 = vpop.f32.mrb[68].mxu1  ;;  %v3211_v34 = vpop.f32.mrb[68].mxu0 }
 0x183   : > { %v3148_v27 = vpop.f32.mrb[69].mxu1  ;;  %v3212_v9 = vpop.f32.mrb[69].mxu0 }
 0x184   : > { %v3149_v24 = vadd.f32 %v3148_v27, %v3147_v32  ;;  %v3213_v50 = vadd.f32 %v3212_v9, %v3211_v34  ;;  %v3150_v0 = vpop.f32.mrb[70].mxu1  ;;  %v3214_v20 = vpop.f32.mrb[70].mxu0 }
 0x185   : > { %v3151_v15 = vpop.f32.mrb[71].mxu1  ;;  %v3215_v62 = vpop.f32.mrb[71].mxu0 }
 0x186   : > { %v4558_v42 = vadd.f32 %v3149_v24, %v4366_v14  ;;  %v4561_v46 = vadd.f32 %v3213_v50, %v4474_v29  ;;  %v3152_v58 = vadd.f32 %v3151_v15, %v3150_v0  ;;  %v3216_v55 = vadd.f32 %v3215_v62, %v3214_v20 }
 0x188   : > { %v4564_v61 = vadd.f32 %v3152_v58, %v4370_v4  ;;  %v4567_v7 = vadd.f32 %v3216_v55, %v4477_v53 }
 0x18a   : > { %v3153_v39 = vpop.f32.mrb[72].mxu1  ;;  %v3217_v47 = vpop.f32.mrb[72].mxu0 }
 0x18b   : > { %v3154_v21 = vpop.f32.mrb[73].mxu1  ;;  %v3218_v23 = vpop.f32.mrb[73].mxu0 }
 0x18c   : > { %v3155_v11 = vadd.f32 %v3154_v21, %v3153_v39  ;;  %v3219_v48 = vadd.f32 %v3218_v23, %v3217_v47  ;;  %v3156_v57 = vpop.f32.mrb[74].mxu1  ;;  %v3220_v14 = vpop.f32.mrb[74].mxu0 }
 0x18d   : > { %v3157_v30 = vpop.f32.mrb[75].mxu1  ;;  %v3221_v33 = vpop.f32.mrb[75].mxu0 }
 0x18e   : > { %v4570_v29 = vadd.f32 %v3155_v11, %v4378_v26  ;;  %v4573_v43 = vadd.f32 %v3219_v48, %v4482_v28  ;;  %v3158_v4 = vadd.f32 %v3157_v30, %v3156_v57  ;;  %v3222_v16 = vadd.f32 %v3221_v33, %v3220_v14 }
 0x190   : > { %v4576_v53 = vadd.f32 %v3158_v4, %v4382_v52  ;;  %v4579_v1 = vadd.f32 %v3222_v16, %v4487_v25 }
 0x192   : > { %v3159_v35 = vpop.f32.mrb[76].mxu1  ;;  %v3223_v22 = vpop.f32.mrb[76].mxu0 }
 0x193   : > { %v3160_v56 = vpop.f32.mrb[77].mxu1  ;;  %v3224_v59 = vpop.f32.mrb[77].mxu0 }
 0x194   : > { %v3161_v32 = vadd.f32 %v3160_v56, %v3159_v35  ;;  %v3225_v34 = vadd.f32 %v3224_v59, %v3223_v22  ;;  %v3162_v27 = vpop.f32.mrb[78].mxu1  ;;  %v3226_v26 = vpop.f32.mrb[78].mxu0 }
 0x195   : > { %v3163_v9 = vpop.f32.mrb[79].mxu1  ;;  %v3227_v24 = vpop.f32.mrb[79].mxu0 }
 0x196   : > { %v4582_v28 = vadd.f32 %v3161_v32, %v4390_v41  ;;  %v4585_v50 = vadd.f32 %v3225_v34, %v4492_v60  ;;  %v3164_v52 = vadd.f32 %v3163_v9, %v3162_v27  ;;  %v3228_v0 = vadd.f32 %v3227_v24, %v3226_v26 }
 0x198   : > { %v4588_v25 = vadd.f32 %v3164_v52, %v4394_v54  ;;  %v4591_v20 = vadd.f32 %v3228_v0, %v4497_v45 }
 0x19a   : > { %v3229_v15 = vpop.f32.mrb[80].mxu0  ;;  %v3293_v62 = vpop.f32.mrb[80].mxu1 }
 0x19b   : > { %v3230_v58 = vpop.f32.mrb[81].mxu0  ;;  %v3294_v55 = vpop.f32.mrb[81].mxu1 }
 0x19c   : > { %v3231_v39 = vadd.f32 %v3230_v58, %v3229_v15  ;;  %v3295_v47 = vadd.f32 %v3294_v55, %v3293_v62  ;;  %v3232_v21 = vpop.f32.mrb[82].mxu0  ;;  %v3296_v41 = vpop.f32.mrb[82].mxu1 }
 0x19d   : > { %v3233_v23 = vpop.f32.mrb[83].mxu0  ;;  %v3297_v11 = vpop.f32.mrb[83].mxu1 }
 0x19e   : > { %v4594_v60 = vadd.f32 %v3231_v39, %v4500_v17  ;;  %v3234_v48 = vadd.f32 %v3233_v23, %v3232_v21  ;;  %v3298_v57 = vadd.f32 %v3297_v11, %v3296_v41  ;;  %v4597_v54 = vadd.f32 %v3295_v47, %v4503_v49 }
 0x1a0   : > { %v4600_v45 = vadd.f32 %v3234_v48, %v4505_v19  ;;  %v4603_v14 = vadd.f32 %v3298_v57, %v4508_v63 }
 0x1a2   : > { %v3235_v30 = vpop.f32.mrb[84].mxu0  ;;  %v3299_v33 = vpop.f32.mrb[84].mxu1 }
 0x1a3   : > { %v3236_v4 = vpop.f32.mrb[85].mxu0  ;;  %v3300_v16 = vpop.f32.mrb[85].mxu1 }
 0x1a4   : > { %v3237_v35 = vadd.f32 %v3236_v4, %v3235_v30  ;;  %v3301_v22 = vadd.f32 %v3300_v16, %v3299_v33  ;;  %v3238_v56 = vpop.f32.mrb[86].mxu0  ;;  %v3302_v17 = vpop.f32.mrb[86].mxu1 }
 0x1a5   : > { %v3239_v59 = vpop.f32.mrb[87].mxu0  ;;  %v3303_v32 = vpop.f32.mrb[87].mxu1 }
 0x1a6   : > { %v4606_v34 = vadd.f32 %v3237_v35, %v4511_v51  ;;  %v3240_v49 = vadd.f32 %v3239_v59, %v3238_v56  ;;  %v3304_v27 = vadd.f32 %v3303_v32, %v3302_v17  ;;  %v4609_v19 = vadd.f32 %v3301_v22, %v4514_v6 }
 0x1a8   : > { %v4612_v63 = vadd.f32 %v3240_v49, %v4516_v2  ;;  %v4615_v26 = vadd.f32 %v3304_v27, %v4519_v3 }
 0x1aa   : > { %v3241_v9 = vpop.f32.mrb[88].mxu0  ;;  %v3305_v24 = vpop.f32.mrb[88].mxu1 }
 0x1ab   : > { %v3242_v52 = vpop.f32.mrb[89].mxu0  ;;  %v3306_v0 = vpop.f32.mrb[89].mxu1 }
 0x1ac   : > { %v3243_v15 = vadd.f32 %v3242_v52, %v3241_v9  ;;  %v3307_v62 = vadd.f32 %v3306_v0, %v3305_v24  ;;  %v3244_v58 = vpop.f32.mrb[90].mxu0  ;;  %v3308_v51 = vpop.f32.mrb[90].mxu1 }
 0x1ad   : > { %v3245_v55 = vpop.f32.mrb[91].mxu0  ;;  %v3309_v39 = vpop.f32.mrb[91].mxu1 }
 0x1ae   : > { %v4618_v47 = vadd.f32 %v3243_v15, %v4522_v12  ;;  %v3246_v6 = vadd.f32 %v3245_v55, %v3244_v58  ;;  %v3310_v21 = vadd.f32 %v3309_v39, %v3308_v51  ;;  %v4621_v2 = vadd.f32 %v3307_v62, %v4525_v18 }
 0x1b0   : > { %v4624_v3 = vadd.f32 %v3246_v6, %v4528_v37  ;;  %v4627_v41 = vadd.f32 %v3310_v21, %v4531_v5 }
 0x1b2   : > { %v3247_v23 = vpop.f32.mrb[92].mxu0  ;;  %v3311_v11 = vpop.f32.mrb[92].mxu1 }
 0x1b3   : > { %v3248_v48 = vpop.f32.mrb[93].mxu0  ;;  %v3312_v57 = vpop.f32.mrb[93].mxu1 }
 0x1b4   : > { %v3249_v30 = vadd.f32 %v3248_v48, %v3247_v23  ;;  %v3313_v33 = vadd.f32 %v3312_v57, %v3311_v11  ;;  %v3250_v4 = vpop.f32.mrb[94].mxu0  ;;  %v3314_v12 = vpop.f32.mrb[94].mxu1 }
 0x1b5   : > { %v3251_v16 = vpop.f32.mrb[95].mxu0  ;;  %v3315_v35 = vpop.f32.mrb[95].mxu1 }
 0x1b6   : > { %v4630_v22 = vadd.f32 %v3249_v30, %v4534_v31  ;;  %v3252_v18 = vadd.f32 %v3251_v16, %v3250_v4  ;;  %v3316_v56 = vadd.f32 %v3315_v35, %v3314_v12  ;;  %v4633_v37 = vadd.f32 %v3313_v33, %v4537_v36 }
 0x1b8   : > { %v4636_v5 = vadd.f32 %v3252_v18, %v4540_v38  ;;  %v4639_v17 = vadd.f32 %v3316_v56, %v4543_v8 }
 0x1ba   : > { %v3253_v59 = vpop.f32.mrb[96].mxu0  ;;  %v3317_v32 = vpop.f32.mrb[96].mxu1 }
 0x1bb   : > { %v3254_v49 = vpop.f32.mrb[97].mxu0  ;;  %v3318_v27 = vpop.f32.mrb[97].mxu1 }
 0x1bc   : > { %v3255_v9 = vadd.f32 %v3254_v49, %v3253_v59  ;;  %v3319_v24 = vadd.f32 %v3318_v27, %v3317_v32  ;;  %v3256_v52 = vpop.f32.mrb[98].mxu0  ;;  %v3320_v31 = vpop.f32.mrb[98].mxu1 }
 0x1bd   : > { %v3257_v0 = vpop.f32.mrb[99].mxu0  ;;  %v3321_v15 = vpop.f32.mrb[99].mxu1 }
 0x1be   : > { %v4642_v62 = vadd.f32 %v3255_v9, %v4546_v10  ;;  %v3258_v36 = vadd.f32 %v3257_v0, %v3256_v52  ;;  %v3322_v58 = vadd.f32 %v3321_v15, %v3320_v31  ;;  %v4645_v38 = vadd.f32 %v3319_v24, %v4549_v44 }
 0x1c0   : > { %v4648_v8 = vadd.f32 %v3258_v36, %v4552_v13  ;;  %v4651_v51 = vadd.f32 %v3322_v58, %v4555_v40 }
 0x1c2   : > { %v3259_v55 = vpop.f32.mrb[100].mxu0  ;;  %v3323_v39 = vpop.f32.mrb[100].mxu1 }
 0x1c3   : > { %v3260_v6 = vpop.f32.mrb[101].mxu0  ;;  %v3324_v21 = vpop.f32.mrb[101].mxu1 }
 0x1c4   : > { %v3261_v23 = vadd.f32 %v3260_v6, %v3259_v55  ;;  %v3325_v11 = vadd.f32 %v3324_v21, %v3323_v39  ;;  %v3262_v48 = vpop.f32.mrb[102].mxu0  ;;  %v3326_v10 = vpop.f32.mrb[102].mxu1 }
 0x1c5   : > { %v3263_v57 = vpop.f32.mrb[103].mxu0  ;;  %v3327_v30 = vpop.f32.mrb[103].mxu1 }
 0x1c6   : > { %v4654_v33 = vadd.f32 %v3261_v23, %v4558_v42  ;;  %v3264_v44 = vadd.f32 %v3263_v57, %v3262_v48  ;;  %v3328_v4 = vadd.f32 %v3327_v30, %v3326_v10  ;;  %v4657_v13 = vadd.f32 %v3325_v11, %v4561_v46 }
 0x1c8   : > { %v4660_v40 = vadd.f32 %v3264_v44, %v4564_v61  ;;  %v4663_v12 = vadd.f32 %v3328_v4, %v4567_v7 }
 0x1ca   : > { %v3265_v16 = vpop.f32.mrb[104].mxu0  ;;  %v3329_v35 = vpop.f32.mrb[104].mxu1 }
 0x1cb   : > { %v3266_v18 = vpop.f32.mrb[105].mxu0  ;;  %v3330_v56 = vpop.f32.mrb[105].mxu1 }
 0x1cc   : > { %v3267_v59 = vadd.f32 %v3266_v18, %v3265_v16  ;;  %v3331_v32 = vadd.f32 %v3330_v56, %v3329_v35  ;;  %v3268_v49 = vpop.f32.mrb[106].mxu0  ;;  %v3332_v42 = vpop.f32.mrb[106].mxu1 }
 0x1cd   : > { %v3269_v27 = vpop.f32.mrb[107].mxu0  ;;  %v3333_v9 = vpop.f32.mrb[107].mxu1 }
 0x1ce   : > { %v4666_v24 = vadd.f32 %v3267_v59, %v4570_v29  ;;  %v3270_v46 = vadd.f32 %v3269_v27, %v3268_v49  ;;  %v3334_v52 = vadd.f32 %v3333_v9, %v3332_v42  ;;  %v4669_v61 = vadd.f32 %v3331_v32, %v4573_v43 }
 0x1d0   : > { %v4672_v7 = vadd.f32 %v3270_v46, %v4576_v53  ;;  %v4675_v31 = vadd.f32 %v3334_v52, %v4579_v1 }
 0x1d2   : > { %v3271_v0 = vpop.f32.mrb[108].mxu0  ;;  %v3335_v15 = vpop.f32.mrb[108].mxu1 }
 0x1d3   : > { %v3272_v36 = vpop.f32.mrb[109].mxu0  ;;  %v3336_v58 = vpop.f32.mrb[109].mxu1 }
 0x1d4   : > { %v3273_v55 = vadd.f32 %v3272_v36, %v3271_v0  ;;  %v3337_v39 = vadd.f32 %v3336_v58, %v3335_v15  ;;  %v3274_v6 = vpop.f32.mrb[110].mxu0  ;;  %v3338_v29 = vpop.f32.mrb[110].mxu1 }
 0x1d5   : > { %v3275_v21 = vpop.f32.mrb[111].mxu0  ;;  %v3339_v23 = vpop.f32.mrb[111].mxu1 }
 0x1d6   : > { %v4678_v11 = vadd.f32 %v3273_v55, %v4582_v28  ;;  %v3276_v43 = vadd.f32 %v3275_v21, %v3274_v6  ;;  %v3340_v48 = vadd.f32 %v3339_v23, %v3338_v29  ;;  %v4681_v53 = vadd.f32 %v3337_v39, %v4585_v50 }
 0x1d8   : > { %v4684_v1 = vadd.f32 %v3276_v43, %v4588_v25  ;;  %v4687_v10 = vadd.f32 %v3340_v48, %v4591_v20 }
 0x1da   : > { %v3341_v57 = vpop.f32.mrb[112].mxu1  ;;  %v3431_v30 = vpop.f32.mrb[112].mxu0 }
 0x1db   : > { %v2105_v44 = vadd.f32 %v3431_v30, %v4609_v19  ;;  %v3342_v4 = vpop.f32.mrb[113].mxu1  ;;  %v2096_v16 = vpop.f32.mrb[113].mxu0 }
 0x1dc   : > { %v3343_v28 = vadd.f32 %v3342_v4, %v3341_v57  ;;  %v2097_v35 = vadd.f32 %v2096_v16, %v4597_v54  ;;  %v3344_v18 = vpop.f32.mrb[114].mxu1  ;;  %v3432_v56 = vpop.f32.mrb[114].mxu0 }
 0x1dd   : > { %v2108_v50 = vadd.f32 %v3432_v56, %v4615_v26  ;;  %v3345_v59 = vpop.f32.mrb[115].mxu1  ;;  %v2099_v32 = vpop.f32.mrb[115].mxu0  ;;  %v2423_v46 = vmul.f32 %v2105_v44, %v2105_v44 }
 0x1de   : > { %v3346_v25 = vadd.f32 %v3345_v59, %v3344_v18  ;;  %v2100_v20 = vadd.f32 %v2099_v32, %v4603_v14  ;;  %v4700_v19 = vadd.f32 %v3343_v28, %v4594_v60  ;;  %v2421_v54 = vmul.f32 %v2097_v35, %v2097_v35 }
 0x1df   : > { %v2853_v49 = vpack.c.bf16 %v2108_v50, %v2105_v44  ;;  %v2424_v58 = vmul.f32 %v2108_v50, %v2108_v50 }
 0x1e0   : > { %v2848_v42 = vpack.c.bf16 %v2100_v20, %v2097_v35  ;;  %v2383_v27 = vadd.f32 %v2100_v20, %v2097_v35  ;;  %v2422_v26 = vmul.f32 %v2100_v20, %v2100_v20  ;;  %v4703_v9 = vadd.f32 %v3346_v25, %v4600_v45 }
 0x1e1   : > { %2926 = vst [vmem:[%s4696_s24 + $0x8] sm:$0xff] %v2853_v49  }
 0x1e2   : > { %2849 = vst [vmem:[%s4696_s24] sm:$0xff] %v2848_v42   ;;  %v2384_v52 = vadd.f32 %v2383_v27, %v2105_v44  ;;  %v2453_v0 = vadd.f32 %v2422_v26, %v2421_v54  ;;  %v3347_v15 = vpop.f32.mrb[116].mxu1  ;;  %v3435_v36 = vpop.f32.mrb[116].mxu0 }
 0x1e3   : > { %v2121_v14 = vadd.f32 %v3435_v36, %v4633_v37  ;;  %v3348_v60 = vpop.f32.mrb[117].mxu1  ;;  %v2112_v55 = vpop.f32.mrb[117].mxu0 }
 0x1e4   : > { %v2454_v39 = vadd.f32 %v2453_v0, %v2423_v46  ;;  %v3349_v6 = vadd.f32 %v3348_v60, %v3347_v15  ;;  %v2113_v29 = vadd.f32 %v2112_v55, %v4621_v2  ;;  %v2385_v21 = vadd.f32 %v2384_v52, %v2108_v50  ;;  %v3350_v45 = vpop.f32.mrb[118].mxu1  ;;  %v3436_v23 = vpop.f32.mrb[118].mxu0 }
 0x1e5   : > { %v2124_v43 = vadd.f32 %v3436_v23, %v4639_v17  ;;  %v3351_v48 = vpop.f32.mrb[119].mxu1  ;;  %v2115_v57 = vpop.f32.mrb[119].mxu0  ;;  %v2427_v25 = vmul.f32 %v2121_v14, %v2121_v14 }
 0x1e6   : > { %v2386_v30 = vadd.f32 %v2385_v21, %v2113_v29  ;;  %v2425_v44 = vmul.f32 %v2113_v29, %v2113_v29  ;;  %v2455_v4 = vadd.f32 %v2454_v39, %v2424_v58  ;;  %v3352_v16 = vadd.f32 %v3351_v48, %v3350_v45 }
 0x1e7   : > { %v2863_v37 = vpack.c.bf16 %v2124_v43, %v2121_v14  ;;  %v2116_v28 = vadd.f32 %v2115_v57, %v4627_v41  ;;  %v4712_v35 = vadd.f32 %v3349_v6, %v4606_v34  ;;  %v2428_v46 = vmul.f32 %v2124_v43, %v2124_v43 }
 0x1e8   : > { %v2456_v2 = vadd.f32 %v2455_v4, %v2425_v44  ;;  %v4715_v18 = vadd.f32 %v3352_v16, %v4612_v63 }
 0x1e9   : > { %2928 = vst [vmem:[%s4696_s24 + $0x18] sm:$0xff] %v2863_v37   ;;  %v2858_v56 = vpack.c.bf16 %v2116_v28, %v2113_v29  ;;  %v2387_v17 = vadd.f32 %v2386_v30, %v2116_v28  ;;  %v2426_v50 = vmul.f32 %v2116_v28, %v2116_v28 }
 0x1ea   : > { %v3353_v59 = vpop.f32.mrb[120].mxu1  ;;  %v3439_v32 = vpop.f32.mrb[120].mxu0 }
 0x1eb   : > { %2927 = vst [vmem:[%s4696_s24 + $0x10] sm:$0xff] %v2858_v56   ;;  %v2388_v20 = vadd.f32 %v2387_v17, %v2121_v14  ;;  %v2457_v54 = vadd.f32 %v2456_v2, %v2426_v50  ;;  %v2137_v49 = vadd.f32 %v3439_v32, %v4657_v13  ;;  %v3354_v41 = vpop.f32.mrb[121].mxu1  ;;  %v2128_v42 = vpop.f32.mrb[121].mxu0 }
 0x1ec   : > { %v3355_v34 = vadd.f32 %v3354_v41, %v3353_v59  ;;  %v2129_v27 = vadd.f32 %v2128_v42, %v4645_v38  ;;  %v3356_v26 = vpop.f32.mrb[122].mxu1  ;;  %v3440_v63 = vpop.f32.mrb[122].mxu0 }
 0x1ed   : > { %v2458_v52 = vadd.f32 %v2457_v54, %v2427_v25  ;;  %v2389_v0 = vadd.f32 %v2388_v20, %v2124_v43  ;;  %v2140_v15 = vadd.f32 %v3440_v63, %v4663_v12  ;;  %v3357_v36 = vpop.f32.mrb[123].mxu1  ;;  %v2131_v58 = vpop.f32.mrb[123].mxu0  ;;  %v2431_v57 = vmul.f32 %v2137_v49, %v2137_v49 }
 0x1ee   : > { %v2429_v14 = vmul.f32 %v2129_v27, %v2129_v27  ;;  %v3358_v60 = vadd.f32 %v3357_v36, %v3356_v26  ;;  %v2132_v13 = vadd.f32 %v2131_v58, %v4651_v51  ;;  %v4724_v55 = vadd.f32 %v3355_v34, %v4618_v47 }
 0x1ef   : > { %v2390_v39 = vadd.f32 %v2389_v0, %v2129_v27  ;;  %v2459_v38 = vadd.f32 %v2458_v52, %v2428_v46  ;;  %v2873_v6 = vpack.c.bf16 %v2140_v15, %v2137_v49 }
 0x1f0   : > { %v2868_v29 = vpack.c.bf16 %v2132_v13, %v2129_v27  ;;  %v2430_v21 = vmul.f32 %v2132_v13, %v2132_v13  ;;  %v4727_v45 = vadd.f32 %v3358_v60, %v4624_v3  ;;  %v2432_v3 = vmul.f32 %v2140_v15, %v2140_v15 }
 0x1f1   : > { %v2460_v23 = vadd.f32 %v2459_v38, %v2429_v14  ;;  %2930 = vst [vmem:[%s4696_s24 + $0x28] sm:$0xff] %v2873_v6   ;;  %v2391_v12 = vadd.f32 %v2390_v39, %v2132_v13 }
 0x1f2   : > { %2929 = vst [vmem:[%s4696_s24 + $0x20] sm:$0xff] %v2868_v29   ;;  %v3359_v43 = vpop.f32.mrb[124].mxu1  ;;  %v3443_v48 = vpop.f32.mrb[124].mxu0 }
 0x1f3   : > { %v2392_v30 = vadd.f32 %v2391_v12, %v2137_v49  ;;  %v2461_v51 = vadd.f32 %v2460_v23, %v2430_v21  ;;  %v2153_v47 = vadd.f32 %v3443_v48, %v4681_v53  ;;  %v3360_v44 = vpop.f32.mrb[125].mxu1  ;;  %v2144_v4 = vpop.f32.mrb[125].mxu0 }
 0x1f4   : > { %v3361_v16 = vadd.f32 %v3360_v44, %v3359_v43  ;;  %v2145_v37 = vadd.f32 %v2144_v4, %v4669_v61  ;;  %v3362_v28 = vpop.f32.mrb[126].mxu1  ;;  %v3444_v2 = vpop.f32.mrb[126].mxu0 }
 0x1f5   : > { %v2462_v56 = vadd.f32 %v2461_v51, %v2431_v57  ;;  %v2393_v17 = vadd.f32 %v2392_v30, %v2140_v15  ;;  %v2156_v50 = vadd.f32 %v3444_v2, %v4687_v10  ;;  %v3363_v59 = vpop.f32.mrb[127].mxu1  ;;  %v2147_v32 = vpop.f32.mrb[127].mxu0  ;;  %v2435_v52 = vmul.f32 %v2153_v47, %v2153_v47 }
 0x1f6   : > { %v2433_v25 = vmul.f32 %v2145_v37, %v2145_v37  ;;  %v3364_v20 = vadd.f32 %v3363_v59, %v3362_v28  ;;  %v2148_v53 = vadd.f32 %v2147_v32, %v4675_v31  ;;  %v2024_v54 = vadd.f32 %v3361_v16, %v4630_v22 }
 0x1f7   : > { %v2394_v49 = vadd.f32 %v2393_v17, %v2145_v37  ;;  %v2463_v41 = vadd.f32 %v2462_v56, %v2432_v3  ;;  %v2883_v61 = vpack.c.bf16 %v2156_v50, %v2153_v47  ;;  %v2436_v39 = vmul.f32 %v2156_v50, %v2156_v50 }
 0x1f8   : > { %v2878_v42 = vpack.c.bf16 %v2148_v53, %v2145_v37  ;;  %v2434_v34 = vmul.f32 %v2148_v53, %v2148_v53  ;;  %v2027_v27 = vadd.f32 %v3364_v20, %v4636_v5 }
 0x1f9   : > { %v2464_v26 = vadd.f32 %v2463_v41, %v2433_v25  ;;  %2932 = vst [vmem:[%s4696_s24 + $0x38] sm:$0xff] %v2883_v61   ;;  %v2395_v63 = vadd.f32 %v2394_v49, %v2148_v53 }
 0x1fa   : > { %2931 = vst [vmem:[%s4696_s24 + $0x30] sm:$0xff] %v2878_v42   ;;  %v3365_v10 = vpop.f32.mrb[128].mxu1  ;;  %v3447_v46 = vpop.f32.mrb[128].mxu0 }
 0x1fb   : > { %v2396_v0 = vadd.f32 %v2395_v63, %v2153_v47  ;;  %v2465_v15 = vadd.f32 %v2464_v26, %v2434_v34  ;;  %v2169_v31 = vadd.f32 %v3447_v46, %v4712_v35  ;;  %v3366_v36 = vpop.f32.mrb[129].mxu1  ;;  %v2160_v22 = vpop.f32.mrb[129].mxu0 }
 0x1fc   : > { %v3367_v58 = vadd.f32 %v3366_v36, %v3365_v10  ;;  %v2161_v14 = vadd.f32 %v2160_v22, %v4700_v19  ;;  %v3368_v60 = vpop.f32.mrb[130].mxu1  ;;  %v3448_v13 = vpop.f32.mrb[130].mxu0 }
 0x1fd   : > { %v2466_v5 = vadd.f32 %v2465_v15, %v2435_v52  ;;  %v2397_v38 = vadd.f32 %v2396_v0, %v2156_v50  ;;  %v2172_v6 = vadd.f32 %v3448_v13, %v4715_v18  ;;  %v3369_v29 = vpop.f32.mrb[131].mxu1  ;;  %v2163_v21 = vpop.f32.mrb[131].mxu0  ;;  %v2439_v37 = vmul.f32 %v2169_v31, %v2169_v31 }
 0x1fe   : > { %v2437_v23 = vmul.f32 %v2161_v14, %v2161_v14  ;;  %v3370_v12 = vadd.f32 %v3369_v29, %v3368_v60  ;;  %v2164_v35 = vadd.f32 %v2163_v21, %v4703_v9  ;;  %v2032_v43 = vadd.f32 %v3367_v58, %v4642_v62 }
 0x1ff   : > { %v2398_v48 = vadd.f32 %v2397_v38, %v2161_v14  ;;  %v2467_v57 = vadd.f32 %v2466_v5, %v2436_v39  ;;  %v2893_v19 = vpack.c.bf16 %v2172_v6, %v2169_v31  ;;  %v2440_v32 = vmul.f32 %v2172_v6, %v2172_v6 }
 0x200   : > { %v2888_v30 = vpack.c.bf16 %v2164_v35, %v2161_v14  ;;  %v2438_v51 = vmul.f32 %v2164_v35, %v2164_v35  ;;  %v2035_v47 = vadd.f32 %v3370_v12, %v4648_v8 }
 0x201   : > { %v2468_v44 = vadd.f32 %v2467_v57, %v2437_v23  ;;  %2934 = vst [vmem:[%s4696_s24 + $0x48] sm:$0xff] %v2893_v19   ;;  %v2399_v4 = vadd.f32 %v2398_v48, %v2164_v35 }
 0x202   : > { %2933 = vst [vmem:[%s4696_s24 + $0x40] sm:$0xff] %v2888_v30   ;;  %v3371_v18 = vpop.f32.mrb[132].mxu1  ;;  %v3451_v16 = vpop.f32.mrb[132].mxu0 }
 0x203   : > { %v2400_v28 = vadd.f32 %v2399_v4, %v2169_v31  ;;  %v2469_v2 = vadd.f32 %v2468_v44, %v2438_v51  ;;  %v2185_v3 = vadd.f32 %v3451_v16, %v2024_v54  ;;  %v3372_v9 = vpop.f32.mrb[133].mxu1  ;;  %v2176_v56 = vpop.f32.mrb[133].mxu0 }
 0x204   : > { %v3373_v62 = vadd.f32 %v3372_v9, %v3371_v18  ;;  %v2177_v17 = vadd.f32 %v2176_v56, %v4724_v55  ;;  %v3374_v50 = vpop.f32.mrb[134].mxu1  ;;  %v3452_v59 = vpop.f32.mrb[134].mxu0 }
 0x205   : > { %v2470_v25 = vadd.f32 %v2469_v2, %v2439_v37  ;;  %v2401_v8 = vadd.f32 %v2400_v28, %v2172_v6  ;;  %v2188_v20 = vadd.f32 %v3452_v59, %v2027_v27  ;;  %v3375_v53 = vpop.f32.mrb[135].mxu1  ;;  %v2179_v49 = vpop.f32.mrb[135].mxu0  ;;  %v2443_v31 = vmul.f32 %v2185_v3, %v2185_v3 }
 0x206   : > { %v2441_v41 = vmul.f32 %v2177_v17, %v2177_v17  ;;  %v3376_v61 = vadd.f32 %v3375_v53, %v3374_v50  ;;  %v2180_v42 = vadd.f32 %v2179_v49, %v4727_v45  ;;  %v2040_v54 = vadd.f32 %v3373_v62, %v4654_v33 }
 0x207   : > { %v2402_v34 = vadd.f32 %v2401_v8, %v2177_v17  ;;  %v2471_v26 = vadd.f32 %v2470_v25, %v2440_v32  ;;  %v2903_v63 = vpack.c.bf16 %v2188_v20, %v2185_v3  ;;  %v2444_v5 = vmul.f32 %v2188_v20, %v2188_v20 }
 0x208   : > { %v2898_v55 = vpack.c.bf16 %v2180_v42, %v2177_v17  ;;  %v2442_v10 = vmul.f32 %v2180_v42, %v2180_v42  ;;  %v2043_v46 = vadd.f32 %v3376_v61, %v4660_v40 }
 0x209   : > { %v2472_v52 = vadd.f32 %v2471_v26, %v2441_v41  ;;  %2936 = vst [vmem:[%s4696_s24 + $0x58] sm:$0xff] %v2903_v63   ;;  %v2403_v0 = vadd.f32 %v2402_v34, %v2180_v42 }
 0x20a   : > { %2935 = vst [vmem:[%s4696_s24 + $0x50] sm:$0xff] %v2898_v55   ;;  %v3377_v27 = vpop.f32.mrb[136].mxu1  ;;  %v3455_v15 = vpop.f32.mrb[136].mxu0 }
 0x20b   : > { %v2404_v36 = vadd.f32 %v2403_v0, %v2185_v3  ;;  %v2473_v22 = vadd.f32 %v2472_v52, %v2442_v10  ;;  %v2201_v58 = vadd.f32 %v3455_v15, %v2040_v54  ;;  %v3378_v45 = vpop.f32.mrb[137].mxu1  ;;  %v2192_v14 = vpop.f32.mrb[137].mxu0 }
 0x20c   : > { %v3379_v33 = vadd.f32 %v3378_v45, %v3377_v27  ;;  %v2193_v60 = vadd.f32 %v2192_v14, %v2032_v43  ;;  %v3380_v13 = vpop.f32.mrb[138].mxu1  ;;  %v3456_v39 = vpop.f32.mrb[138].mxu0 }
 0x20d   : > { %v2474_v38 = vadd.f32 %v2473_v22, %v2443_v31  ;;  %v2405_v40 = vadd.f32 %v2404_v36, %v2188_v20  ;;  %v2204_v6 = vadd.f32 %v3456_v39, %v2043_v46  ;;  %v3381_v29 = vpop.f32.mrb[139].mxu1  ;;  %v2195_v21 = vpop.f32.mrb[139].mxu0  ;;  %v2447_v28 = vmul.f32 %v2201_v58, %v2201_v58 }
 0x20e   : > { %v2445_v23 = vmul.f32 %v2193_v60, %v2193_v60  ;;  %v3382_v12 = vadd.f32 %v3381_v29, %v3380_v13  ;;  %v2196_v35 = vadd.f32 %v2195_v21, %v2035_v47  ;;  %v2048_v48 = vadd.f32 %v3379_v33, %v4666_v24 }
 0x20f   : > { %v2406_v57 = vadd.f32 %v2405_v40, %v2193_v60  ;;  %v2475_v19 = vadd.f32 %v2474_v38, %v2444_v5  ;;  %v2913_v30 = vpack.c.bf16 %v2204_v6, %v2201_v58  ;;  %v2448_v50 = vmul.f32 %v2204_v6, %v2204_v6 }
 0x210   : > { %v2908_v51 = vpack.c.bf16 %v2196_v35, %v2193_v60  ;;  %v2446_v43 = vmul.f32 %v2196_v35, %v2196_v35  ;;  %v2051_v44 = vadd.f32 %v3382_v12, %v4672_v7 }
 0x211   : > { %v2476_v4 = vadd.f32 %v2475_v19, %v2445_v23  ;;  %2938 = vst [vmem:[%s4696_s24 + $0x68] sm:$0xff] %v2913_v30   ;;  %v2407_v18 = vadd.f32 %v2406_v57, %v2196_v35 }
 0x212   : > { %2937 = vst [vmem:[%s4696_s24 + $0x60] sm:$0xff] %v2908_v51   ;;  %v3383_v16 = vpop.f32.mrb[140].mxu1  ;;  %v3459_v37 = vpop.f32.mrb[140].mxu0 }
 0x213   : > { %v2408_v2 = vadd.f32 %v2407_v18, %v2201_v58  ;;  %v2477_v3 = vadd.f32 %v2476_v4, %v2446_v43  ;;  %v3384_v9 = vpop.f32.mrb[141].mxu1  ;;  %v2208_v47 = vpop.f32.mrb[141].mxu0 }
 0x214   : > { %v3385_v56 = vadd.f32 %v3384_v9, %v3383_v16  ;;  %v2209_v24 = vadd.f32 %v2208_v47, %v2048_v48  ;;  %v3386_v62 = vpop.f32.mrb[142].mxu1  ;;  %v3460_v17 = vpop.f32.mrb[142].mxu0 }
 0x215   : > { %v2478_v59 = vadd.f32 %v2477_v3, %v2447_v28  ;;  %v2409_v32 = vadd.f32 %v2408_v2, %v2204_v6  ;;  %v3387_v25 = vpop.f32.mrb[143].mxu1  ;;  %v2211_v7 = vpop.f32.mrb[143].mxu0 }
 0x216   : > { %v2056_v8 = vadd.f32 %v3385_v56, %v4678_v11  ;;  %v2449_v20 = vmul.f32 %v2209_v24, %v2209_v24  ;;  %v3388_v53 = vadd.f32 %v3387_v25, %v3386_v62  ;;  %v2212_v49 = vadd.f32 %v2211_v7, %v2051_v44 }
 0x217   : > { %v2410_v41 = vadd.f32 %v2409_v32, %v2209_v24  ;;  %v2479_v61 = vadd.f32 %v2478_v59, %v2448_v50 }
 0x218   : > { %v2217_v42 = vadd.f32 %v3459_v37, %v2056_v8  ;;  %v2059_v54 = vadd.f32 %v3388_v53, %v4684_v1  ;;  %v2918_v34 = vpack.c.bf16 %v2212_v49, %v2209_v24  ;;  %v2450_v26 = vmul.f32 %v2212_v49, %v2212_v49 }
 0x219   : > { %v2480_v63 = vadd.f32 %v2479_v61, %v2449_v20  ;;  %v2411_v55 = vadd.f32 %v2410_v41, %v2212_v49 }
 0x21a   : > { %v2451_v10 = vmul.f32 %v2217_v42, %v2217_v42  ;;  %v2220_v46 = vadd.f32 %v3460_v17, %v2059_v54  ;;  %2939 = vst [vmem:[%s4696_s24 + $0x70] sm:$0xff] %v2918_v34  }
 0x21b   : > { %v2412_v52 = vadd.f32 %v2411_v55, %v2217_v42  ;;  %v2481_v0 = vadd.f32 %v2480_v63, %v2450_v26 }
 0x21c   : > { %v2923_v11 = vpack.c.bf16 %v2220_v46, %v2217_v42  ;;  %v2452_v27 = vmul.f32 %v2220_v46, %v2220_v46 }
 0x21d   : > { %v2413_v15 = vadd.f32 %v2412_v52, %v2220_v46  ;;  %v2482_v31 = vadd.f32 %v2481_v0, %v2451_v10 }
 0x21e   : > { %2940 = vst [vmem:[%s4696_s24 + $0x78] sm:$0xff] %v2923_v11  }
 0x21f   : > { %v2414_v36 = vrot.slane %v2413_v15, 4  ;;  %v2483_v22 = vadd.f32 %v2482_v31, %v2452_v27 }
 0x221   : > { %v2415_v58 = vadd.f32 %v2414_v36, %v2413_v15  ;;  %v2484_v45 = vrot.slane %v2483_v22, 4 }
 0x223   : > { %v2416_v1 = vrot.slane %v2415_v58, 2  ;;  %v2485_v14 = vadd.f32 %v2484_v45, %v2483_v22 }
 0x225   : > { %v2417_v33 = vadd.f32 %v2416_v1, %v2415_v58  ;;  %v2486_v60 = vrot.slane %v2485_v14, 2 }
 0x227   : > { %v2418_v13 = vrot.slane %v2417_v33, 1  ;;  %v2487_v39 = vadd.f32 %v2486_v60, %v2485_v14 }
 0x229   : > { %v2419_v5 = vadd.f32 %v2418_v13, %v2417_v33  ;;  %v2488_v38 = vrot.slane %v2487_v39, 1 }
 0x22b   : > { %2420 = vst [vmem:[%s411_s27] sm:$0x1] %v2419_v5  ;;  %v2489_v40 = vadd.f32 %v2488_v38, %v2487_v39 }
 0x22d   : > { %2490 = vst [vmem:[%s411_s27 + $0x1] sm:$0x1] %v2489_v40 }
 0x22e PF: > { %s16_s20 = sadd.s32 1, %s3595_s20   ;;  %s4784_s18 = smov %s3591_s19 }
 0x22f   : > { %p13_p5 = scmp.ge.s32.totalorder %s16_s20, 4   ;;  %s4785_s19 = smov %s4787_s21 }
 0x231   :  { %15 = sbr.rel (!%p13_p5) target bundleno = 2 (0x2), region = 84 }

// kernel: double_conv.4
= control target key start
LH: loop header
LB: loop body
LE: loop exit
PB: predicated region body
PF: predicated region fallthrough
CT: control target
= control target key end

     0   :  { %s3814_s24 = smov 0   ;;  %s3816_s25 = smov 0   ;;  %s5043_s0 = inlined_call_operand.vmem [shape: bf16[2,16,16,128], index: 0, kind: input, shape index: {}, may-alias: {0,1,2}]   ;;  %s5044_s1 = inlined_call_operand.vmem [shape: bf16[2,16,16,128], index: 1, kind: input, shape index: {}, may-alias: {0,1,2}]   ;;  %s5045_s2 = inlined_call_operand.vmem [shape: bf16[2,16,16,128], index: 2, kind: input, shape index: {}, may-alias: {0,1,2}]   ;;  %s5046_s3 = inlined_call_operand.vmem [shape: bf16[1152,128], index: 3, kind: input, shape index: {}]   ;;  %s5047_s4 = inlined_call_operand.vmem [shape: f32[1,128], index: 4, kind: input, shape index: {}]   ;;  %s5048_s5 = inlined_call_operand.vmem [shape: f32[1,128], index: 5, kind: input, shape index: {}]   ;;  %s5049_s6 = inlined_call_operand.vmem [shape: bf16[2,16,16,128], index: 6, kind: output, shape index: {0}]   ;;  %s5050_s7 = inlined_call_operand.vmem [shape: f32[2,1,2,128], index: 7, kind: output, shape index: {1}]  }
   0x1   :  { %s3818_s26 = smov 0  }
   0x2 LB: > { %s30_s27 = sadd.s32 1, %s3768_s25  ;;  %p2778_p0 = scmp.ge.s32.totalorder %s3772_s26, 1  ;;  %s3772_s26 = sphi %s3818_s26, %s18_s26   ;;  %s3768_s25 = sphi %s3816_s25, %s5056_s25   ;;  %s3764_s24 = sphi %s3814_s24, %s5055_s24  }
   0x3   : > { %p32_p1 = scmp.ge.s32.totalorder %s30_s27, 2  ;;  %p328_p2 = scmp.lt.s32.totalorder %s3772_s26, 3 }
   0x5   : > { %s5058_s27 = smov (%p32_p1, %s30_s27), 0  ;;  %p329_p3 = pnand %p2778_p0, %p328_p2 }
   0x6   : > { %v3676_v0 = vld [vmem:[%s5046_s3 + $0x40] sm:$0xff] (!%p329_p3)   ;;  %v3678_v2 = vld [vmem:[%s5046_s3 + $0x48] sm:$0xff] (!%p329_p3)   ;;  %p404_p4 = scmp.lt.s32.totalorder (!%p329_p3), %s3764_s24, 1  ;;  %v3680_v4 = vld [vmem:[%s5046_s3 + $0x50] sm:$0xff] (!%p329_p3)   ;;  %vm850_vm0 = vcmask (!%p329_p3), 1040384   ;;  %vm925_vm3 = vcmask (!%p329_p3), 1047552  }
   0x7   : > { %332 = sbr.rel (%p329_p3) target bundleno = 558 (0x22e), region = 44  ;;  %v3677_v1 = vld [vmem:[%s5046_s3] sm:$0xff] (!%p329_p3)   ;;  %3116 = vmatprep.subr.bf16.mxu0 (!%p329_p3), %v3676_v0  ;;  %3636 = vmatprep.subr.bf16.mxu1 (!%p329_p3), %v3676_v0  ;;  %v3679_v3 = vld [vmem:[%s5046_s3 + $0x8] sm:$0xff] (!%p329_p3)   ;;  %v3681_v5 = vld [vmem:[%s5046_s3 + $0x10] sm:$0xff] (!%p329_p3)   ;;  %vm851_vm1 = vsmask.f32 (!%p329_p3), 256 }
   0x8   : > { %3117 = vmatpush3.bf16.msra.mxu0 (!%p329_p3), %v3677_v1  ;;  %3644 = vmatpush3.bf16.msra.mxu1 (!%p329_p3), %v3677_v1  ;;  %v3682_v6 = vld [vmem:[%s5046_s3 + $0x58] sm:$0xff] (!%p329_p3)   ;;  %v3684_v8 = vld [vmem:[%s5046_s3 + $0x60] sm:$0xff] (!%p329_p3)   ;;  %v3686_v10 = vld [vmem:[%s5046_s3 + $0x68] sm:$0xff] (!%p329_p3)   ;;  %vm926_vm4 = vsmask.f32 (!%p329_p3), 7424 }
   0x9   : > { %3118 = vmatprep.subr.bf16.mxu0 (!%p329_p3), %v3678_v2  ;;  %3637 = vmatprep.subr.bf16.mxu1 (!%p329_p3), %v3678_v2  ;;  %v3683_v7 = vld [vmem:[%s5046_s3 + $0x18] sm:$0xff] (!%p329_p3)   ;;  %v3685_v9 = vld [vmem:[%s5046_s3 + $0x20] sm:$0xff] (!%p329_p3)   ;;  %v3687_v19 = vld [vmem:[%s5046_s3 + $0x28] sm:$0xff] (!%p329_p3)  }
   0xa   : > { %v3883_v12 = vld [vmem:[%s5047_s4] ss:$0 sm:$0xff] (!%p329_p3)  ;;  %v3688_v22 = vld [vmem:[%s5046_s3 + $0x70] sm:$0xff] (!%p329_p3)   ;;  %v3690_v33 = vld [vmem:[%s5046_s3 + $0x78] sm:$0xff] (!%p329_p3)  }
   0xb   : > { %v3889_v16 = vld [vmem:[%s5048_s5] ss:$0 sm:$0xff] (!%p329_p3)  ;;  %v3689_v29 = vld [vmem:[%s5046_s3 + $0x30] sm:$0xff] (!%p329_p3)   ;;  %v3691_v45 = vld [vmem:[%s5046_s3 + $0x38] sm:$0xff] (!%p329_p3)  }
   0xc   : > { %3119 = vmatpush3.bf16.msra.mxu0 (!%p329_p3), %v3679_v3  ;;  %3645 = vmatpush3.bf16.msra.mxu1 (!%p329_p3), %v3679_v3  ;;  %v3692_v50 = vld [vmem:[%s5046_s3 + $0xc0] sm:$0xff] (!%p329_p3)   ;;  %vm3944_vm2 = vmand (!%p329_p3), %vm850_vm0, %vm851_vm1 }
   0xd   : > { %3120 = vmatprep.subr.bf16.mxu0 (!%p329_p3), %v3680_v4  ;;  %3638 = vmatprep.subr.bf16.mxu1 (!%p329_p3), %v3680_v4  ;;  %v3693_v51 = vld [vmem:[%s5046_s3 + $0x140] sm:$0xff] (!%p329_p3)   ;;  %vm4166_vm5 = vmand (!%p329_p3), %vm925_vm3, %vm926_vm4 }
   0xe   : > { %s5060_s24 = smov (!%p404_p4, %s3764_s24), 1 }
   0xf   : > { %s3856_s19 = sshll.u32 %s5060_s24, 7 }
  0x10   : > { %3121 = vmatpush3.bf16.msra.mxu0 %v3681_v5  ;;  %3646 = vmatpush3.bf16.msra.mxu1 %v3681_v5  ;;  %s426_s30 = scalar_lea.vmem %s5044_s1, %s3856_s19  ;;  %s3872_s10 = scalar_lea.vmem %s5043_s0, %s3856_s19 }
  0x11   : > { %3122 = vmatprep.subr.bf16.mxu0 %v3682_v6  ;;  %3639 = vmatprep.subr.bf16.mxu1 %v3682_v6  ;;  %v2934_v11 = vld [vmem:[%s426_s30] sm:$0xff]   ;;  %v3096_v15 = vld [vmem:[%s3872_s10 + $0x58] sm:$0xff]   ;;  %v3086_v2 = vld [vmem:[%s3872_s10 + $0x8] sm:$0xff]   ;;  %s2899_s30 = sadd.s32 120, %s3856_s19  ;;  %s4965_s14 = scalar_lea.vmem %s5049_s6, %s3856_s19 }
  0x12   : > { %v2935_v13 = vunpack.c.l.bf16 %v2934_v11  ;;  %v2936_v14 = vunpack.c.h.bf16 %v2934_v11  ;;  %v2983_v17 = vunpack.c.l.bf16 %v3096_v15  ;;  %v2984_v18 = vunpack.c.h.bf16 %v3096_v15  ;;  %v2938_v32 = vld [vmem:[%s3872_s10] sm:$0xff]   ;;  %s443_s11 = scalar_lea.vmem %s5045_s2, %s2899_s30  ;;  %s2787_s19 = sshll.u32 %s5060_s24, 1 }
  0x13   : > { %v2939_v36 = vunpack.c.l.bf16 %v2938_v32  ;;  %v2940_v37 = vunpack.c.h.bf16 %v2938_v32  ;;  %v3097_v38 = vld [vmem:[%s3872_s10 + $0x60] sm:$0xff]   ;;  %v2943_v5 = vunpack.c.l.bf16 %v3086_v2  ;;  %v2944_v6 = vunpack.c.h.bf16 %v3086_v2  ;;  %s465_s17 = scalar_lea.vmem %s5050_s7, %s2787_s19 }
  0x14   : > { %3123 = vmatpush3.bf16.msra.mxu0 %v3683_v7  ;;  %3647 = vmatpush3.bf16.msra.mxu1 %v3683_v7  ;;  %v547_v20 = vmul.f32 %v2935_v13, %v3883_v12  ;;  %v548_v21 = vmul.f32 %v2936_v14, %v3883_v12  ;;  %v571_v23 = vmul.f32 %v2983_v17, %v3883_v12  ;;  %v2987_v40 = vunpack.c.l.bf16 %v3097_v38  ;;  %v3098_v7 = vld [vmem:[%s3872_s10 + $0x68] sm:$0xff]   ;;  %v3694_v15 = vld [vmem:[%s5046_s3 + $0x80] sm:$0xff]  }
  0x15   : > { %3124 = vmatprep.subr.bf16.mxu0 %v3684_v8  ;;  %3640 = vmatprep.subr.bf16.mxu1 %v3684_v8  ;;  %v572_v24 = vmul.f32 %v2984_v18, %v3883_v12  ;;  %v2988_v41 = vunpack.c.h.bf16 %v3097_v38  ;;  %v549_v43 = vmul.f32 %v2939_v36, %v3883_v12  ;;  %v550_v44 = vmul.f32 %v2940_v37, %v3883_v12  ;;  %v3696_v17 = vld [vmem:[%s5046_s3 + $0xc8] sm:$0xff]   ;;  %v3099_v38 = vld [vmem:[%s3872_s10 + $0x70] sm:$0xff]  }
  0x16   : > { %v589_v25 = vadd.f32 %v3889_v16, %v547_v20  ;;  %v590_v26 = vadd.f32 %v3889_v16, %v548_v21  ;;  %v613_v27 = vadd.f32 %v3889_v16, %v571_v23  ;;  %v573_v47 = vmul.f32 %v2987_v40, %v3883_v12  ;;  %v3701_v23 = vld [vmem:[%s5046_s3 + $0x148] sm:$0xff]  }
  0x17   : > { %v614_v28 = vadd.f32 %v3889_v16, %v572_v24  ;;  %v574_v48 = vmul.f32 %v2988_v41, %v3883_v12  ;;  %v591_v52 = vadd.f32 %v3889_v16, %v549_v43  ;;  %v592_v53 = vadd.f32 %v3889_v16, %v550_v44 }
  0x18   : > { %3125 = vmatpush3.bf16.msra.mxu0 %v3685_v9  ;;  %3648 = vmatpush3.bf16.msra.mxu1 %v3685_v9  ;;  %v625_v30 = vmax.f32 %v589_v25, 0.0  ;;  %v626_v31 = vmax.f32 %v590_v26, 0.0  ;;  %v649_v34 = vmax.f32 %v613_v27, 0.0  ;;  %v615_v56 = vadd.f32 %v3889_v16, %v573_v47  ;;  %v3695_v9 = vld [vmem:[%s5046_s3 + $0x100] sm:$0xff]   ;;  %v3697_v27 = vld [vmem:[%s5046_s3 + $0x88] sm:$0xff]  }
  0x19   : > { %3126 = vmatprep.subr.bf16.mxu0 %v3686_v10  ;;  %3641 = vmatprep.subr.bf16.mxu1 %v3686_v10  ;;  %v650_v35 = vmax.f32 %v614_v28, 0.0  ;;  %v616_v57 = vadd.f32 %v3889_v16, %v574_v48  ;;  %v627_v60 = vmax.f32 %v591_v52, 0.0  ;;  %v628_v61 = vmax.f32 %v592_v53, 0.0  ;;  %v3709_v48 = vld [vmem:[%s5046_s3 + $0x150] sm:$0xff]  }
  0x1a   : > { %v661_v39 = vpack.c.bf16 %v626_v31, %v625_v30  ;;  %v651_v0 = vmax.f32 %v615_v56, 0.0  ;;  %v2991_v11 = vunpack.c.l.bf16 %v3098_v7  ;;  %v2992_v13 = vunpack.c.h.bf16 %v3098_v7  ;;  %v3087_v31 = vld [vmem:[%s3872_s10 + $0x10] sm:$0xff]  }
  0x1b   : > { %v673_v42 = vpack.c.bf16 %v650_v35, %v649_v34  ;;  %v652_v1 = vmax.f32 %v616_v57, 0.0  ;;  %v662_v4 = vpack.c.bf16 %v628_v61, %v627_v60  ;;  %v552_v20 = vmul.f32 %v2944_v6, %v3883_v12  ;;  %v3698_v34 = vld [vmem:[%s5046_s3 + $0xd0] sm:$0xff]   ;;  %v3703_v35 = vld [vmem:[%s5046_s3 + $0x108] sm:$0xff]  }
  0x1c   : > { %3127 = vmatpush3.bf16.msra.mxu0 %v3687_v19  ;;  %3649 = vmatpush3.bf16.msra.mxu1 %v3687_v19  ;;  %v3918_v46 = vmul.bf16 0.0|0.0, %v661_v39  ;;  %v551_v19 = vmul.f32 %v2943_v5, %v3883_v12  ;;  %v575_v24 = vmul.f32 %v2991_v11, %v3883_v12  ;;  %v576_v25 = vmul.f32 %v2992_v13, %v3883_v12 }
  0x1d   : > { %3128 = vmatprep.subr.bf16.mxu0 %v3688_v22  ;;  %3642 = vmatprep.subr.bf16.mxu1 %v3688_v22  ;;  %v3922_v49 = vmul.bf16 1.0|1.0, %v673_v42  ;;  %v674_v10 = vpack.c.bf16 %v652_v1, %v651_v0  ;;  %v3965_v18 = vmul.bf16 1.0|1.0, %v662_v4  ;;  %v594_v36 = vadd.f32 %v3889_v16, %v552_v20  ;;  %v3700_v1 = vld [vmem:[%s5046_s3 + $0xd8] sm:$0xff]  }
  0x1e   : > { %1554 = vmatprep.mubr.bf16.mxu0 %v3918_v46  ;;  %v707_v54 = vshrl.u32 %v3918_v46, 16  ;;  %v710_v55 = vshll.u32 %v3918_v46, 16  ;;  %v593_v30 = vadd.f32 %v3889_v16, %v551_v19  ;;  %v617_v37 = vadd.f32 %v3889_v16, %v575_v24 }
  0x1f   : > { %1650 = vmatprep.mubr.bf16.mxu1 %v3922_v49  ;;  %v791_v58 = vshrl.u32 %v3922_v49, 16  ;;  %v794_v59 = vshll.u32 %v3922_v49, 16  ;;  %v3971_v22 = vmul.bf16 1.0|1.0, %v674_v10  ;;  %v714_v28 = vshrl.u32 %v3965_v18, 16  ;;  %v3702_v10 = vld [vmem:[%s5046_s3 + $0x98] sm:$0xff]  }
  0x20   : > { %3129 = vmatpush3.bf16.msra.mxu0 %v3689_v29  ;;  %3650 = vmatpush3.bf16.msra.mxu1 %v3689_v29  ;;  %v709_v62 = vrot.slane %v707_v54, 7  ;;  %v717_v29 = vshll.u32 %v3965_v18, 16  ;;  %v629_v40 = vmax.f32 %v593_v30, 0.0  ;;  %v618_v41 = vadd.f32 %v3889_v16, %v576_v25  ;;  %v3704_v25 = vld [vmem:[%s5046_s3 + $0xe0] sm:$0xff]  }
  0x21   : > { %3130 = vmatprep.subr.bf16.mxu0 %v3690_v33  ;;  %3643 = vmatprep.subr.bf16.mxu1 %v3690_v33  ;;  %v793_v3 = vrot.slane %v791_v58, 7  ;;  %v798_v32 = vshrl.u32 %v3971_v22, 16  ;;  %v801_v33 = vshll.u32 %v3971_v22, 16  ;;  %v716_v39 = vrot.slane %v714_v28, 7 }
  0x22   : > { %v712_v8 = vor.u32 %v710_v55, %v709_v62  ;;  %v2947_v42 = vunpack.c.l.bf16 %v3087_v31  ;;  %v630_v44 = vmax.f32 %v594_v36, 0.0  ;;  %v2948_v47 = vunpack.c.h.bf16 %v3087_v31 }
  0x23   : > { %v796_v14 = vor.u32 %v794_v59, %v793_v3  ;;  %v800_v43 = vrot.slane %v798_v32, 7  ;;  %v654_v52 = vmax.f32 %v618_v41, 0.0  ;;  %v2995_v56 = vunpack.c.l.bf16 %v3099_v38 }
  0x24   : > { %3131 = vmatpush3.bf16.msra.mxu0 %v3691_v45  ;;  %3651 = vmatpush3.bf16.msra.mxu1 %v3691_v45  ;;  %v853_v21 = vsel %vm3944_vm2, 0, %v712_v8  ;;  %v653_v45 = vmax.f32 %v617_v37, 0.0  ;;  %v553_v53 = vmul.f32 %v2947_v42, %v3883_v12  ;;  %v663_v60 = vpack.c.bf16 %v630_v44, %v629_v40  ;;  %v3716_v40 = vld [vmem:[%s5046_s3 + $0x158] sm:$0xff]   ;;  %v3706_v42 = vld [vmem:[%s5046_s3 + $0xe8] sm:$0xff]  }
  0x25   : > { %3228 = vmatprep.subr.bf16.mxu1 %v3692_v50  ;;  %3340 = vmatprep.subr.bf16.mxu0 %v3693_v51  ;;  %v3980_v26 = vsel %vm3944_vm2, 0, %v796_v14  ;;  %v719_v50 = vor.u32 %v717_v29, %v716_v39  ;;  %v3699_v51 = vld [vmem:[%s5046_s3 + $0x90] sm:$0xff]   ;;  %v803_v57 = vor.u32 %v801_v33, %v800_v43  ;;  %v554_v61 = vmul.f32 %v2948_v47, %v3883_v12 }
  0x26   : > { %v2996_v62 = vunpack.c.h.bf16 %v3099_v38  ;;  %v675_v2 = vpack.c.bf16 %v654_v52, %v653_v45  ;;  %v595_v3 = vadd.f32 %v3889_v16, %v553_v53  ;;  %v577_v4 = vmul.f32 %v2995_v56, %v3883_v12  ;;  %v3705_v38 = vld [vmem:[%s5046_s3 + $0xa0] sm:$0xff]  }
  0x27   : > { %1555 = vmatmul.mubr.bf16.vlgmr.msra.gmra.mrb[0].mxu0 %v853_v21  ;;  %1651 = vmatmul.mubr.bf16.vlgmr.msra.gmra.mrb[0].mxu1 %v3980_v26  ;;  %v4022_v0 = vsel %vm3944_vm2, 0, %v719_v50  ;;  %v4031_v5 = vsel %vm3944_vm2, 0, %v803_v57  ;;  %v4033_v6 = vmul.bf16 1.0|1.0, %v663_v60  ;;  %v596_v7 = vadd.f32 %v3889_v16, %v554_v61  ;;  %v3088_v21 = vld [vmem:[%s3872_s10 + $0x18] sm:$0xff]   ;;  %v3090_v60 = vld [vmem:[%s3872_s10 + $0x28] sm:$0xff]  }
  0x28   : > { %3341 = vmatpush3.bf16.msra.mxu0 %v3695_v9  ;;  %3229 = vmatpush3.bf16.msra.mxu1 %v3694_v15  ;;  %v578_v8 = vmul.f32 %v2996_v62, %v3883_v12  ;;  %v3711_v9 = vld [vmem:[%s5046_s3 + $0x110] sm:$0xff]   ;;  %v4044_v11 = vmul.bf16 1.0|1.0, %v675_v2  ;;  %v631_v13 = vmax.f32 %v595_v3, 0.0  ;;  %v619_v14 = vadd.f32 %v3889_v16, %v577_v4  ;;  %v3717_v50 = vld [vmem:[%s5046_s3 + $0x118] sm:$0xff]   ;;  %v3707_v62 = vld [vmem:[%s5046_s3 + $0xa8] sm:$0xff]  }
  0x29   : > { %1562 = vmatprep.mubr.bf16.mxu0 %v3965_v18  ;;  %3230 = vmatprep.subr.bf16.mxu1 %v3696_v17  ;;  %v721_v15 = vshrl.u32 %v4033_v6, 16  ;;  %v724_v17 = vshll.u32 %v4033_v6, 16  ;;  %v632_v19 = vmax.f32 %v596_v7, 0.0  ;;  %v2951_v30 = vunpack.c.l.bf16 %v3088_v21 }
  0x2a   : > { %1658 = vmatprep.mubr.bf16.mxu1 %v3971_v22  ;;  %3342 = vmatprep.subr.bf16.mxu0 %v3701_v23  ;;  %v620_v20 = vadd.f32 %v3889_v16, %v578_v8  ;;  %v805_v23 = vshrl.u32 %v4044_v11, 16  ;;  %v808_v24 = vshll.u32 %v4044_v11, 16  ;;  %v2952_v36 = vunpack.c.h.bf16 %v3088_v21 }
  0x2b   : > { %v723_v31 = vrot.slane %v721_v15, 7  ;;  %v555_v39 = vmul.f32 %v2951_v30, %v3883_v12  ;;  %v2960_v30 = vunpack.c.h.bf16 %v3090_v60 }
  0x2c   : > { %3343 = vmatpush3.bf16.msra.mxu0 %v3703_v35  ;;  %3231 = vmatpush3.bf16.msra.mxu1 %v3697_v27  ;;  %v655_v27 = vmax.f32 %v619_v14, 0.0  ;;  %v656_v35 = vmax.f32 %v620_v20, 0.0  ;;  %v807_v37 = vrot.slane %v805_v23, 7  ;;  %v556_v45 = vmul.f32 %v2952_v36, %v3883_v12 }
  0x2d   : > { %3344 = vmatprep.subr.bf16.mxu0 %v3709_v48  ;;  %3232 = vmatprep.subr.bf16.mxu1 %v3698_v34  ;;  %v664_v34 = vpack.c.bf16 %v632_v19, %v631_v13  ;;  %v726_v41 = vor.u32 %v724_v17, %v723_v31  ;;  %v597_v48 = vadd.f32 %v3889_v16, %v555_v39  ;;  %v3708_v13 = vld [vmem:[%s5046_s3 + $0xf0] sm:$0xff]   ;;  %v2959_v20 = vunpack.c.l.bf16 %v3090_v60  ;;  %v3720_v31 = vld [vmem:[%s5046_s3 + $0x120] sm:$0xff]  }
  0x2e   : > { %v676_v44 = vpack.c.bf16 %v656_v35, %v655_v27  ;;  %v810_v47 = vor.u32 %v808_v24, %v807_v37  ;;  %v3710_v35 = vld [vmem:[%s5046_s3 + $0xb0] sm:$0xff]  }
  0x2f   : > { %1563 = vmatmul.mubr.bf16.gmra.mrb[4].mxu0 %v4022_v0  ;;  %1659 = vmatmul.mubr.bf16.gmra.mrb[4].mxu1 %v4031_v5  ;;  %v4075_v43 = vmul.bf16 1.0|1.0, %v664_v34  ;;  %v4087_v52 = vsel %vm3944_vm2, 0, %v726_v41  ;;  %v633_v2 = vmax.f32 %v597_v48, 0.0  ;;  %v871_v34 = vrot.slane %v710_v55, 1  ;;  %v3091_v39 = vld [vmem:[%s3872_s10 + $0x30] sm:$0xff]  }
  0x30   : > { %1570 = vmatprep.mubr.bf16.mxu0 %v4033_v6  ;;  %3233 = vmatpush3.bf16.msra.mxu1 %v3699_v51  ;;  %v3089_v51 = vld [vmem:[%s3872_s10 + $0x20] sm:$0xff]   ;;  %v4089_v53 = vmul.bf16 1.0|1.0, %v676_v44  ;;  %v4097_v61 = vsel %vm3944_vm2, 0, %v810_v47  ;;  %v3722_v44 = vld [vmem:[%s5046_s3 + $0x168] sm:$0xff]   ;;  %v2964_v46 = vunpack.c.h.bf16 %v3091_v39 }
  0x31   : > { %1666 = vmatprep.mubr.bf16.mxu1 %v4044_v11  ;;  %3234 = vmatprep.subr.bf16.mxu1 %v3700_v1  ;;  %v728_v56 = vshrl.u32 %v4075_v43, 16  ;;  %v731_v57 = vshll.u32 %v4075_v43, 16  ;;  %v598_v1 = vadd.f32 %v3889_v16, %v556_v45  ;;  %v2955_v3 = vunpack.c.l.bf16 %v3089_v51  ;;  %v3712_v45 = vld [vmem:[%s5046_s3 + $0xf8] sm:$0xff]  }
  0x32   : > { %3345 = vmatpush3.bf16.msra.mxu0 %v3711_v9  ;;  %v812_v7 = vshrl.u32 %v4089_v53, 16  ;;  %v815_v8 = vshll.u32 %v4089_v53, 16  ;;  %v2956_v9 = vunpack.c.h.bf16 %v3089_v51 }
  0x33   : > { %3346 = vmatprep.subr.bf16.mxu0 %v3716_v40  ;;  %v730_v4 = vrot.slane %v728_v56, 7  ;;  %v634_v14 = vmax.f32 %v598_v1, 0.0  ;;  %v557_v19 = vmul.f32 %v2955_v3, %v3883_v12  ;;  %v3092_v3 = vld [vmem:[%s3872_s10 + $0x38] sm:$0xff]  }
  0x34   : > { %3235 = vmatpush3.bf16.msra.mxu1 %v3702_v10  ;;  %v3718_v10 = vld [vmem:[%s5046_s3 + $0x160] sm:$0xff]   ;;  %v558_v27 = vmul.f32 %v2956_v9, %v3883_v12 }
  0x35   : > { %3236 = vmatprep.subr.bf16.mxu1 %v3704_v25  ;;  %v733_v21 = vor.u32 %v731_v57, %v730_v4  ;;  %v814_v25 = vrot.slane %v812_v7, 7  ;;  %v665_v36 = vpack.c.bf16 %v634_v14, %v633_v2  ;;  %v599_v37 = vadd.f32 %v3889_v16, %v557_v19  ;;  %v3713_v19 = vld [vmem:[%s5046_s3 + $0xb8] sm:$0xff]  }
  0x36   : > { %3347 = vmatpush3.bf16.msra.mxu0 %v3717_v50  ;;  %v600_v55 = vadd.f32 %v3889_v16, %v558_v27  ;;  %v2963_v2 = vunpack.c.l.bf16 %v3091_v39  ;;  %v3714_v27 = vld [vmem:[%s5046_s3 + $0x1c0] sm:$0xff]  }
  0x37   : > { %1571 = vmatmul.mubr.bf16.gmra.mrb[8].mxu0 %v4087_v52  ;;  %1667 = vmatmul.mubr.bf16.gmra.mrb[8].mxu1 %v4097_v61  ;;  %v4135_v40 = vsel %vm3944_vm2, 0, %v733_v21  ;;  %v817_v41 = vor.u32 %v815_v8, %v814_v25  ;;  %v4147_v47 = vmul.bf16 1.0|1.0, %v665_v36  ;;  %v635_v48 = vmax.f32 %v599_v37, 0.0 }
  0x38   : > { %1578 = vmatprep.mubr.bf16.mxu0 %v4075_v43  ;;  %3237 = vmatpush3.bf16.msra.mxu1 %v3705_v38  ;;  %v559_v38 = vmul.f32 %v2959_v20, %v3883_v12  ;;  %v636_v60 = vmax.f32 %v600_v55, 0.0 }
  0x39   : > { %1674 = vmatprep.mubr.bf16.mxu1 %v4089_v53  ;;  %3238 = vmatprep.subr.bf16.mxu1 %v3706_v42  ;;  %v560_v42 = vmul.f32 %v2960_v30, %v3883_v12  ;;  %v4152_v51 = vsel %vm3944_vm2, 0, %v817_v41  ;;  %v735_v4 = vshrl.u32 %v4147_v47, 16  ;;  %v738_v9 = vshll.u32 %v4147_v47, 16 }
  0x3a   : > { %3348 = vmatprep.subr.bf16.mxu0 %v3718_v10  ;;  %v601_v50 = vadd.f32 %v3889_v16, %v559_v38  ;;  %v872_v10 = vor.u32 %v871_v34, %v707_v54  ;;  %v666_v20 = vpack.c.bf16 %v636_v60, %v635_v48  ;;  %v561_v54 = vmul.f32 %v2963_v2, %v3883_v12  ;;  %v3726_v34 = vld [vmem:[%s5046_s3 + $0x170] sm:$0xff]  }
  0x3b   : > { %v602_v1 = vadd.f32 %v3889_v16, %v560_v42  ;;  %3349 = vmatpush3.bf16.msra.mxu0 %v3720_v31  ;;  %v737_v25 = vrot.slane %v735_v4, 7  ;;  %v2967_v30 = vunpack.c.l.bf16 %v3092_v3  ;;  %v2968_v31 = vunpack.c.h.bf16 %v3092_v3  ;;  %v3727_v42 = vld [vmem:[%s5046_s3 + $0x130] sm:$0xff]   ;;  %v3093_v3 = vld [vmem:[%s3872_s10 + $0x40] sm:$0xff]  }
  0x3c   : > { %3239 = vmatpush3.bf16.msra.mxu1 %v3707_v62  ;;  %v3723_v62 = vld [vmem:[%s5046_s3 + $0x128] sm:$0xff]   ;;  %v637_v14 = vmax.f32 %v601_v50, 0.0  ;;  %3350 = vmatprep.subr.bf16.mxu0 %v3722_v44  ;;  %v4185_v36 = vmul.bf16 1.0|1.0, %v666_v20  ;;  %v928_v39 = vsel %vm4166_vm5, %v872_v10, 0  ;;  %v3715_v44 = vld [vmem:[%s5046_s3 + $0x180] sm:$0xff]  }
  0x3d   : > { %3240 = vmatprep.subr.bf16.mxu1 %v3708_v13  ;;  %v638_v21 = vmax.f32 %v602_v1, 0.0  ;;  %v740_v38 = vor.u32 %v738_v9, %v737_v25  ;;  %v563_v41 = vmul.f32 %v2967_v30, %v3883_v12  ;;  %v564_v55 = vmul.f32 %v2968_v31, %v3883_v12  ;;  %v3730_v31 = vld [vmem:[%s5046_s3 + $0x178] sm:$0xff]  }
  0x3e   : > { %v745_v48 = vshll.u32 %v4185_v36, 16  ;;  %v873_v2 = vrot.slane %v717_v29, 1  ;;  %v3721_v29 = vld [vmem:[%s5046_s3 + $0x188] sm:$0xff]   ;;  %v2972_v30 = vunpack.c.h.bf16 %v3093_v3 }
  0x3f   : > { %1579 = vmatmul.mubr.bf16.gmra.mrb[12].mxu0 %v4135_v40  ;;  %1675 = vmatmul.mubr.bf16.gmra.mrb[12].mxu1 %v4152_v51  ;;  %v667_v37 = vpack.c.bf16 %v638_v21, %v637_v14  ;;  %v4208_v1 = vsel %vm3944_vm2, 0, %v740_v38  ;;  %v3719_v14 = vld [vmem:[%s5046_s3 + $0x1c8] sm:$0xff]  }
  0x40   : > { %1586 = vmatprep.mubr.bf16.mxu0 %v4147_v47  ;;  %3241 = vmatpush3.bf16.msra.mxu1 %v3710_v35  ;;  %v562_v35 = vmul.f32 %v2964_v46, %v3883_v12  ;;  %v606_v46 = vadd.f32 %v3889_v16, %v564_v55  ;;  %v4248_v55 = vld [vmem:[%s5046_s3 + $0x200] sm:$0xff]  }
  0x41   : > { %1715 = vmatprep.mubr.bf16.mxu1 %v4022_v0  ;;  %3242 = vmatprep.subr.bf16.mxu1 %v3712_v45  ;;  %v603_v0 = vadd.f32 %v3889_v16, %v561_v54  ;;  %v742_v45 = vshrl.u32 %v4185_v36, 16  ;;  %v4203_v50 = vmul.bf16 1.0|1.0, %v667_v37  ;;  %v3724_v37 = vld [vmem:[%s5046_s3 + $0x1d0] sm:$0xff]  }
  0x42   : > { %3351 = vmatpush3.bf16.msra.mxu0 %v3723_v62  ;;  %v604_v60 = vadd.f32 %v3889_v16, %v562_v35 }
  0x43   : > { %3352 = vmatprep.subr.bf16.mxu0 %v3726_v34  ;;  %v639_v62 = vmax.f32 %v603_v0, 0.0  ;;  %v744_v10 = vrot.slane %v742_v45, 7  ;;  %v749_v21 = vshrl.u32 %v4203_v50, 16  ;;  %v874_v34 = vor.u32 %v873_v2, %v714_v28 }
  0x44   : > { %3243 = vmatpush3.bf16.msra.mxu1 %v3713_v19  ;;  %v640_v20 = vmax.f32 %v604_v60, 0.0  ;;  %v605_v19 = vadd.f32 %v3889_v16, %v563_v41  ;;  %v752_v35 = vshll.u32 %v4203_v50, 16  ;;  %v3731_v41 = vld [vmem:[%s5046_s3 + $0x138] sm:$0xff]   ;;  %v566_v60 = vmul.f32 %v2972_v30, %v3883_v12 }
  0x45   : > { %3452 = vmatprep.subr.bf16.mxu1 %v3714_v27  ;;  %v747_v54 = vor.u32 %v745_v48, %v744_v10  ;;  %v2971_v27 = vunpack.c.l.bf16 %v3093_v3  ;;  %v751_v28 = vrot.slane %v749_v21, 7  ;;  %v4258_v2 = vsel %vm4166_vm5, %v874_v34, 0  ;;  %v3725_v3 = vld [vmem:[%s5046_s3 + $0x190] sm:$0xff]   ;;  %v3094_v10 = vld [vmem:[%s3872_s10 + $0x48] sm:$0xff]   ;;  %v3729_v30 = vld [vmem:[%s5046_s3 + $0x198] sm:$0xff]  }
  0x46   : > { %3353 = vmatpush3.bf16.msra.mxu0 %v3727_v42  ;;  %v668_v25 = vpack.c.bf16 %v640_v20, %v639_v62  ;;  %v641_v38 = vmax.f32 %v605_v19, 0.0  ;;  %v875_v62 = vrot.slane %v724_v17, 1  ;;  %v3728_v20 = vld [vmem:[%s5046_s3 + $0x1d8] sm:$0xff]  }
  0x47   : > { %1587 = vmatmul.mubr.bf16.gmra.mrb[16].mxu0 %v4208_v1  ;;  %1716 = vmatmul.mubr.bf16.vlgmr.msra.gmra.mrb[16].mxu1 %v928_v39  ;;  %v642_v39 = vmax.f32 %v606_v46, 0.0  ;;  %v4252_v42 = vsel %vm3944_vm2, 0, %v747_v54  ;;  %v754_v19 = vor.u32 %v752_v35, %v751_v28  ;;  %v608_v46 = vadd.f32 %v3889_v16, %v566_v60  ;;  %v3095_v60 = vld [vmem:[%s3872_s10 + $0x50] sm:$0xff]  }
  0x48   : > { %1594 = vmatprep.mubr.bf16.mxu0 %v4185_v36  ;;  %3453 = vmatpush3.bf16.msra.mxu1 %v3715_v44  ;;  %v4238_v0 = vmul.bf16 1.0|1.0, %v668_v25  ;;  %v565_v44 = vmul.f32 %v2971_v27, %v3883_v12  ;;  %v2975_v54 = vunpack.c.l.bf16 %v3094_v10  ;;  %v2976_v25 = vunpack.c.h.bf16 %v3094_v10 }
  0x49   : > { %1723 = vmatprep.mubr.bf16.mxu1 %v4087_v52  ;;  %3454 = vmatprep.subr.bf16.mxu1 %v3719_v14  ;;  %v669_v14 = vpack.c.bf16 %v642_v39, %v641_v38  ;;  %v876_v27 = vor.u32 %v875_v62, %v721_v15  ;;  %v4293_v38 = vsel %vm3944_vm2, 0, %v754_v19  ;;  %v644_v28 = vmax.f32 %v608_v46, 0.0 }
  0x4a   : > { %3354 = vmatprep.subr.bf16.mxu0 %v3730_v31  ;;  %v756_v17 = vshrl.u32 %v4238_v0, 16  ;;  %v877_v31 = vrot.slane %v731_v57, 1  ;;  %v759_v39 = vshll.u32 %v4238_v0, 16  ;;  %v567_v57 = vmul.f32 %v2975_v54, %v3883_v12 }
  0x4b   : > { %3355 = vmatpush3.bf16.msra.mxu0 %v3731_v41  ;;  %v4286_v34 = vmul.bf16 1.0|1.0, %v669_v14  ;;  %v4303_v62 = vsel %vm4166_vm5, %v876_v27, 0  ;;  %v895_v46 = vrot.slane %v794_v59, 1  ;;  %v897_v54 = vrot.slane %v801_v33, 1  ;;  %v3737_v59 = vld [vmem:[%s5046_s3 + $0x1a8] sm:$0xff]  }
  0x4c   : > { %3455 = vmatpush3.bf16.msra.mxu1 %v3721_v29  ;;  %3588 = vmatprep.subr.bf16.mxu0 %v4248_v55  ;;  %v607_v29 = vadd.f32 %v3889_v16, %v565_v44  ;;  %v758_v15 = vrot.slane %v756_v17, 7  ;;  %v568_v44 = vmul.f32 %v2976_v25, %v3883_v12  ;;  %v878_v10 = vor.u32 %v877_v31, %v728_v56 }
  0x4d   : > { %3456 = vmatprep.subr.bf16.mxu1 %v3724_v37  ;;  %v3732_v37 = vld [vmem:[%s5046_s3 + $0x1e0] sm:$0xff]   ;;  %v763_v14 = vshrl.u32 %v4286_v34, 16  ;;  %v609_v25 = vadd.f32 %v3889_v16, %v567_v57  ;;  %v4331_v33 = vor.u32 %v895_v46, %v791_v58  ;;  %v4335_v31 = vor.u32 %v897_v54, %v798_v32 }
  0x4e   : > { %v643_v41 = vmax.f32 %v607_v29, 0.0  ;;  %v761_v19 = vor.u32 %v759_v39, %v758_v15  ;;  %v2979_v29 = vunpack.c.l.bf16 %v3095_v60  ;;  %v610_v27 = vadd.f32 %v3889_v16, %v568_v44  ;;  %v4384_v46 = vld [vmem:[%s5048_s5] ss:$0 sm:$0xff] }
  0x4f   : > { %1595 = vmatmul.mubr.bf16.gmra.mrb[20].mxu0 %v4252_v42  ;;  %1724 = vmatmul.mubr.bf16.gmra.mrb[20].mxu1 %v4258_v2  ;;  %v766_v16 = vshll.u32 %v4286_v34, 16  ;;  %v879_v15 = vrot.slane %v738_v9, 1  ;;  %v765_v32 = vrot.slane %v763_v14, 7  ;;  %v899_v57 = vrot.slane %v808_v24, 1  ;;  %v3741_v24 = vld [vmem:[%s5046_s3 + $0x1f8] sm:$0xff]  }
  0x50   : > { %1602 = vmatprep.mubr.bf16.mxu0 %v4203_v50  ;;  %1731 = vmatprep.mubr.bf16.mxu1 %v4135_v40  ;;  %v670_v56 = vpack.c.bf16 %v644_v28, %v643_v41  ;;  %v3738_v41 = vld [vmem:[%s5046_s3 + $0x1f0] sm:$0xff]   ;;  %v4349_v58 = vsel %vm3944_vm2, 0, %v761_v19  ;;  %v569_v28 = vmul.f32 %v2979_v29, %v3883_v12  ;;  %v645_v9 = vmax.f32 %v609_v25, 0.0  ;;  %v3743_v25 = vld [vmem:[%s5046_s3 + $0x1b8] sm:$0xff]  }
  0x51   : > { %3457 = vmatpush3.bf16.msra.mxu1 %v3725_v3  ;;  %v3734_v3 = vld [vmem:[%s5046_s3 + $0x1a0] sm:$0xff]   ;;  %v901_v19 = vrot.slane %v815_v8, 1 }
  0x52   : > { %3458 = vmatprep.subr.bf16.mxu1 %v3728_v20  ;;  %v3735_v20 = vld [vmem:[%s5046_s3 + $0x1e8] sm:$0xff]   ;;  %v4356_v44 = vmul.bf16 1.0|1.0, %v670_v56  ;;  %v611_v54 = vadd.f32 %v4384_v46, %v569_v28 }
  0x53   : > { %v4376_v29 = vor.u32 %v901_v19, %v812_v7  ;;  %v880_v7 = vor.u32 %v879_v15, %v735_v4  ;;  %v881_v15 = vrot.slane %v745_v48, 1 }
  0x55   : > { %3459 = vmatpush3.bf16.msra.mxu1 %v3729_v30  ;;  %v2980_v30 = vunpack.c.h.bf16 %v3095_v60  ;;  %v646_v60 = vmax.f32 %v610_v27, 0.0  ;;  %v4405_v4 = vsel %vm4166_vm5, %v880_v7, 0 }
  0x56   : > { %3460 = vmatprep.subr.bf16.mxu1 %v3732_v37  ;;  %v4339_v37 = vsel %vm4166_vm5, %v878_v10, 0  ;;  %v3740_v10 = vld [vmem:[%s5046_s3 + $0x1b0] sm:$0xff]  }
  0x57   : > { %1603 = vmatmul.mubr.bf16.gmra.mrb[24].mxu0 %v4293_v38  ;;  %1732 = vmatmul.mubr.bf16.gmra.mrb[24].mxu1 %v4303_v62  ;;  %v671_v8 = vpack.c.bf16 %v646_v60, %v645_v9 }
  0x58   : > { %1610 = vmatprep.mubr.bf16.mxu0 %v4238_v0  ;;  %1739 = vmatprep.mubr.bf16.mxu1 %v4208_v1 }
  0x59   : > { %3461 = vmatpush3.bf16.msra.mxu1 %v3734_v3  ;;  %v570_v3 = vmul.f32 %v2980_v30, %v3883_v12  ;;  %v768_v12 = vor.u32 %v766_v16, %v765_v32  ;;  %v773_v30 = vshll.u32 %v4356_v44, 16  ;;  %v647_v32 = vmax.f32 %v611_v54, 0.0 }
  0x5a   : > { %3462 = vmatprep.subr.bf16.mxu1 %v3735_v20  ;;  %v4364_v20 = vor.u32 %v899_v57, %v805_v23  ;;  %v770_v23 = vshrl.u32 %v4356_v44, 16 }
  0x5b   : > { %v612_v56 = vadd.f32 %v4384_v46, %v570_v3  ;;  %v4396_v27 = vsel %vm3944_vm2, 0, %v768_v12  ;;  %v882_v3 = vor.u32 %v881_v15, %v742_v45 }
  0x5d   : > { %3463 = vmatpush3.bf16.msra.mxu1 %v3737_v59  ;;  %v772_v59 = vrot.slane %v770_v23, 7  ;;  %v648_v28 = vmax.f32 %v612_v56, 0.0  ;;  %v4425_v12 = vsel %vm4166_vm5, %v882_v3, 0  ;;  %v889_v3 = vrot.slane %v773_v30, 1 }
  0x5e   : > { %3464 = vmatprep.subr.bf16.mxu1 %v3738_v41  ;;  %v4401_v41 = vmul.bf16 1.0|1.0, %v671_v8  ;;  %v883_v8 = vrot.slane %v752_v35, 1 }
  0x5f   : > { %1611 = vmatmul.mubr.bf16.gmra.mrb[28].mxu0 %v4349_v58  ;;  %1740 = vmatmul.mubr.bf16.gmra.mrb[28].mxu1 %v4339_v37  ;;  %v775_v57 = vor.u32 %v773_v30, %v772_v59  ;;  %v672_v60 = vpack.c.bf16 %v648_v28, %v647_v32  ;;  %v885_v32 = vrot.slane %v759_v39, 1  ;;  %v887_v39 = vrot.slane %v766_v16, 1  ;;  %v3736_v16 = vld [vmem:[%s5046_s3 + $0x208] sm:$0xff]  }
  0x60   : > { %1618 = vmatprep.mubr.bf16.mxu0 %v4286_v34  ;;  %1747 = vmatprep.mubr.bf16.mxu1 %v4252_v42  ;;  %v777_v9 = vshrl.u32 %v4401_v41, 16  ;;  %v780_v19 = vshll.u32 %v4401_v41, 16  ;;  %v884_v56 = vor.u32 %v883_v8, %v749_v21 }
  0x61   : > { %3465 = vmatpush3.bf16.msra.mxu1 %v3740_v10  ;;  %v4418_v10 = vsel %vm3944_vm2, 0, %v775_v57  ;;  %v886_v28 = vor.u32 %v885_v32, %v756_v17  ;;  %v888_v17 = vor.u32 %v887_v39, %v763_v14  ;;  %v3739_v14 = vld [vmem:[%s5046_s3 + $0x210] sm:$0xff]   ;;  %v4508_v32 = vld [vmem:[%s5047_s4] ss:$0 sm:$0xff] }
  0x62   : > { %3466 = vmatprep.subr.bf16.mxu1 %v3741_v24  ;;  %v779_v48 = vrot.slane %v777_v9, 7  ;;  %v4421_v24 = vmul.bf16 1.0|1.0, %v672_v60  ;;  %v4443_v59 = vsel %vm4166_vm5, %v884_v56, 0  ;;  %v891_v30 = vrot.slane %v780_v19, 1 }
  0x63   : > { %v4459_v57 = vsel %vm4166_vm5, %v886_v28, 0  ;;  %v4471_v60 = vsel %vm4166_vm5, %v888_v17, 0  ;;  %v3745_v28 = vld [vmem:[%s5046_s3 + $0x228] sm:$0xff]  }
  0x64   : > { %v782_v45 = vor.u32 %v780_v19, %v779_v48  ;;  %v784_v54 = vshrl.u32 %v4421_v24, 16  ;;  %v787_v35 = vshll.u32 %v4421_v24, 16  ;;  %v3100_v48 = vld [vmem:[%s3872_s10 + $0x78] sm:$0xff]   ;;  %v3744_v19 = vld [vmem:[%s5046_s3 + $0x220] sm:$0xff]  }
  0x65   : > { %3467 = vmatpush3.bf16.msra.mxu1 %v3743_v25  ;;  %v2999_v8 = vunpack.c.l.bf16 %v3100_v48 }
  0x66   : > { %v4438_v7 = vsel %vm3944_vm2, 0, %v782_v45  ;;  %v786_v25 = vrot.slane %v784_v54, 7  ;;  %v3000_v45 = vunpack.c.h.bf16 %v3100_v48 }
  0x67   : > { %1619 = vmatmul.mubr.bf16.gmra.mrb[32].mxu0 %v4396_v27  ;;  %1748 = vmatmul.mubr.bf16.gmra.mrb[32].mxu1 %v4405_v4 }
  0x68   : > { %1626 = vmatprep.mubr.bf16.mxu0 %v4356_v44  ;;  %1755 = vmatprep.mubr.bf16.mxu1 %v4293_v38  ;;  %v789_v21 = vor.u32 %v787_v35, %v786_v25  ;;  %v893_v25 = vrot.slane %v787_v35, 1 }
  0x6a   : > { %v4455_v15 = vsel %vm3944_vm2, 0, %v789_v21  ;;  %v580_v21 = vmul.f32 %v4508_v32, %v3000_v45  ;;  %v894_v35 = vor.u32 %v893_v25, %v784_v54  ;;  %v3747_v54 = vld [vmem:[%s5046_s3 + $0x238] sm:$0xff]   ;;  %v4560_v25 = vsel %vm4166_vm5, %v4364_v20, 0 }
  0x6c   : > { %v622_v17 = vadd.f32 %v4384_v46, %v580_v21 }
  0x6f   : > { %1627 = vmatmul.mubr.bf16.gmra.mrb[36].mxu0 %v4418_v10  ;;  %1756 = vmatmul.mubr.bf16.gmra.mrb[36].mxu1 %v4425_v12 }
  0x70   : > { %1634 = vmatprep.mubr.bf16.mxu0 %v4401_v41  ;;  %1763 = vmatprep.mubr.bf16.mxu1 %v4349_v58 }
  0x77   : > { %1635 = vmatmul.mubr.bf16.gmra.mrb[40].mxu0 %v4438_v7  ;;  %1764 = vmatmul.mubr.bf16.gmra.mrb[40].mxu1 %v4443_v59 }
  0x78   : > { %1642 = vmatprep.mubr.bf16.mxu0 %v4421_v24  ;;  %1771 = vmatprep.mubr.bf16.mxu1 %v4396_v27 }
  0x7f   : > { %1643 = vmatmul.mubr.bf16.gmra.mrb[44].mxu0 %v4455_v15  ;;  %1772 = vmatmul.mubr.bf16.gmra.mrb[44].mxu1 %v4459_v57 }
  0x80   : > { %1876 = vmatprep.mubr.bf16.mxu0 %v4258_v2  ;;  %1779 = vmatprep.mubr.bf16.mxu1 %v4418_v10  ;;  %v890_v2 = vor.u32 %v889_v3, %v770_v23  ;;  %v892_v23 = vor.u32 %v891_v30, %v777_v9  ;;  %v579_v9 = vmul.f32 %v4508_v32, %v2999_v8  ;;  %v3746_v3 = vld [vmem:[%s5046_s3 + $0x230] sm:$0xff]   ;;  %v4550_v8 = vsel %vm4166_vm5, %v4335_v31, 0 }
  0x82   : > { %v4503_v56 = vsel %vm4166_vm5, %v892_v23, 0  ;;  %v621_v39 = vadd.f32 %v4384_v46, %v579_v9  ;;  %v4573_v9 = vsel %vm4166_vm5, %v4376_v29, 0 }
  0x87   : > { %1877 = vmatmul.mubr.bf16.vlgmr.msra.gmra.mrb[48].mxu0 %v3965_v18  ;;  %1780 = vmatmul.mubr.bf16.gmra.mrb[48].mxu1 %v4471_v60  ;;  %v4488_v18 = vsel %vm4166_vm5, %v890_v2, 0  ;;  %v657_v2 = vmax.f32 %v621_v39, 0.0 }
  0x88   : > { %3589 = vmatpush3.bf16.msra.mxu0 %v4248_v55  ;;  %1787 = vmatprep.mubr.bf16.mxu1 %v4438_v7  ;;  %v3742_v55 = vld [vmem:[%s5046_s3 + $0x218] sm:$0xff]  }
  0x89   : > { %1884 = vmatprep.mubr.bf16.mxu0 %v4303_v62  ;;  %3590 = vmatprep.subr.bf16.mxu0 %v3736_v16 }
  0x8c   : > { %3591 = vmatpush3.bf16.msra.mxu0 %v3736_v16  ;;  %v4526_v16 = vsel %vm4166_vm5, %v894_v35, 0 }
  0x8d   : > { %3592 = vmatprep.subr.bf16.mxu0 %v3739_v14 }
  0x8f   : > { %1885 = vmatmul.mubr.bf16.gmra.mrb[52].mxu0 %v4033_v6  ;;  %1788 = vmatmul.mubr.bf16.gmra.mrb[52].mxu1 %v4488_v18 }
  0x90   : > { %1892 = vmatprep.mubr.bf16.mxu0 %v4339_v37  ;;  %1795 = vmatprep.mubr.bf16.mxu1 %v4455_v15 }
  0x91   : > { %3593 = vmatpush3.bf16.msra.mxu0 %v3739_v14  ;;  %v658_v14 = vmax.f32 %v622_v17, 0.0 }
  0x92   : > { %3594 = vmatprep.subr.bf16.mxu0 %v3742_v55 }
  0x93   : > { %v677_v30 = vpack.c.bf16 %v658_v14, %v657_v2 }
  0x95   : > { %3595 = vmatpush3.bf16.msra.mxu0 %v3742_v55  ;;  %v4538_v55 = vsel %vm4166_vm5, %v4331_v33, 0  ;;  %v4540_v48 = vmul.bf16 1.0|1.0, %v677_v30 }
  0x96   : > { %3596 = vmatprep.subr.bf16.mxu0 %v3744_v19 }
  0x97   : > { %1893 = vmatmul.mubr.bf16.gmra.mrb[56].mxu0 %v4075_v43  ;;  %1796 = vmatmul.mubr.bf16.gmra.mrb[56].mxu1 %v4503_v56  ;;  %v819_v23 = vshrl.u32 %v4540_v48, 16  ;;  %v822_v45 = vshll.u32 %v4540_v48, 16 }
  0x98   : > { %1900 = vmatprep.mubr.bf16.mxu0 %v4405_v4  ;;  %1803 = vmatprep.mubr.bf16.mxu1 %v3980_v26 }
  0x99   : > { %3597 = vmatpush3.bf16.msra.mxu0 %v3744_v19  ;;  %v821_v33 = vrot.slane %v819_v23, 7 }
  0x9a   : > { %3598 = vmatprep.subr.bf16.mxu0 %v3745_v28 }
  0x9b   : > { %v824_v19 = vor.u32 %v822_v45, %v821_v33 }
  0x9d   : > { %3599 = vmatpush3.bf16.msra.mxu0 %v3745_v28  ;;  %v4564_v31 = vsel %vm3944_vm2, 0, %v824_v19 }
  0x9e   : > { %3600 = vmatprep.subr.bf16.mxu0 %v3746_v3 }
  0x9f   : > { %1901 = vmatmul.mubr.bf16.gmra.mrb[60].mxu0 %v4147_v47  ;;  %1804 = vmatmul.mubr.bf16.gmra.mrb[60].mxu1 %v4526_v16 }
  0xa0   : > { %1908 = vmatprep.mubr.bf16.mxu0 %v4425_v12  ;;  %1811 = vmatprep.mubr.bf16.mxu1 %v4031_v5 }
  0xa1   : > { %3601 = vmatpush3.bf16.msra.mxu0 %v3746_v3 }
  0xa2   : > { %3602 = vmatprep.subr.bf16.mxu0 %v3747_v54 }
  0xa5   : > { %3603 = vmatpush3.bf16.msra.mxu0 %v3747_v54 }
  0xa7   : > { %1909 = vmatmul.mubr.bf16.gmra.mrb[64].mxu0 %v4185_v36  ;;  %1812 = vmatmul.mubr.bf16.gmra.mrb[64].mxu1 %v4538_v55 }
  0xa8   : > { %1916 = vmatprep.mubr.bf16.mxu0 %v4443_v59  ;;  %1819 = vmatprep.mubr.bf16.mxu1 %v4097_v61 }
  0xaf   : > { %1917 = vmatmul.mubr.bf16.gmra.mrb[68].mxu0 %v4203_v50  ;;  %1820 = vmatmul.mubr.bf16.gmra.mrb[68].mxu1 %v4550_v8 }
  0xb0   : > { %1924 = vmatprep.mubr.bf16.mxu0 %v4459_v57  ;;  %1827 = vmatprep.mubr.bf16.mxu1 %v4152_v51 }
  0xb7   : > { %1925 = vmatmul.mubr.bf16.gmra.mrb[72].mxu0 %v4238_v0  ;;  %1828 = vmatmul.mubr.bf16.gmra.mrb[72].mxu1 %v4560_v25 }
  0xb8   : > { %1932 = vmatprep.mubr.bf16.mxu0 %v4471_v60  ;;  %1835 = vmatprep.mubr.bf16.mxu1 %v4564_v31 }
  0xbf   : > { %1933 = vmatmul.mubr.bf16.gmra.mrb[76].mxu0 %v4286_v34  ;;  %1836 = vmatmul.mubr.bf16.gmra.mrb[76].mxu1 %v4573_v9 }
  0xc0   : > { %1940 = vmatprep.mubr.bf16.mxu0 %v4488_v18  ;;  %2037 = vmatprep.mubr.bf16.mxu1 %v4033_v6  ;;  %v903_v6 = vrot.slane %v822_v45, 1 }
  0xc7   : > { %1941 = vmatmul.mubr.bf16.gmra.mrb[80].mxu0 %v4356_v44  ;;  %2038 = vmatmul.mubr.bf16.vlgmr.msra.gmra.mrb[80].mxu1 %v4087_v52 }
  0xc8   : > { %1948 = vmatprep.mubr.bf16.mxu0 %v4503_v56  ;;  %2045 = vmatprep.mubr.bf16.mxu1 %v4075_v43  ;;  %v904_v43 = vor.u32 %v903_v6, %v819_v23 }
  0xca   : > { %v4605_v52 = vsel %vm4166_vm5, %v904_v43, 0 }
  0xcf   : > { %1949 = vmatmul.mubr.bf16.gmra.mrb[84].mxu0 %v4401_v41  ;;  %2046 = vmatmul.mubr.bf16.gmra.mrb[84].mxu1 %v4135_v40 }
  0xd0   : > { %1956 = vmatprep.mubr.bf16.mxu0 %v4526_v16  ;;  %2053 = vmatprep.mubr.bf16.mxu1 %v4147_v47 }
  0xd7   : > { %1957 = vmatmul.mubr.bf16.gmra.mrb[88].mxu0 %v4421_v24  ;;  %2054 = vmatmul.mubr.bf16.gmra.mrb[88].mxu1 %v4208_v1 }
  0xd8   : > { %1964 = vmatprep.mubr.bf16.mxu0 %v4538_v55  ;;  %2061 = vmatprep.mubr.bf16.mxu1 %v4185_v36 }
  0xdf   : > { %1965 = vmatmul.mubr.bf16.gmra.mrb[92].mxu0 %v3922_v49  ;;  %2062 = vmatmul.mubr.bf16.gmra.mrb[92].mxu1 %v4252_v42 }
  0xe0   : > { %1972 = vmatprep.mubr.bf16.mxu0 %v4550_v8  ;;  %2069 = vmatprep.mubr.bf16.mxu1 %v4203_v50 }
  0xe7   : > { %1973 = vmatmul.mubr.bf16.gmra.mrb[96].mxu0 %v3971_v22  ;;  %2070 = vmatmul.mubr.bf16.gmra.mrb[96].mxu1 %v4293_v38 }
  0xe8   : > { %1980 = vmatprep.mubr.bf16.mxu0 %v4560_v25  ;;  %2077 = vmatprep.mubr.bf16.mxu1 %v4238_v0 }
  0xef   : > { %1981 = vmatmul.mubr.bf16.gmra.mrb[100].mxu0 %v4044_v11  ;;  %2078 = vmatmul.mubr.bf16.gmra.mrb[100].mxu1 %v4349_v58 }
  0xf0   : > { %1988 = vmatprep.mubr.bf16.mxu0 %v4573_v9  ;;  %2085 = vmatprep.mubr.bf16.mxu1 %v4286_v34 }
  0xf7   : > { %1989 = vmatmul.mubr.bf16.gmra.mrb[104].mxu0 %v4089_v53  ;;  %2086 = vmatmul.mubr.bf16.gmra.mrb[104].mxu1 %v4396_v27 }
  0xf8   : > { %1996 = vmatprep.mubr.bf16.mxu0 %v4605_v52  ;;  %2093 = vmatprep.mubr.bf16.mxu1 %v4356_v44 }
  0xfa   : > { %v3132_v40 = vpop.f32.mrb[0].mxu0  ;;  %v3204_v47 = vpop.f32.mrb[0].mxu1 }
  0xfb   : > { %v3133_v36 = vpop.f32.mrb[1].mxu0  ;;  %v3205_v1 = vpop.f32.mrb[1].mxu1 }
  0xfc   : > { %v4611_v50 = vadd.f32 %v3133_v36, %v3132_v40  ;;  %v3135_v0 = vpop.f32.mrb[2].mxu0  ;;  %v4613_v42 = vadd.f32 %v3205_v1, %v3204_v47  ;;  %v3207_v34 = vpop.f32.mrb[2].mxu1 }
  0xfd   : > { %v3136_v38 = vpop.f32.mrb[3].mxu0  ;;  %v3208_v20 = vpop.f32.mrb[3].mxu1 }
  0xfe   : > { %v4615_v58 = vadd.f32 %v3136_v38, %v3135_v0  ;;  %v4617_v29 = vadd.f32 %v3208_v20, %v3207_v34 }
  0xff   : > { %1997 = vmatmul.mubr.bf16.gmra.mrb[108].mxu0 %v4540_v48  ;;  %2094 = vmatmul.mubr.bf16.gmra.mrb[108].mxu1 %v4418_v10 }
 0x100   : > { %3604 = vmatprep.mubr.bf16.mxu0 %v4303_v62  ;;  %2101 = vmatprep.mubr.bf16.mxu1 %v4401_v41 }
 0x102   : > { %v3138_v44 = vpop.f32.mrb[4].mxu0  ;;  %v3210_v27 = vpop.f32.mrb[4].mxu1 }
 0x103   : > { %v3139_v21 = vpop.f32.mrb[5].mxu0  ;;  %v3211_v35 = vpop.f32.mrb[5].mxu1 }
 0x104   : > { %v4623_v28 = vadd.f32 %v3139_v21, %v3138_v44  ;;  %v3141_v39 = vpop.f32.mrb[6].mxu0  ;;  %v4625_v17 = vadd.f32 %v3211_v35, %v3210_v27  ;;  %v3213_v3 = vpop.f32.mrb[6].mxu1 }
 0x105   : > { %v3142_v2 = vpop.f32.mrb[7].mxu0  ;;  %v3214_v54 = vpop.f32.mrb[7].mxu1 }
 0x106   : > { %v4627_v14 = vadd.f32 %v3142_v2, %v3141_v39  ;;  %v4629_v30 = vadd.f32 %v3214_v54, %v3213_v3 }
 0x107   : > { %3605 = vmatmul.mubr.bf16.vlgmr.msra.gmra.mrb[112].mxu0 %v4339_v37  ;;  %2102 = vmatmul.mubr.bf16.gmra.mrb[112].mxu1 %v4438_v7 }
 0x108   : > { %3608 = vmatprep.mubr.bf16.mxu0 %v4405_v4  ;;  %2109 = vmatprep.mubr.bf16.mxu1 %v4421_v24 }
 0x10a   : > { %v3144_v62 = vpop.f32.mrb[8].mxu0  ;;  %v3216_v41 = vpop.f32.mrb[8].mxu1 }
 0x10b   : > { %v3145_v10 = vpop.f32.mrb[9].mxu0  ;;  %v3217_v33 = vpop.f32.mrb[9].mxu1 }
 0x10c   : > { %v4635_v23 = vadd.f32 %v3145_v10, %v3144_v62  ;;  %v3147_v45 = vpop.f32.mrb[10].mxu0  ;;  %v4637_v19 = vadd.f32 %v3217_v33, %v3216_v41  ;;  %v3219_v6 = vpop.f32.mrb[10].mxu1 }
 0x10d   : > { %v3148_v43 = vpop.f32.mrb[11].mxu0  ;;  %v3220_v37 = vpop.f32.mrb[11].mxu1 }
 0x10e   : > { %v4639_v40 = vadd.f32 %v3148_v43, %v3147_v45  ;;  %v4641_v7 = vadd.f32 %v3220_v37, %v3219_v6 }
 0x10f   : > { %3609 = vmatmul.mubr.bf16.gmra.mrb[116].mxu0 %v4425_v12  ;;  %2110 = vmatmul.mubr.bf16.gmra.mrb[116].mxu1 %v4455_v15  ;;  %v3002_v15 = vld [vmem:[%s443_s11] sm:$0xff]  }
 0x110   : > { %3612 = vmatprep.mubr.bf16.mxu0 %v4443_v59  ;;  %2117 = vmatprep.mubr.bf16.mxu1 %v3922_v49  ;;  %v3003_v44 = vunpack.c.l.bf16 %v3002_v15  ;;  %v3004_v27 = vunpack.c.h.bf16 %v3002_v15 }
 0x112   : > { %v3150_v4 = vpop.f32.mrb[12].mxu0  ;;  %v3222_v24 = vpop.f32.mrb[12].mxu1  ;;  %v581_v62 = vmul.f32 %v4508_v32, %v3003_v44  ;;  %v582_v41 = vmul.f32 %v4508_v32, %v3004_v27 }
 0x113   : > { %v3151_v47 = vpop.f32.mrb[13].mxu0  ;;  %v3223_v1 = vpop.f32.mrb[13].mxu1 }
 0x114   : > { %v4651_v36 = vadd.f32 %v3151_v47, %v3150_v4  ;;  %v3153_v0 = vpop.f32.mrb[14].mxu0  ;;  %v4653_v34 = vadd.f32 %v3223_v1, %v3222_v24  ;;  %v3225_v12 = vpop.f32.mrb[14].mxu1  ;;  %v623_v6 = vadd.f32 %v4384_v46, %v581_v62  ;;  %v624_v32 = vadd.f32 %v4384_v46, %v582_v41 }
 0x115   : > { %v3154_v38 = vpop.f32.mrb[15].mxu0  ;;  %v3226_v59 = vpop.f32.mrb[15].mxu1 }
 0x116   : > { %v4655_v20 = vadd.f32 %v3154_v38, %v3153_v0  ;;  %v4657_v49 = vadd.f32 %v3226_v59, %v3225_v12  ;;  %v659_v1 = vmax.f32 %v623_v6, 0.0 }
 0x117   : > { %3613 = vmatmul.mubr.bf16.gmra.mrb[120].mxu0 %v4459_v57  ;;  %2118 = vmatmul.mubr.bf16.gmra.mrb[120].mxu1 %v3980_v26 }
 0x118   : > { %3616 = vmatprep.mubr.bf16.mxu0 %v4471_v60  ;;  %2125 = vmatprep.mubr.bf16.mxu1 %v3971_v22 }
 0x11a   : > { %v3156_v21 = vpop.f32.mrb[16].mxu0  ;;  %v3244_v35 = vpop.f32.mrb[16].mxu1 }
 0x11b   : > { %v3157_v39 = vpop.f32.mrb[17].mxu0  ;;  %v3245_v2 = vpop.f32.mrb[17].mxu1 }
 0x11c   : > { %v4663_v3 = vadd.f32 %v3157_v39, %v3156_v21  ;;  %v3159_v54 = vpop.f32.mrb[18].mxu0  ;;  %v3246_v57 = vadd.f32 %v3245_v2, %v3244_v35  ;;  %v3247_v10 = vpop.f32.mrb[18].mxu1 }
 0x11d   : > { %v3160_v26 = vpop.f32.mrb[19].mxu0  ;;  %v3248_v60 = vpop.f32.mrb[19].mxu1 }
 0x11e   : > { %v4667_v33 = vadd.f32 %v3160_v26, %v3159_v54  ;;  %v4670_v45 = vadd.f32 %v3246_v57, %v4611_v50  ;;  %v3249_v22 = vadd.f32 %v3248_v60, %v3247_v10 }
 0x11f   : > { %3617 = vmatmul.mubr.bf16.gmra.mrb[124].mxu0 %v4488_v18  ;;  %2126 = vmatmul.mubr.bf16.gmra.mrb[124].mxu1 %v4031_v5  ;;  %v660_v5 = vmax.f32 %v624_v32, 0.0 }
 0x120   : > { %3620 = vmatprep.mubr.bf16.mxu0 %v4503_v56  ;;  %v4678_v43 = vadd.f32 %v3249_v22, %v4615_v58  ;;  %2133 = vmatprep.mubr.bf16.mxu1 %v4044_v11 }
 0x121   : > { %v678_v11 = vpack.c.bf16 %v660_v5, %v659_v1 }
 0x122   : > { %v3162_v37 = vpop.f32.mrb[20].mxu0  ;;  %v3250_v4 = vpop.f32.mrb[20].mxu1 }
 0x123   : > { %v3163_v50 = vpop.f32.mrb[21].mxu0  ;;  %v3251_v47 = vpop.f32.mrb[21].mxu1  ;;  %v705_v2 = vmul.bf16 0.0|0.0, %v678_v11 }
 0x124   : > { %v4681_v24 = vadd.f32 %v3163_v50, %v3162_v37  ;;  %v3165_v18 = vpop.f32.mrb[22].mxu0  ;;  %v3252_v0 = vadd.f32 %v3251_v47, %v3250_v4  ;;  %v3253_v56 = vpop.f32.mrb[22].mxu1 }
 0x125   : > { %v3166_v12 = vpop.f32.mrb[23].mxu0  ;;  %v3254_v46 = vpop.f32.mrb[23].mxu1  ;;  %v826_v10 = vshrl.u32 %v705_v2, 16 }
 0x126   : > { %v4683_v38 = vadd.f32 %v3166_v12, %v3165_v18  ;;  %v4686_v58 = vadd.f32 %v3252_v0, %v4623_v28  ;;  %v3255_v15 = vadd.f32 %v3254_v46, %v3253_v56 }
 0x127   : > { %3621 = vmatmul.mubr.bf16.gmra.mrb[128].mxu0 %v4526_v16  ;;  %2134 = vmatmul.mubr.bf16.gmra.mrb[128].mxu1 %v4097_v61  ;;  %v828_v50 = vrot.slane %v826_v10, 7 }
 0x128   : > { %3624 = vmatprep.mubr.bf16.mxu0 %v4538_v55  ;;  %v4692_v59 = vadd.f32 %v3255_v15, %v4627_v14  ;;  %2141 = vmatprep.mubr.bf16.mxu1 %v4089_v53  ;;  %v829_v53 = vshll.u32 %v705_v2, 16 }
 0x12a   : > { %v3168_v44 = vpop.f32.mrb[24].mxu0  ;;  %v3256_v27 = vpop.f32.mrb[24].mxu1  ;;  %v905_v37 = vrot.slane %v829_v53, 1  ;;  %v831_v5 = vor.u32 %v829_v53, %v828_v50 }
 0x12b   : > { %v3169_v21 = vpop.f32.mrb[25].mxu0  ;;  %v3257_v28 = vpop.f32.mrb[25].mxu1 }
 0x12c   : > { %v4695_v35 = vadd.f32 %v3169_v21, %v3168_v44  ;;  %v3171_v39 = vpop.f32.mrb[26].mxu0  ;;  %v3258_v54 = vadd.f32 %v3257_v28, %v3256_v27  ;;  %v3259_v16 = vpop.f32.mrb[26].mxu1  ;;  %v906_v18 = vor.u32 %v905_v37, %v826_v10 }
 0x12d   : > { %v3172_v62 = vpop.f32.mrb[27].mxu0  ;;  %v3260_v55 = vpop.f32.mrb[27].mxu1 }
 0x12e   : > { %v4697_v61 = vadd.f32 %v3172_v62, %v3171_v39  ;;  %v4700_v41 = vadd.f32 %v3258_v54, %v4635_v23  ;;  %v3261_v14 = vadd.f32 %v3260_v55, %v3259_v16 }
 0x12f   : > { %3625 = vmatmul.mubr.bf16.gmra.mrb[132].mxu0 %v4550_v8  ;;  %2142 = vmatmul.mubr.bf16.gmra.mrb[132].mxu1 %v4152_v51 }
 0x130   : > { %3628 = vmatprep.mubr.bf16.mxu0 %v4560_v25  ;;  %v4706_v57 = vadd.f32 %v3261_v14, %v4639_v40  ;;  %2149 = vmatprep.mubr.bf16.mxu1 %v4540_v48 }
 0x132   : > { %v3174_v26 = vpop.f32.mrb[28].mxu0  ;;  %v3262_v60 = vpop.f32.mrb[28].mxu1 }
 0x133   : > { %v3175_v22 = vpop.f32.mrb[29].mxu0  ;;  %v3263_v23 = vpop.f32.mrb[29].mxu1 }
 0x134   : > { %v4709_v6 = vadd.f32 %v3175_v22, %v3174_v26  ;;  %v3177_v32 = vpop.f32.mrb[30].mxu0  ;;  %v3264_v8 = vadd.f32 %v3263_v23, %v3262_v60  ;;  %v3265_v4 = vpop.f32.mrb[30].mxu1 }
 0x135   : > { %v3178_v51 = vpop.f32.mrb[31].mxu0  ;;  %v3266_v47 = vpop.f32.mrb[31].mxu1 }
 0x136   : > { %v4711_v25 = vadd.f32 %v3178_v51, %v3177_v32  ;;  %v4714_v40 = vadd.f32 %v3264_v8, %v4651_v36  ;;  %v3267_v48 = vadd.f32 %v3266_v47, %v3265_v4 }
 0x137   : > { %3629 = vmatmul.mubr.bf16.gmra.mrb[136].mxu0 %v4573_v9  ;;  %2150 = vmatmul.mubr.bf16.gmra.mrb[136].mxu1 %v4564_v31  ;;  %v945_v9 = vsel %vm4166_vm5, %v906_v18, 0 }
 0x138   : > { %3632 = vmatprep.mubr.bf16.mxu0 %v4605_v52  ;;  %v4720_v1 = vadd.f32 %v3267_v48, %v4655_v20  ;;  %2157 = vmatprep.mubr.bf16.mxu1 %v705_v2  ;;  %v870_v52 = vsel %vm3944_vm2, 0, %v831_v5 }
 0x13a   : > { %v3180_v0 = vpop.f32.mrb[32].mxu0  ;;  %v3268_v56 = vpop.f32.mrb[32].mxu1 }
 0x13b   : > { %v3181_v12 = vpop.f32.mrb[33].mxu0  ;;  %v3269_v36 = vpop.f32.mrb[33].mxu1 }
 0x13c   : > { %v4722_v46 = vadd.f32 %v3181_v12, %v3180_v0  ;;  %v3183_v15 = vpop.f32.mrb[34].mxu0  ;;  %v3270_v11 = vadd.f32 %v3269_v36, %v3268_v56  ;;  %v3271_v31 = vpop.f32.mrb[34].mxu1 }
 0x13d   : > { %v3184_v44 = vpop.f32.mrb[35].mxu0  ;;  %v3272_v27 = vpop.f32.mrb[35].mxu1 }
 0x13e   : > { %v4728_v20 = vadd.f32 %v3184_v44, %v3183_v15  ;;  %v4731_v21 = vadd.f32 %v3270_v11, %v4663_v3  ;;  %v3273_v28 = vadd.f32 %v3272_v27, %v3271_v31 }
 0x13f   : > { %3633 = vmatmul.mubr.bf16.gmra.mrb[140].mxu0 %v945_v9  ;;  %2158 = vmatmul.mubr.bf16.gmra.mrb[140].mxu1 %v870_v52 }
 0x140   : > { %v4734_v39 = vadd.f32 %v3273_v28, %v4667_v33 }
 0x142   : > { %v3186_v13 = vpop.f32.mrb[36].mxu0  ;;  %v3274_v2 = vpop.f32.mrb[36].mxu1 }
 0x143   : > { %v3187_v54 = vpop.f32.mrb[37].mxu0  ;;  %v3275_v62 = vpop.f32.mrb[37].mxu1 }
 0x144   : > { %v4736_v16 = vadd.f32 %v3187_v54, %v3186_v13  ;;  %v3189_v63 = vpop.f32.mrb[38].mxu0  ;;  %v3276_v55 = vadd.f32 %v3275_v62, %v3274_v2  ;;  %v3277_v14 = vpop.f32.mrb[38].mxu1 }
 0x145   : > { %v3190_v53 = vpop.f32.mrb[39].mxu0  ;;  %v3278_v3 = vpop.f32.mrb[39].mxu1 }
 0x146   : > { %v4738_v10 = vadd.f32 %v3190_v53, %v3189_v63  ;;  %v4741_v26 = vadd.f32 %v3276_v55, %v4681_v24  ;;  %v3279_v60 = vadd.f32 %v3278_v3, %v3277_v14 }
 0x148   : > { %v4744_v33 = vadd.f32 %v3279_v60, %v4683_v38 }
 0x14a   : > { %v3192_v22 = vpop.f32.mrb[40].mxu0  ;;  %v3280_v23 = vpop.f32.mrb[40].mxu1 }
 0x14b   : > { %v3193_v32 = vpop.f32.mrb[41].mxu0  ;;  %v3281_v8 = vpop.f32.mrb[41].mxu1 }
 0x14c   : > { %v4746_v37 = vadd.f32 %v3193_v32, %v3192_v22  ;;  %v3195_v4 = vpop.f32.mrb[42].mxu0  ;;  %v3282_v51 = vadd.f32 %v3281_v8, %v3280_v23  ;;  %v3283_v50 = vpop.f32.mrb[42].mxu1 }
 0x14d   : > { %v3196_v47 = vpop.f32.mrb[43].mxu0  ;;  %v3284_v18 = vpop.f32.mrb[43].mxu1 }
 0x14e   : > { %v4748_v48 = vadd.f32 %v3196_v47, %v3195_v4  ;;  %v4751_v24 = vadd.f32 %v3282_v51, %v4695_v35  ;;  %v3285_v5 = vadd.f32 %v3284_v18, %v3283_v50 }
 0x150   : > { %v4754_v38 = vadd.f32 %v3285_v5, %v4697_v61 }
 0x152   : > { %v3198_v0 = vpop.f32.mrb[44].mxu0  ;;  %v3286_v56 = vpop.f32.mrb[44].mxu1 }
 0x153   : > { %v3199_v12 = vpop.f32.mrb[45].mxu0  ;;  %v3287_v15 = vpop.f32.mrb[45].mxu1 }
 0x154   : > { %v4756_v36 = vadd.f32 %v3199_v12, %v3198_v0  ;;  %v3201_v9 = vpop.f32.mrb[46].mxu0  ;;  %v3288_v11 = vadd.f32 %v3287_v15, %v3286_v56  ;;  %v3289_v31 = vpop.f32.mrb[46].mxu1 }
 0x155   : > { %v3202_v44 = vpop.f32.mrb[47].mxu0  ;;  %v3290_v27 = vpop.f32.mrb[47].mxu1 }
 0x156   : > { %v4758_v52 = vadd.f32 %v3202_v44, %v3201_v9  ;;  %v4761_v35 = vadd.f32 %v3288_v11, %v4709_v6  ;;  %v3291_v28 = vadd.f32 %v3290_v27, %v3289_v31 }
 0x158   : > { %v4764_v61 = vadd.f32 %v3291_v28, %v4711_v25 }
 0x15a   : > { %v3356_v13 = vpop.f32.mrb[48].mxu0  ;;  %v3292_v2 = vpop.f32.mrb[48].mxu1 }
 0x15b   : > { %v3357_v54 = vpop.f32.mrb[49].mxu0  ;;  %v3293_v62 = vpop.f32.mrb[49].mxu1 }
 0x15c   : > { %v3358_v63 = vadd.f32 %v3357_v54, %v3356_v13  ;;  %v3359_v55 = vpop.f32.mrb[50].mxu0  ;;  %v3294_v14 = vadd.f32 %v3293_v62, %v3292_v2  ;;  %v3295_v53 = vpop.f32.mrb[50].mxu1 }
 0x15d   : > { %v3360_v3 = vpop.f32.mrb[51].mxu0  ;;  %v3296_v22 = vpop.f32.mrb[51].mxu1 }
 0x15e   : > { %v4767_v60 = vadd.f32 %v3358_v63, %v4670_v45  ;;  %v3361_v23 = vadd.f32 %v3360_v3, %v3359_v55  ;;  %v4770_v6 = vadd.f32 %v3294_v14, %v4722_v46  ;;  %v3297_v32 = vadd.f32 %v3296_v22, %v3295_v53 }
 0x160   : > { %v4773_v25 = vadd.f32 %v3361_v23, %v4678_v43  ;;  %v4776_v8 = vadd.f32 %v3297_v32, %v4728_v20 }
 0x162   : > { %v3362_v4 = vpop.f32.mrb[52].mxu0  ;;  %v3298_v51 = vpop.f32.mrb[52].mxu1 }
 0x163   : > { %v3363_v50 = vpop.f32.mrb[53].mxu0  ;;  %v3299_v47 = vpop.f32.mrb[53].mxu1 }
 0x164   : > { %v3364_v18 = vadd.f32 %v3363_v50, %v3362_v4  ;;  %v3365_v5 = vpop.f32.mrb[54].mxu0  ;;  %v3300_v45 = vadd.f32 %v3299_v47, %v3298_v51  ;;  %v3301_v0 = vpop.f32.mrb[54].mxu1 }
 0x165   : > { %v3366_v56 = vpop.f32.mrb[55].mxu0  ;;  %v3302_v46 = vpop.f32.mrb[55].mxu1 }
 0x166   : > { %v4779_v12 = vadd.f32 %v3364_v18, %v4686_v58  ;;  %v3367_v15 = vadd.f32 %v3366_v56, %v3365_v5  ;;  %v4782_v43 = vadd.f32 %v3300_v45, %v4736_v16  ;;  %v3303_v9 = vadd.f32 %v3302_v46, %v3301_v0 }
 0x168   : > { %v4785_v20 = vadd.f32 %v3367_v15, %v4692_v59  ;;  %v4788_v11 = vadd.f32 %v3303_v9, %v4738_v10 }
 0x16a   : > { %v3368_v31 = vpop.f32.mrb[56].mxu0  ;;  %v3304_v44 = vpop.f32.mrb[56].mxu1 }
 0x16b   : > { %v3369_v27 = vpop.f32.mrb[57].mxu0  ;;  %v3305_v28 = vpop.f32.mrb[57].mxu1 }
 0x16c   : > { %v3370_v13 = vadd.f32 %v3369_v27, %v3368_v31  ;;  %v3371_v2 = vpop.f32.mrb[58].mxu0  ;;  %v3306_v58 = vadd.f32 %v3305_v28, %v3304_v44  ;;  %v3307_v54 = vpop.f32.mrb[58].mxu1 }
 0x16d   : > { %v3372_v62 = vpop.f32.mrb[59].mxu0  ;;  %v3308_v16 = vpop.f32.mrb[59].mxu1 }
 0x16e   : > { %v4791_v63 = vadd.f32 %v3370_v13, %v4700_v41  ;;  %v3373_v55 = vadd.f32 %v3372_v62, %v3371_v2  ;;  %v4794_v59 = vadd.f32 %v3306_v58, %v4746_v37  ;;  %v3309_v14 = vadd.f32 %v3308_v16, %v3307_v54 }
 0x170   : > { %v4797_v10 = vadd.f32 %v3373_v55, %v4706_v57  ;;  %v4800_v53 = vadd.f32 %v3309_v14, %v4748_v48 }
 0x172   : > { %v3374_v3 = vpop.f32.mrb[60].mxu0  ;;  %v3310_v22 = vpop.f32.mrb[60].mxu1 }
 0x173   : > { %v3375_v23 = vpop.f32.mrb[61].mxu0  ;;  %v3311_v32 = vpop.f32.mrb[61].mxu1 }
 0x174   : > { %v3376_v4 = vadd.f32 %v3375_v23, %v3374_v3  ;;  %v3377_v51 = vpop.f32.mrb[62].mxu0  ;;  %v3312_v41 = vadd.f32 %v3311_v32, %v3310_v22  ;;  %v3313_v50 = vpop.f32.mrb[62].mxu1 }
 0x175   : > { %v3378_v47 = vpop.f32.mrb[63].mxu0  ;;  %v3314_v37 = vpop.f32.mrb[63].mxu1 }
 0x176   : > { %v4803_v18 = vadd.f32 %v3376_v4, %v4714_v40  ;;  %v3379_v5 = vadd.f32 %v3378_v47, %v3377_v51  ;;  %v4806_v57 = vadd.f32 %v3312_v41, %v4756_v36  ;;  %v3315_v45 = vadd.f32 %v3314_v37, %v3313_v50 }
 0x178   : > { %v4809_v48 = vadd.f32 %v3379_v5, %v4720_v1  ;;  %v4812_v0 = vadd.f32 %v3315_v45, %v4758_v52 }
 0x17a   : > { %v3380_v56 = vpop.f32.mrb[64].mxu0  ;;  %v3316_v46 = vpop.f32.mrb[64].mxu1 }
 0x17b   : > { %v3381_v15 = vpop.f32.mrb[65].mxu0  ;;  %v3317_v9 = vpop.f32.mrb[65].mxu1 }
 0x17c   : > { %v3382_v31 = vadd.f32 %v3381_v15, %v3380_v56  ;;  %v3383_v44 = vpop.f32.mrb[66].mxu0  ;;  %v3318_v40 = vadd.f32 %v3317_v9, %v3316_v46  ;;  %v3319_v27 = vpop.f32.mrb[66].mxu1 }
 0x17d   : > { %v3384_v28 = vpop.f32.mrb[67].mxu0  ;;  %v3320_v36 = vpop.f32.mrb[67].mxu1 }
 0x17e   : > { %v4815_v13 = vadd.f32 %v3382_v31, %v4731_v21  ;;  %v3385_v2 = vadd.f32 %v3384_v28, %v3383_v44  ;;  %v4818_v1 = vadd.f32 %v3318_v40, %v4613_v42  ;;  %v3321_v58 = vadd.f32 %v3320_v36, %v3319_v27 }
 0x180   : > { %v4821_v52 = vadd.f32 %v3385_v2, %v4734_v39  ;;  %v4824_v54 = vadd.f32 %v3321_v58, %v4617_v29 }
 0x182   : > { %v3386_v62 = vpop.f32.mrb[68].mxu0  ;;  %v3322_v16 = vpop.f32.mrb[68].mxu1 }
 0x183   : > { %v3387_v55 = vpop.f32.mrb[69].mxu0  ;;  %v3323_v14 = vpop.f32.mrb[69].mxu1 }
 0x184   : > { %v3388_v3 = vadd.f32 %v3387_v55, %v3386_v62  ;;  %v3389_v22 = vpop.f32.mrb[70].mxu0  ;;  %v3324_v21 = vadd.f32 %v3323_v14, %v3322_v16  ;;  %v3325_v23 = vpop.f32.mrb[70].mxu1 }
 0x185   : > { %v3390_v32 = vpop.f32.mrb[71].mxu0  ;;  %v3326_v42 = vpop.f32.mrb[71].mxu1 }
 0x186   : > { %v4827_v4 = vadd.f32 %v3388_v3, %v4741_v26  ;;  %v3391_v51 = vadd.f32 %v3390_v32, %v3389_v22  ;;  %v4830_v39 = vadd.f32 %v3324_v21, %v4625_v17  ;;  %v3327_v41 = vadd.f32 %v3326_v42, %v3325_v23 }
 0x188   : > { %v4833_v29 = vadd.f32 %v3391_v51, %v4744_v33  ;;  %v4836_v50 = vadd.f32 %v3327_v41, %v4629_v30 }
 0x18a   : > { %v3392_v47 = vpop.f32.mrb[72].mxu0  ;;  %v3328_v37 = vpop.f32.mrb[72].mxu1 }
 0x18b   : > { %v3393_v5 = vpop.f32.mrb[73].mxu0  ;;  %v3329_v45 = vpop.f32.mrb[73].mxu1 }
 0x18c   : > { %v3394_v56 = vadd.f32 %v3393_v5, %v3392_v47  ;;  %v3395_v46 = vpop.f32.mrb[74].mxu0  ;;  %v3330_v26 = vadd.f32 %v3329_v45, %v3328_v37  ;;  %v3331_v15 = vpop.f32.mrb[74].mxu1 }
 0x18d   : > { %v3396_v9 = vpop.f32.mrb[75].mxu0  ;;  %v3332_v17 = vpop.f32.mrb[75].mxu1 }
 0x18e   : > { %v4839_v31 = vadd.f32 %v3394_v56, %v4751_v24  ;;  %v3397_v44 = vadd.f32 %v3396_v9, %v3395_v46  ;;  %v4842_v33 = vadd.f32 %v3330_v26, %v4637_v19  ;;  %v3333_v40 = vadd.f32 %v3332_v17, %v3331_v15 }
 0x190   : > { %v4845_v30 = vadd.f32 %v3397_v44, %v4754_v38  ;;  %v4848_v27 = vadd.f32 %v3333_v40, %v4641_v7 }
 0x192   : > { %v3398_v28 = vpop.f32.mrb[76].mxu0  ;;  %v3334_v36 = vpop.f32.mrb[76].mxu1 }
 0x193   : > { %v3399_v2 = vpop.f32.mrb[77].mxu0  ;;  %v3335_v58 = vpop.f32.mrb[77].mxu1 }
 0x194   : > { %v3400_v62 = vadd.f32 %v3399_v2, %v3398_v28  ;;  %v3401_v16 = vpop.f32.mrb[78].mxu0  ;;  %v3336_v24 = vadd.f32 %v3335_v58, %v3334_v36  ;;  %v3337_v55 = vpop.f32.mrb[78].mxu1 }
 0x195   : > { %v3402_v14 = vpop.f32.mrb[79].mxu0  ;;  %v3338_v19 = vpop.f32.mrb[79].mxu1 }
 0x196   : > { %v4851_v3 = vadd.f32 %v3400_v62, %v4761_v35  ;;  %v3403_v22 = vadd.f32 %v3402_v14, %v3401_v16  ;;  %v4854_v38 = vadd.f32 %v3336_v24, %v4653_v34  ;;  %v3339_v21 = vadd.f32 %v3338_v19, %v3337_v55 }
 0x198   : > { %v4857_v7 = vadd.f32 %v3403_v22, %v4764_v61  ;;  %v4860_v23 = vadd.f32 %v3339_v21, %v4657_v49 }
 0x19a   : > { %v3404_v32 = vpop.f32.mrb[80].mxu0  ;;  %v3468_v42 = vpop.f32.mrb[80].mxu1 }
 0x19b   : > { %v3405_v51 = vpop.f32.mrb[81].mxu0  ;;  %v3469_v47 = vpop.f32.mrb[81].mxu1 }
 0x19c   : > { %v3406_v41 = vadd.f32 %v3405_v51, %v3404_v32  ;;  %v3407_v37 = vpop.f32.mrb[82].mxu0  ;;  %v3470_v35 = vadd.f32 %v3469_v47, %v3468_v42  ;;  %v3471_v5 = vpop.f32.mrb[82].mxu1 }
 0x19d   : > { %v3408_v45 = vpop.f32.mrb[83].mxu0  ;;  %v3472_v46 = vpop.f32.mrb[83].mxu1 }
 0x19e   : > { %v4863_v56 = vadd.f32 %v3406_v41, %v4770_v6  ;;  %v3409_v34 = vadd.f32 %v3408_v45, %v3407_v37  ;;  %v3473_v26 = vadd.f32 %v3472_v46, %v3471_v5  ;;  %v4866_v61 = vadd.f32 %v3470_v35, %v4767_v60 }
 0x1a0   : > { %v4869_v49 = vadd.f32 %v3409_v34, %v4776_v8  ;;  %v4872_v15 = vadd.f32 %v3473_v26, %v4773_v25 }
 0x1a2   : > { %v3410_v9 = vpop.f32.mrb[84].mxu0  ;;  %v3474_v17 = vpop.f32.mrb[84].mxu1 }
 0x1a3   : > { %v3411_v44 = vpop.f32.mrb[85].mxu0  ;;  %v3475_v28 = vpop.f32.mrb[85].mxu1 }
 0x1a4   : > { %v3412_v40 = vadd.f32 %v3411_v44, %v3410_v9  ;;  %v3413_v36 = vpop.f32.mrb[86].mxu0  ;;  %v3476_v6 = vadd.f32 %v3475_v28, %v3474_v17  ;;  %v3477_v2 = vpop.f32.mrb[86].mxu1 }
 0x1a5   : > { %v3414_v58 = vpop.f32.mrb[87].mxu0  ;;  %v3478_v16 = vpop.f32.mrb[87].mxu1 }
 0x1a6   : > { %v4875_v62 = vadd.f32 %v3412_v40, %v4782_v43  ;;  %v3415_v60 = vadd.f32 %v3414_v58, %v3413_v36  ;;  %v3479_v24 = vadd.f32 %v3478_v16, %v3477_v2  ;;  %v4878_v8 = vadd.f32 %v3476_v6, %v4779_v12 }
 0x1a8   : > { %v4881_v25 = vadd.f32 %v3415_v60, %v4788_v11  ;;  %v4884_v55 = vadd.f32 %v3479_v24, %v4785_v20 }
 0x1aa   : > { %v3416_v14 = vpop.f32.mrb[88].mxu0  ;;  %v3480_v19 = vpop.f32.mrb[88].mxu1 }
 0x1ab   : > { %v3417_v22 = vpop.f32.mrb[89].mxu0  ;;  %v3481_v32 = vpop.f32.mrb[89].mxu1 }
 0x1ac   : > { %v3418_v21 = vadd.f32 %v3417_v22, %v3416_v14  ;;  %v3419_v42 = vpop.f32.mrb[90].mxu0  ;;  %v3482_v43 = vadd.f32 %v3481_v32, %v3480_v19  ;;  %v3483_v51 = vpop.f32.mrb[90].mxu1 }
 0x1ad   : > { %v3420_v41 = vpop.f32.mrb[91].mxu0  ;;  %v3484_v37 = vpop.f32.mrb[91].mxu1 }
 0x1ae   : > { %v4887_v47 = vadd.f32 %v3418_v21, %v4794_v59  ;;  %v3421_v12 = vadd.f32 %v3420_v41, %v3419_v42  ;;  %v3485_v35 = vadd.f32 %v3484_v37, %v3483_v51  ;;  %v4890_v11 = vadd.f32 %v3482_v43, %v4791_v63 }
 0x1b0   : > { %v4893_v20 = vadd.f32 %v3421_v12, %v4800_v53  ;;  %v4896_v5 = vadd.f32 %v3485_v35, %v4797_v10 }
 0x1b2   : > { %v3422_v45 = vpop.f32.mrb[92].mxu0  ;;  %v3486_v34 = vpop.f32.mrb[92].mxu1 }
 0x1b3   : > { %v3423_v46 = vpop.f32.mrb[93].mxu0  ;;  %v3487_v9 = vpop.f32.mrb[93].mxu1 }
 0x1b4   : > { %v3424_v26 = vadd.f32 %v3423_v46, %v3422_v45  ;;  %v3425_v17 = vpop.f32.mrb[94].mxu0  ;;  %v3488_v59 = vadd.f32 %v3487_v9, %v3486_v34  ;;  %v3489_v44 = vpop.f32.mrb[94].mxu1 }
 0x1b5   : > { %v3426_v40 = vpop.f32.mrb[95].mxu0  ;;  %v3490_v36 = vpop.f32.mrb[95].mxu1 }
 0x1b6   : > { %v4899_v28 = vadd.f32 %v3424_v26, %v4806_v57  ;;  %v3427_v63 = vadd.f32 %v3426_v40, %v3425_v17  ;;  %v3491_v6 = vadd.f32 %v3490_v36, %v3489_v44  ;;  %v4902_v53 = vadd.f32 %v3488_v59, %v4803_v18 }
 0x1b8   : > { %v4905_v10 = vadd.f32 %v3427_v63, %v4812_v0  ;;  %v4908_v2 = vadd.f32 %v3491_v6, %v4809_v48 }
 0x1ba   : > { %v3428_v58 = vpop.f32.mrb[96].mxu0  ;;  %v3492_v60 = vpop.f32.mrb[96].mxu1 }
 0x1bb   : > { %v3429_v16 = vpop.f32.mrb[97].mxu0  ;;  %v3493_v14 = vpop.f32.mrb[97].mxu1 }
 0x1bc   : > { %v3430_v24 = vadd.f32 %v3429_v16, %v3428_v58  ;;  %v3431_v19 = vpop.f32.mrb[98].mxu0  ;;  %v3494_v57 = vadd.f32 %v3493_v14, %v3492_v60  ;;  %v3495_v22 = vpop.f32.mrb[98].mxu1 }
 0x1bd   : > { %v3432_v21 = vpop.f32.mrb[99].mxu0  ;;  %v3496_v42 = vpop.f32.mrb[99].mxu1 }
 0x1be   : > { %v4911_v32 = vadd.f32 %v3430_v24, %v4818_v1  ;;  %v3433_v18 = vadd.f32 %v3432_v21, %v3431_v19  ;;  %v3497_v43 = vadd.f32 %v3496_v42, %v3495_v22  ;;  %v4914_v0 = vadd.f32 %v3494_v57, %v4815_v13 }
 0x1c0   : > { %v4917_v48 = vadd.f32 %v3433_v18, %v4824_v54  ;;  %v4920_v51 = vadd.f32 %v3497_v43, %v4821_v52 }
 0x1c2   : > { %v3434_v41 = vpop.f32.mrb[100].mxu0  ;;  %v3498_v12 = vpop.f32.mrb[100].mxu1 }
 0x1c3   : > { %v3435_v37 = vpop.f32.mrb[101].mxu0  ;;  %v3499_v45 = vpop.f32.mrb[101].mxu1 }
 0x1c4   : > { %v3436_v35 = vadd.f32 %v3435_v37, %v3434_v41  ;;  %v3437_v34 = vpop.f32.mrb[102].mxu0  ;;  %v3500_v1 = vadd.f32 %v3499_v45, %v3498_v12  ;;  %v3501_v46 = vpop.f32.mrb[102].mxu1 }
 0x1c5   : > { %v3438_v26 = vpop.f32.mrb[103].mxu0  ;;  %v3502_v17 = vpop.f32.mrb[103].mxu1 }
 0x1c6   : > { %v4923_v9 = vadd.f32 %v3436_v35, %v4830_v39  ;;  %v3439_v13 = vadd.f32 %v3438_v26, %v3437_v34  ;;  %v3503_v59 = vadd.f32 %v3502_v17, %v3501_v46  ;;  %v4926_v54 = vadd.f32 %v3500_v1, %v4827_v4 }
 0x1c8   : > { %v4929_v52 = vadd.f32 %v3439_v13, %v4836_v50  ;;  %v4932_v44 = vadd.f32 %v3503_v59, %v4833_v29 }
 0x1ca   : > { %v3440_v40 = vpop.f32.mrb[104].mxu0  ;;  %v3504_v63 = vpop.f32.mrb[104].mxu1 }
 0x1cb   : > { %v3441_v36 = vpop.f32.mrb[105].mxu0  ;;  %v3505_v58 = vpop.f32.mrb[105].mxu1 }
 0x1cc   : > { %v3442_v6 = vadd.f32 %v3441_v36, %v3440_v40  ;;  %v3443_v60 = vpop.f32.mrb[106].mxu0  ;;  %v3506_v39 = vadd.f32 %v3505_v58, %v3504_v63  ;;  %v3507_v16 = vpop.f32.mrb[106].mxu1 }
 0x1cd   : > { %v3444_v24 = vpop.f32.mrb[107].mxu0  ;;  %v3508_v19 = vpop.f32.mrb[107].mxu1 }
 0x1ce   : > { %v4935_v14 = vadd.f32 %v3442_v6, %v4842_v33  ;;  %v3445_v4 = vadd.f32 %v3444_v24, %v3443_v60  ;;  %v3509_v57 = vadd.f32 %v3508_v19, %v3507_v16  ;;  %v4938_v50 = vadd.f32 %v3506_v39, %v4839_v31 }
 0x1d0   : > { %v4941_v29 = vadd.f32 %v3445_v4, %v4848_v27  ;;  %v4944_v22 = vadd.f32 %v3509_v57, %v4845_v30 }
 0x1d2   : > { %v3446_v21 = vpop.f32.mrb[108].mxu0  ;;  %v3510_v18 = vpop.f32.mrb[108].mxu1 }
 0x1d3   : > { %v3447_v42 = vpop.f32.mrb[109].mxu0  ;;  %v3511_v41 = vpop.f32.mrb[109].mxu1 }
 0x1d4   : > { %v3448_v43 = vadd.f32 %v3447_v42, %v3446_v21  ;;  %v3449_v12 = vpop.f32.mrb[110].mxu0  ;;  %v3512_v33 = vadd.f32 %v3511_v41, %v3510_v18  ;;  %v3513_v37 = vpop.f32.mrb[110].mxu1 }
 0x1d5   : > { %v3450_v35 = vpop.f32.mrb[111].mxu0  ;;  %v3514_v34 = vpop.f32.mrb[111].mxu1 }
 0x1d6   : > { %v4947_v45 = vadd.f32 %v3448_v43, %v4854_v38  ;;  %v3451_v31 = vadd.f32 %v3450_v35, %v3449_v12  ;;  %v3515_v27 = vadd.f32 %v3514_v34, %v3513_v37  ;;  %v4950_v1 = vadd.f32 %v3512_v33, %v4851_v3 }
 0x1d8   : > { %v4953_v30 = vadd.f32 %v3451_v31, %v4860_v23  ;;  %v4956_v46 = vadd.f32 %v3515_v27, %v4857_v7 }
 0x1da   : > { %v3606_v26 = vpop.f32.mrb[112].mxu0  ;;  %v3516_v13 = vpop.f32.mrb[112].mxu1 }
 0x1db   : > { %v2209_v17 = vadd.f32 %v3606_v26, %v4878_v8  ;;  %v2200_v59 = vpop.f32.mrb[113].mxu0  ;;  %v3517_v38 = vpop.f32.mrb[113].mxu1 }
 0x1dc   : > { %v2201_v40 = vadd.f32 %v2200_v59, %v4866_v61  ;;  %v3607_v63 = vpop.f32.mrb[114].mxu0  ;;  %v3518_v36 = vadd.f32 %v3517_v38, %v3516_v13  ;;  %v3519_v6 = vpop.f32.mrb[114].mxu1 }
 0x1dd   : > { %v2212_v3 = vadd.f32 %v3607_v63, %v4884_v55  ;;  %v2203_v58 = vpop.f32.mrb[115].mxu0  ;;  %v3520_v7 = vpop.f32.mrb[115].mxu1  ;;  %v2527_v19 = vmul.f32 %v2209_v17, %v2209_v17 }
 0x1de   : > { %v2204_v23 = vadd.f32 %v2203_v58, %v4872_v15  ;;  %v3521_v60 = vadd.f32 %v3520_v7, %v3519_v6  ;;  %v4969_v61 = vadd.f32 %v3518_v36, %v4863_v56  ;;  %v2525_v39 = vmul.f32 %v2201_v40, %v2201_v40 }
 0x1df   : > { %v3013_v8 = vpack.c.bf16 %v2212_v3, %v2209_v17  ;;  %v2528_v41 = vmul.f32 %v2212_v3, %v2212_v3 }
 0x1e0   : > { %v3008_v16 = vpack.c.bf16 %v2204_v23, %v2201_v40  ;;  %v2487_v24 = vadd.f32 %v2204_v23, %v2201_v40  ;;  %v2526_v55 = vmul.f32 %v2204_v23, %v2204_v23  ;;  %v4973_v4 = vadd.f32 %v3521_v60, %v4869_v49 }
 0x1e1   : > { %3101 = vst [vmem:[%s4965_s14 + $0x8] sm:$0xff] %v3013_v8  }
 0x1e2   : > { %3009 = vst [vmem:[%s4965_s14] sm:$0xff] %v3008_v16   ;;  %v2488_v57 = vadd.f32 %v2487_v24, %v2209_v17  ;;  %v2557_v21 = vadd.f32 %v2526_v55, %v2525_v39  ;;  %v3610_v18 = vpop.f32.mrb[116].mxu0  ;;  %v3522_v42 = vpop.f32.mrb[116].mxu1 }
 0x1e3   : > { %v2225_v15 = vadd.f32 %v3610_v18, %v4902_v53  ;;  %v2216_v43 = vpop.f32.mrb[117].mxu0  ;;  %v3523_v12 = vpop.f32.mrb[117].mxu1 }
 0x1e4   : > { %v2558_v56 = vadd.f32 %v2557_v21, %v2527_v19  ;;  %v2217_v33 = vadd.f32 %v2216_v43, %v4890_v11  ;;  %v2489_v37 = vadd.f32 %v2488_v57, %v2212_v3  ;;  %v3611_v35 = vpop.f32.mrb[118].mxu0  ;;  %v3524_v31 = vadd.f32 %v3523_v12, %v3522_v42  ;;  %v3525_v49 = vpop.f32.mrb[118].mxu1 }
 0x1e5   : > { %v2228_v34 = vadd.f32 %v3611_v35, %v4908_v2  ;;  %v2219_v27 = vpop.f32.mrb[119].mxu0  ;;  %v3526_v59 = vpop.f32.mrb[119].mxu1  ;;  %v2531_v58 = vmul.f32 %v2225_v15, %v2225_v15 }
 0x1e6   : > { %v2490_v26 = vadd.f32 %v2489_v37, %v2217_v33  ;;  %v2529_v13 = vmul.f32 %v2217_v33, %v2217_v33  ;;  %v2559_v17 = vadd.f32 %v2558_v56, %v2528_v41  ;;  %v2220_v53 = vadd.f32 %v2219_v27, %v4896_v5 }
 0x1e7   : > { %v3023_v38 = vpack.c.bf16 %v2228_v34, %v2225_v15  ;;  %v3527_v40 = vadd.f32 %v3526_v59, %v3525_v49  ;;  %v4981_v63 = vadd.f32 %v3524_v31, %v4875_v62  ;;  %v2532_v16 = vmul.f32 %v2228_v34, %v2228_v34 }
 0x1e8   : > { %v2560_v11 = vadd.f32 %v2559_v17, %v2529_v13  ;;  %v3018_v36 = vpack.c.bf16 %v2220_v53, %v2217_v33  ;;  %v2491_v6 = vadd.f32 %v2490_v26, %v2220_v53  ;;  %v2530_v3 = vmul.f32 %v2220_v53, %v2220_v53 }
 0x1e9   : > { %3103 = vst [vmem:[%s4965_s14 + $0x18] sm:$0xff] %v3023_v38   ;;  %v4985_v2 = vadd.f32 %v3527_v40, %v4881_v25 }
 0x1ea   : > { %3102 = vst [vmem:[%s4965_s14 + $0x10] sm:$0xff] %v3018_v36   ;;  %v2492_v7 = vadd.f32 %v2491_v6, %v2225_v15  ;;  %v2561_v23 = vadd.f32 %v2560_v11, %v2530_v3  ;;  %v3614_v8 = vpop.f32.mrb[120].mxu0  ;;  %v3528_v60 = vpop.f32.mrb[120].mxu1 }
 0x1eb   : > { %v2241_v5 = vadd.f32 %v3614_v8, %v4926_v54  ;;  %v2232_v39 = vpop.f32.mrb[121].mxu0  ;;  %v3529_v24 = vpop.f32.mrb[121].mxu1 }
 0x1ec   : > { %v2562_v62 = vadd.f32 %v2561_v23, %v2531_v58  ;;  %v2233_v55 = vadd.f32 %v2232_v39, %v4914_v0  ;;  %v2493_v19 = vadd.f32 %v2492_v7, %v2228_v34  ;;  %v3615_v57 = vpop.f32.mrb[122].mxu0  ;;  %v3530_v21 = vadd.f32 %v3529_v24, %v3528_v60  ;;  %v3531_v25 = vpop.f32.mrb[122].mxu1 }
 0x1ed   : > { %v2244_v18 = vadd.f32 %v3615_v57, %v4932_v44  ;;  %v2235_v42 = vpop.f32.mrb[123].mxu0  ;;  %v3532_v56 = vpop.f32.mrb[123].mxu1  ;;  %v2535_v34 = vmul.f32 %v2241_v5, %v2241_v5 }
 0x1ee   : > { %v2494_v15 = vadd.f32 %v2493_v19, %v2233_v55  ;;  %v2533_v43 = vmul.f32 %v2233_v55, %v2233_v55  ;;  %v2563_v41 = vadd.f32 %v2562_v62, %v2532_v16  ;;  %v2236_v54 = vadd.f32 %v2235_v42, %v4920_v51 }
 0x1ef   : > { %v3033_v12 = vpack.c.bf16 %v2244_v18, %v2241_v5  ;;  %v3533_v33 = vadd.f32 %v3532_v56, %v3531_v25  ;;  %v4993_v37 = vadd.f32 %v3530_v21, %v4887_v47  ;;  %v2536_v53 = vmul.f32 %v2244_v18, %v2244_v18 }
 0x1f0   : > { %v2564_v0 = vadd.f32 %v2563_v41, %v2533_v43  ;;  %v3028_v35 = vpack.c.bf16 %v2236_v54, %v2233_v55  ;;  %v2495_v31 = vadd.f32 %v2494_v15, %v2236_v54  ;;  %v2534_v49 = vmul.f32 %v2236_v54, %v2236_v54 }
 0x1f1   : > { %3105 = vst [vmem:[%s4965_s14 + $0x28] sm:$0xff] %v3033_v12   ;;  %v4997_v44 = vadd.f32 %v3533_v33, %v4893_v20 }
 0x1f2   : > { %3104 = vst [vmem:[%s4965_s14 + $0x20] sm:$0xff] %v3028_v35   ;;  %v2496_v27 = vadd.f32 %v2495_v31, %v2241_v5  ;;  %v2565_v26 = vadd.f32 %v2564_v0, %v2534_v49  ;;  %v3618_v13 = vpop.f32.mrb[124].mxu0  ;;  %v3534_v17 = vpop.f32.mrb[124].mxu1 }
 0x1f3   : > { %v2257_v51 = vadd.f32 %v3618_v13, %v4950_v1  ;;  %v2248_v59 = vpop.f32.mrb[125].mxu0  ;;  %v3535_v38 = vpop.f32.mrb[125].mxu1 }
 0x1f4   : > { %v2566_v47 = vadd.f32 %v2565_v26, %v2535_v34  ;;  %v2249_v40 = vadd.f32 %v2248_v59, %v4938_v50  ;;  %v2497_v11 = vadd.f32 %v2496_v27, %v2244_v18  ;;  %v3619_v36 = vpop.f32.mrb[126].mxu0  ;;  %v3536_v6 = vadd.f32 %v3535_v38, %v3534_v17  ;;  %v3537_v20 = vpop.f32.mrb[126].mxu1 }
 0x1f5   : > { %v2260_v3 = vadd.f32 %v3619_v36, %v4956_v46  ;;  %v2251_v58 = vpop.f32.mrb[127].mxu0  ;;  %v3538_v60 = vpop.f32.mrb[127].mxu1  ;;  %v2539_v46 = vmul.f32 %v2257_v51, %v2257_v51 }
 0x1f6   : > { %v2498_v7 = vadd.f32 %v2497_v11, %v2249_v40  ;;  %v2537_v23 = vmul.f32 %v2249_v40, %v2249_v40  ;;  %v2567_v8 = vadd.f32 %v2566_v47, %v2536_v53  ;;  %v2252_v1 = vadd.f32 %v2251_v58, %v4944_v22 }
 0x1f7   : > { %v3043_v5 = vpack.c.bf16 %v2260_v3, %v2257_v51  ;;  %v3539_v39 = vadd.f32 %v3538_v60, %v3537_v20  ;;  %v2128_v16 = vadd.f32 %v3536_v6, %v4899_v28  ;;  %v2540_v15 = vmul.f32 %v2260_v3, %v2260_v3 }
 0x1f8   : > { %v2568_v50 = vadd.f32 %v2567_v8, %v2537_v23  ;;  %v3038_v62 = vpack.c.bf16 %v2252_v1, %v2249_v40  ;;  %v2499_v24 = vadd.f32 %v2498_v7, %v2252_v1  ;;  %v2538_v55 = vmul.f32 %v2252_v1, %v2252_v1 }
 0x1f9   : > { %3107 = vst [vmem:[%s4965_s14 + $0x38] sm:$0xff] %v3043_v5   ;;  %v2131_v19 = vadd.f32 %v3539_v39, %v4905_v10 }
 0x1fa   : > { %3106 = vst [vmem:[%s4965_s14 + $0x30] sm:$0xff] %v3038_v62   ;;  %v2500_v57 = vadd.f32 %v2499_v24, %v2257_v51  ;;  %v2569_v21 = vadd.f32 %v2568_v50, %v2538_v55  ;;  %v3622_v25 = vpop.f32.mrb[128].mxu0  ;;  %v3540_v18 = vpop.f32.mrb[128].mxu1 }
 0x1fb   : > { %v2273_v42 = vadd.f32 %v3622_v25, %v4981_v63  ;;  %v2264_v22 = vpop.f32.mrb[129].mxu0  ;;  %v3541_v41 = vpop.f32.mrb[129].mxu1 }
 0x1fc   : > { %v2570_v43 = vadd.f32 %v2569_v21, %v2539_v46  ;;  %v2265_v28 = vadd.f32 %v2264_v22, %v4969_v61  ;;  %v2501_v56 = vadd.f32 %v2500_v57, %v2260_v3  ;;  %v3623_v54 = vpop.f32.mrb[130].mxu0  ;;  %v3542_v12 = vadd.f32 %v3541_v41, %v3540_v18  ;;  %v3543_v33 = vpop.f32.mrb[130].mxu1 }
 0x1fd   : > { %v2276_v10 = vadd.f32 %v3623_v54, %v4985_v2  ;;  %v2267_v0 = vpop.f32.mrb[131].mxu0  ;;  %v3544_v34 = vpop.f32.mrb[131].mxu1  ;;  %v2543_v2 = vmul.f32 %v2273_v42, %v2273_v42 }
 0x1fe   : > { %v2502_v35 = vadd.f32 %v2501_v56, %v2265_v28  ;;  %v2541_v31 = vmul.f32 %v2265_v28, %v2265_v28  ;;  %v2571_v49 = vadd.f32 %v2570_v43, %v2540_v15  ;;  %v2268_v63 = vadd.f32 %v2267_v0, %v4973_v4 }
 0x1ff   : > { %v3053_v27 = vpack.c.bf16 %v2276_v10, %v2273_v42  ;;  %v3545_v26 = vadd.f32 %v3544_v34, %v3543_v33  ;;  %v2136_v13 = vadd.f32 %v3542_v12, %v4911_v32  ;;  %v2544_v4 = vmul.f32 %v2276_v10, %v2276_v10 }
 0x200   : > { %v2572_v61 = vadd.f32 %v2571_v49, %v2541_v31  ;;  %v3048_v17 = vpack.c.bf16 %v2268_v63, %v2265_v28  ;;  %v2503_v51 = vadd.f32 %v2502_v35, %v2268_v63  ;;  %v2542_v59 = vmul.f32 %v2268_v63, %v2268_v63 }
 0x201   : > { %3109 = vst [vmem:[%s4965_s14 + $0x48] sm:$0xff] %v3053_v27   ;;  %v2139_v53 = vadd.f32 %v3545_v26, %v4917_v48 }
 0x202   : > { %3108 = vst [vmem:[%s4965_s14 + $0x40] sm:$0xff] %v3048_v17   ;;  %v2504_v47 = vadd.f32 %v2503_v51, %v2273_v42  ;;  %v2573_v38 = vadd.f32 %v2572_v61, %v2542_v59  ;;  %v3626_v40 = vpop.f32.mrb[132].mxu0  ;;  %v3546_v11 = vpop.f32.mrb[132].mxu1 }
 0x203   : > { %v2289_v36 = vadd.f32 %v3626_v40, %v2128_v16  ;;  %v2280_v6 = vpop.f32.mrb[133].mxu0  ;;  %v3547_v3 = vpop.f32.mrb[133].mxu1 }
 0x204   : > { %v2574_v20 = vadd.f32 %v2573_v38, %v2543_v2  ;;  %v2281_v32 = vadd.f32 %v2280_v6, %v4993_v37  ;;  %v2505_v58 = vadd.f32 %v2504_v47, %v2276_v10  ;;  %v3627_v7 = vpop.f32.mrb[134].mxu0  ;;  %v3548_v23 = vadd.f32 %v3547_v3, %v3546_v11  ;;  %v3549_v8 = vpop.f32.mrb[134].mxu1 }
 0x205   : > { %v2292_v60 = vadd.f32 %v3627_v7, %v2131_v19  ;;  %v2283_v48 = vpop.f32.mrb[135].mxu0  ;;  %v3550_v50 = vpop.f32.mrb[135].mxu1  ;;  %v2547_v19 = vmul.f32 %v2289_v36, %v2289_v36 }
 0x206   : > { %v2506_v1 = vadd.f32 %v2505_v58, %v2281_v32  ;;  %v2545_v5 = vmul.f32 %v2281_v32, %v2281_v32  ;;  %v2575_v39 = vadd.f32 %v2574_v20, %v2544_v4  ;;  %v2284_v16 = vadd.f32 %v2283_v48, %v4997_v44 }
 0x207   : > { %v3063_v62 = vpack.c.bf16 %v2292_v60, %v2289_v36  ;;  %v3551_v24 = vadd.f32 %v3550_v50, %v3549_v8  ;;  %v2144_v55 = vadd.f32 %v3548_v23, %v4923_v9  ;;  %v2548_v44 = vmul.f32 %v2292_v60, %v2292_v60 }
 0x208   : > { %v2576_v46 = vadd.f32 %v2575_v39, %v2545_v5  ;;  %v3058_v37 = vpack.c.bf16 %v2284_v16, %v2281_v32  ;;  %v2507_v57 = vadd.f32 %v2506_v1, %v2284_v16  ;;  %v2546_v21 = vmul.f32 %v2284_v16, %v2284_v16 }
 0x209   : > { %3111 = vst [vmem:[%s4965_s14 + $0x58] sm:$0xff] %v3063_v62   ;;  %v2147_v25 = vadd.f32 %v3551_v24, %v4929_v52 }
 0x20a   : > { %3110 = vst [vmem:[%s4965_s14 + $0x50] sm:$0xff] %v3058_v37   ;;  %v2508_v18 = vadd.f32 %v2507_v57, %v2289_v36  ;;  %v2577_v42 = vadd.f32 %v2576_v46, %v2546_v21  ;;  %v3630_v22 = vpop.f32.mrb[136].mxu0  ;;  %v3552_v15 = vpop.f32.mrb[136].mxu1 }
 0x20b   : > { %v2305_v43 = vadd.f32 %v3630_v22, %v2144_v55  ;;  %v2296_v41 = vpop.f32.mrb[137].mxu0  ;;  %v3553_v56 = vpop.f32.mrb[137].mxu1 }
 0x20c   : > { %v2578_v28 = vadd.f32 %v2577_v42, %v2547_v19  ;;  %v2297_v54 = vadd.f32 %v2296_v41, %v2136_v13  ;;  %v2509_v9 = vadd.f32 %v2508_v18, %v2292_v60  ;;  %v3631_v12 = vpop.f32.mrb[138].mxu0  ;;  %v3554_v33 = vadd.f32 %v3553_v56, %v3552_v15  ;;  %v3555_v10 = vpop.f32.mrb[138].mxu1 }
 0x20d   : > { %v2308_v0 = vadd.f32 %v3631_v12, %v2147_v25  ;;  %v2299_v35 = vpop.f32.mrb[139].mxu0  ;;  %v3556_v34 = vpop.f32.mrb[139].mxu1  ;;  %v2551_v47 = vmul.f32 %v2305_v43, %v2305_v43 }
 0x20e   : > { %v2510_v52 = vadd.f32 %v2509_v9, %v2297_v54  ;;  %v2549_v31 = vmul.f32 %v2297_v54, %v2297_v54  ;;  %v2579_v49 = vadd.f32 %v2578_v28, %v2548_v44  ;;  %v2300_v63 = vadd.f32 %v2299_v35, %v2139_v53 }
 0x20f   : > { %v3073_v27 = vpack.c.bf16 %v2308_v0, %v2305_v43  ;;  %v3557_v26 = vadd.f32 %v3556_v34, %v3555_v10  ;;  %v2152_v61 = vadd.f32 %v3554_v33, %v4935_v14  ;;  %v2552_v4 = vmul.f32 %v2308_v0, %v2308_v0 }
 0x210   : > { %v2580_v17 = vadd.f32 %v2579_v49, %v2549_v31  ;;  %v3068_v51 = vpack.c.bf16 %v2300_v63, %v2297_v54  ;;  %v2511_v13 = vadd.f32 %v2510_v52, %v2300_v63  ;;  %v2550_v59 = vmul.f32 %v2300_v63, %v2300_v63 }
 0x211   : > { %3113 = vst [vmem:[%s4965_s14 + $0x68] sm:$0xff] %v3073_v27   ;;  %v2155_v2 = vadd.f32 %v3557_v26, %v4941_v29 }
 0x212   : > { %3112 = vst [vmem:[%s4965_s14 + $0x60] sm:$0xff] %v3068_v51   ;;  %v2512_v38 = vadd.f32 %v2511_v13, %v2305_v43  ;;  %v2581_v40 = vadd.f32 %v2580_v17, %v2550_v59  ;;  %v3634_v11 = vpop.f32.mrb[140].mxu0  ;;  %v3558_v36 = vpop.f32.mrb[140].mxu1 }
 0x213   : > { %v2312_v6 = vpop.f32.mrb[141].mxu0  ;;  %v3559_v20 = vpop.f32.mrb[141].mxu1 }
 0x214   : > { %v2582_v53 = vadd.f32 %v2581_v40, %v2551_v47  ;;  %v2313_v3 = vadd.f32 %v2312_v6, %v2152_v61  ;;  %v2513_v32 = vadd.f32 %v2512_v38, %v2308_v0  ;;  %v3635_v14 = vpop.f32.mrb[142].mxu0  ;;  %v3560_v58 = vadd.f32 %v3559_v20, %v3558_v36  ;;  %v3561_v7 = vpop.f32.mrb[142].mxu1 }
 0x215   : > { %v2315_v23 = vpop.f32.mrb[143].mxu0  ;;  %v3562_v48 = vpop.f32.mrb[143].mxu1 }
 0x216   : > { %v2514_v8 = vadd.f32 %v2513_v32, %v2313_v3  ;;  %v2553_v60 = vmul.f32 %v2313_v3, %v2313_v3  ;;  %v2583_v29 = vadd.f32 %v2582_v53, %v2552_v4  ;;  %v2316_v1 = vadd.f32 %v2315_v23, %v2155_v2 }
 0x217   : > { %v2160_v5 = vadd.f32 %v3560_v58, %v4947_v45  ;;  %v3563_v39 = vadd.f32 %v3562_v48, %v3561_v7 }
 0x218   : > { %v2584_v50 = vadd.f32 %v2583_v29, %v2553_v60  ;;  %v3078_v16 = vpack.c.bf16 %v2316_v1, %v2313_v3  ;;  %v2515_v62 = vadd.f32 %v2514_v8, %v2316_v1  ;;  %v2554_v24 = vmul.f32 %v2316_v1, %v2316_v1 }
 0x219   : > { %v2321_v55 = vadd.f32 %v3634_v11, %v2160_v5  ;;  %v2163_v46 = vadd.f32 %v3563_v39, %v4953_v30 }
 0x21a   : > { %3114 = vst [vmem:[%s4965_s14 + $0x70] sm:$0xff] %v3078_v16   ;;  %v2585_v37 = vadd.f32 %v2584_v50, %v2554_v24 }
 0x21b   : > { %v2555_v57 = vmul.f32 %v2321_v55, %v2321_v55  ;;  %v2324_v21 = vadd.f32 %v3635_v14, %v2163_v46  ;;  %v2516_v25 = vadd.f32 %v2515_v62, %v2321_v55 }
 0x21d   : > { %v3083_v19 = vpack.c.bf16 %v2324_v21, %v2321_v55  ;;  %v2556_v18 = vmul.f32 %v2324_v21, %v2324_v21  ;;  %v2517_v42 = vadd.f32 %v2516_v25, %v2324_v21  ;;  %v2586_v22 = vadd.f32 %v2585_v37, %v2555_v57 }
 0x21f   : > { %3115 = vst [vmem:[%s4965_s14 + $0x78] sm:$0xff] %v3083_v19   ;;  %v2518_v45 = vrot.slane %v2517_v42, 4  ;;  %v2587_v15 = vadd.f32 %v2586_v22, %v2556_v18 }
 0x221   : > { %v2519_v43 = vadd.f32 %v2518_v45, %v2517_v42  ;;  %v2588_v41 = vrot.slane %v2587_v15, 4 }
 0x223   : > { %v2520_v44 = vrot.slane %v2519_v43, 2  ;;  %v2589_v28 = vadd.f32 %v2588_v41, %v2587_v15 }
 0x225   : > { %v2521_v56 = vadd.f32 %v2520_v44, %v2519_v43  ;;  %v2590_v30 = vrot.slane %v2589_v28, 2 }
 0x227   : > { %v2522_v54 = vrot.slane %v2521_v56, 1  ;;  %v2591_v9 = vadd.f32 %v2590_v30, %v2589_v28 }
 0x229   : > { %v2523_v12 = vadd.f32 %v2522_v54, %v2521_v56  ;;  %v2592_v33 = vrot.slane %v2591_v9, 1 }
 0x22b   : > { %2524 = vst [vmem:[%s465_s17] sm:$0x1] %v2523_v12  ;;  %v2593_v10 = vadd.f32 %v2592_v33, %v2591_v9 }
 0x22d   : > { %2594 = vst [vmem:[%s465_s17 + $0x1] sm:$0x1] %v2593_v10 }
 0x22e PF: > { %s18_s26 = sadd.s32 1, %s3772_s26   ;;  %s5055_s24 = smov %s3768_s25 }
 0x22f   : > { %p15_p5 = scmp.ge.s32.totalorder %s18_s26, 4   ;;  %s5056_s25 = smov %s5058_s27 }
 0x231   :  { %17 = sbr.rel (!%p15_p5) target bundleno = 2 (0x2), region = 92 }

</bundles_post_ra>
